<compile_context>
chip_gen: v7x
topology: tpu7x:2x2x1
jax: 0.10.0
libtpu: 0.0.40
codegen_flags: <defaults>
</compile_context>

<pallas_src>
import jax
import jax.numpy as jnp
from jax.experimental import pallas as pl
from jax.experimental.pallas import tpu as pltpu


def _linear_add_kernel(x_ref, w_ref, b_ref, r_ref, o_ref):
    """One (tm, tn) output tile, accumulated in-place over the K grid axis."""
    k = pl.program_id(2)

    @pl.when(k == 0)
    def _():
        o_ref[...] = jnp.zeros_like(o_ref)

    o_ref[...] += jnp.dot(
        x_ref[...], w_ref[...], preferred_element_type=jnp.float32
    )

    @pl.when(k == pl.num_programs(2) - 1)
    def _():
        # Fused epilogue: bias broadcast + residual add.
        o_ref[...] += b_ref[...] + r_ref[...]


def linear_add(x, w_t, bias, residual, *, tm=384, tn=384, tk=768):
    """Compute (x @ w_t + bias) + residual with a tiled Pallas kernel.

    x:        (S, K) float32
    w_t:      (K, N) float32   (transpose of PyTorch Linear weight)
    bias:     (N,)   float32
    residual: (S, N) float32
    returns:  (S, N) float32
    """
    S, K = x.shape
    _, N = w_t.shape
    tm = min(tm, S)
    tn = min(tn, N)
    tk = min(tk, K)
    assert S % tm == 0 and N % tn == 0 and K % tk == 0

    bias2d = bias.reshape(1, N)

    grid = (S // tm, N // tn, K // tk)

    cost = pl.CostEstimate(
        flops=2 * S * K * N,
        transcendentals=0,
        bytes_accessed=(S * K + K * N + 2 * S * N + N) * 4,
    )

    return pl.pallas_call(
        _linear_add_kernel,
        out_shape=jax.ShapeDtypeStruct((S, N), x.dtype),
        grid_spec=pltpu.PrefetchScalarGridSpec(
            num_scalar_prefetch=0,
            grid=grid,
            in_specs=[
                pl.BlockSpec((tm, tk), lambda i, j, k: (i, k)),   # x
                pl.BlockSpec((tk, tn), lambda i, j, k: (k, j)),   # w_t
                pl.BlockSpec((1, tn), lambda i, j, k: (0, j)),    # bias
                pl.BlockSpec((tm, tn), lambda i, j, k: (i, j)),   # residual
            ],
            out_specs=pl.BlockSpec((tm, tn), lambda i, j, k: (i, j)),
        ),
        compiler_params=pltpu.CompilerParams(
            dimension_semantics=("parallel", "parallel", "arbitrary"),
            vmem_limit_bytes=32 * 1024 * 1024,
        ),
        cost_estimate=cost,
    )(x, w_t, bias2d, residual)


class MPallas:
    """Mirrors the PyTorch module M: Linear(3072, 768) followed by residual add."""

    def __init__(self, in_features=3072, out_features=768, key=None):
        if key is None:
            key = jax.random.PRNGKey(42)
        kw, kb = jax.random.split(key)
        bound = 1.0 / jnp.sqrt(jnp.float32(in_features))
        # PyTorch Linear stores weight as (out, in); keep that convention here
        # and pass the transpose (K, N) to the kernel.
        self.weight = jax.random.uniform(
            kw, (out_features, in_features), jnp.float32, -bound, bound
        )
        self.bias = jax.random.uniform(
            kb, (out_features,), jnp.float32, -bound, bound
        )

    def __call__(self, x285, x283):
        # x285: (B, S, 3072), x283: (B, S, 768)
        B, S, K = x285.shape
        N = self.weight.shape[0]
        x2d = x285.reshape(B * S, K)
        r2d = x283.reshape(B * S, N)
        out2d = linear_add(x2d, self.weight.T, self.bias, r2d)
        return out2d.reshape(B, S, N)


if __name__ == "__main__":
    key = jax.random.PRNGKey(0)
    k1, k2 = jax.random.split(key)

    B, S, K, N = 1, 384, 3072, 768
    x285 = jax.random.normal(k1, (B, S, K), jnp.float32)
    x283 = jax.random.normal(k2, (B, S, N), jnp.float32)

    model = MPallas(in_features=K, out_features=N)
    out = model(x285, x283)
    jax.block_until_ready(out)

    # Reference check in plain JAX.
    ref = x285 @ model.weight.T + model.bias + x283
    err = jnp.max(jnp.abs(out - ref))
    assert out.shape == (B, S, N), out.shape
    assert err < 1e-3, f"max abs err {err}"

    print("KERNEL_OK")
</pallas_src>

<mosaic_0001>
module attributes {stable_mosaic.version = 11 : i64} {
  func.func @_linear_add_kernel(%arg0: i32, %arg1: i32, %arg2: i32, %arg3: memref<384x768xf32, #tpu.memory_space<vmem>>, %arg4: memref<768x384xf32, #tpu.memory_space<vmem>>, %arg5: memref<1x384xf32, #tpu.memory_space<vmem>>, %arg6: memref<384x384xf32, #tpu.memory_space<vmem>>, %arg7: memref<384x384xf32, #tpu.memory_space<vmem>>) attributes {dimension_semantics = [#tpu.dimension_semantics<parallel>, #tpu.dimension_semantics<parallel>, #tpu.dimension_semantics<arbitrary>], iteration_bounds = array<i64: 1, 2, 4>, scalar_prefetch = 0 : i64, scratch_operands = 0 : i64, tpu.core_type = #tpu.core_type<tc>, window_params = [{transform_indices = @transform_0, window_bounds = array<i64: 384, 768>}, {transform_indices = @transform_1, window_bounds = array<i64: 768, 384>}, {transform_indices = @transform_2, window_bounds = array<i64: 1, 384>}, {transform_indices = @transform_3, window_bounds = array<i64: 384, 384>}, {transform_indices = @transform_4, window_bounds = array<i64: 384, 384>}]} {
    %c0_i32 = arith.constant 0 : i32
    %0 = arith.cmpi eq, %arg2, %c0_i32 : i32
    %1 = arith.extui %0 : i1 to i32
    %c0_i32_0 = arith.constant 0 : i32
    %2 = arith.cmpi ne, %1, %c0_i32_0 : i32
    scf.if %2 {
      %cst_9 = arith.constant 0.000000e+00 : f32
      %12 = vector.broadcast %cst_9 : f32 to vector<384x384xf32>
      %c0_10 = arith.constant 0 : index
      %c0_11 = arith.constant 0 : index
      %13 = vector.load %arg7[%c0_10, %c0_11] : memref<384x384xf32, #tpu.memory_space<vmem>>, vector<384x384xf32>
      tpu.vector_store %arg7[%c0_10, %c0_11], %12 {strides = array<i32>} : memref<384x384xf32, #tpu.memory_space<vmem>>, vector<384x384xf32>,
    } else {
    }
    %c0 = arith.constant 0 : index
    %c0_1 = arith.constant 0 : index
    %3 = vector.load %arg7[%c0, %c0_1] : memref<384x384xf32, #tpu.memory_space<vmem>>, vector<384x384xf32>
    %c0_2 = arith.constant 0 : index
    %c0_3 = arith.constant 0 : index
    %4 = vector.load %arg3[%c0_2, %c0_3] : memref<384x768xf32, #tpu.memory_space<vmem>>, vector<384x768xf32>
    %c0_4 = arith.constant 0 : index
    %c0_5 = arith.constant 0 : index
    %5 = vector.load %arg4[%c0_4, %c0_5] : memref<768x384xf32, #tpu.memory_space<vmem>>, vector<768x384xf32>
    %cst = arith.constant dense<0.000000e+00> : vector<384x384xf32>
    %6 = tpu.matmul %4, %5, %cst {dimension_numbers = #tpu.dot_dimension_numbers<[1], [0], [0], [1], [0, 0, 1, 1], [], []>} : vector<384x768xf32>, vector<768x384xf32>, vector<384x384xf32> -> vector<384x384xf32>
    %7 = arith.addf %3, %6 : vector<384x384xf32>
    %c0_6 = arith.constant 0 : index
    %c0_7 = arith.constant 0 : index
    %8 = vector.load %arg7[%c0_6, %c0_7] : memref<384x384xf32, #tpu.memory_space<vmem>>, vector<384x384xf32>
    tpu.vector_store %arg7[%c0_6, %c0_7], %7 {strides = array<i32>} : memref<384x384xf32, #tpu.memory_space<vmem>>, vector<384x384xf32>,
    %c3_i32 = arith.constant 3 : i32
    %9 = arith.cmpi eq, %arg2, %c3_i32 : i32
    %10 = arith.extui %9 : i1 to i32
    %c0_i32_8 = arith.constant 0 : i32
    %11 = arith.cmpi ne, %10, %c0_i32_8 : i32
    scf.if %11 {
      %c0_9 = arith.constant 0 : index
      %c0_10 = arith.constant 0 : index
      %12 = vector.load %arg7[%c0_9, %c0_10] : memref<384x384xf32, #tpu.memory_space<vmem>>, vector<384x384xf32>
      %c0_11 = arith.constant 0 : index
      %c0_12 = arith.constant 0 : index
      %13 = vector.load %arg5[%c0_11, %c0_12] : memref<1x384xf32, #tpu.memory_space<vmem>>, vector<1x384xf32>
      %c0_13 = arith.constant 0 : index
      %c0_14 = arith.constant 0 : index
      %14 = vector.load %arg6[%c0_13, %c0_14] : memref<384x384xf32, #tpu.memory_space<vmem>>, vector<384x384xf32>
      %15 = vector.broadcast %13 : vector<1x384xf32> to vector<384x384xf32>
      %16 = arith.addf %15, %14 : vector<384x384xf32>
      %17 = arith.addf %12, %16 : vector<384x384xf32>
      %c0_15 = arith.constant 0 : index
      %c0_16 = arith.constant 0 : index
      %18 = vector.load %arg7[%c0_15, %c0_16] : memref<384x384xf32, #tpu.memory_space<vmem>>, vector<384x384xf32>
      tpu.vector_store %arg7[%c0_15, %c0_16], %17 {strides = array<i32>} : memref<384x384xf32, #tpu.memory_space<vmem>>, vector<384x384xf32>,
    } else {
    }
    return
  }
  func.func @transform_0(%arg0: i32, %arg1: i32, %arg2: i32) -> (i32, i32) {
    %c0_i32 = arith.constant 0 : i32
    return %arg0, %arg2 : i32, i32
  }
  func.func @transform_1(%arg0: i32, %arg1: i32, %arg2: i32) -> (i32, i32) {
    %c0_i32 = arith.constant 0 : i32
    return %arg2, %arg1 : i32, i32
  }
  func.func @transform_2(%arg0: i32, %arg1: i32, %arg2: i32) -> (i32, i32) {
    %c0_i32 = arith.constant 0 : i32
    %c0_i32_0 = arith.constant 0 : i32
    return %c0_i32, %arg1 : i32, i32
  }
  func.func @transform_3(%arg0: i32, %arg1: i32, %arg2: i32) -> (i32, i32) {
    %c0_i32 = arith.constant 0 : i32
    return %arg0, %arg1 : i32, i32
  }
  func.func @transform_4(%arg0: i32, %arg1: i32, %arg2: i32) -> (i32, i32) {
    %c0_i32 = arith.constant 0 : i32
    return %arg0, %arg1 : i32, i32
  }
}

</mosaic_0001>

<bundles_post_ra>
// kernel: tpu_custom_call.1
= control target key start
LH: loop header
LB: loop body
LE: loop exit
PB: predicated region body
PF: predicated region fallthrough
CT: control target
= control target key end

     0   :  { %s7990_s0 = inlined_call_operand.hbm [shape: f32[384,3072], index: 0, kind: input, shape index: {}]   ;;  %s7991_s1 = inlined_call_operand.hbm [shape: f32[3072,768], index: 1, kind: input, shape index: {}]   ;;  %s7992_s2 = inlined_call_operand.hbm [shape: f32[1,768], index: 2, kind: input, shape index: {}]   ;;  %s7993_s3 = inlined_call_operand.hbm [shape: f32[384,768], index: 3, kind: input, shape index: {}]   ;;  %s7994_s4 = inlined_call_operand.hbm [shape: f32[384,768], index: 4, kind: output, shape index: {}]  }
   0x1   :  { %8012 = sst [smem:[#allocation26_spill]] %s7990_s0 }
   0x2   :  { %8013 = sst [smem:[#allocation27_spill]] %s7991_s1 }
   0x3   :  { %8014 = sst [smem:[#allocation28_spill]] %s7993_s3 }
   0x4   :  { %8015 = sst [smem:[#allocation29_spill]] %s7994_s4 }
   0x5   :  { %9 = vsyncpa [#allocation3], 0 }
   0x6   :  { %11 = vsyncpa [#allocation3 + $0x1], 0 }
   0x7   :  { %12 = vsyncpa [#allocation6], 0 }
   0x8   :  { %14 = vsyncpa [#allocation6 + $0x1], 0 }
   0x9   :  { %15 = vsyncpa [#allocation9], 0 }
   0xa   :  { %17 = vsyncpa [#allocation9 + $0x1], 0 }
   0xb   :  { %18 = vsyncpa [#allocation4], 0 }
   0xc   :  { %20 = vsyncpa [#allocation4 + $0x1], 0  ;;  %s5456_s15 = smov 0   ;;  %s5458_s16 = smov 0  }
   0xd   :  { %s5460_s17 = smov 0   ;;  %s5462_s18 = smov 0  }
   0xe   :  { %s5464_s19 = smov 0   ;;  %s5466_s20 = smov 0  }
   0xf   :  { %s5468_s21 = smov 0   ;;  %s5470_s22 = smov 0  }
  0x10   :  { %s5472_s23 = smov 0   ;;  %s5474_s24 = smov 0  }
  0x11   :  { %s5476_s25 = smov 0   ;;  %s5478_s26 = smov 0  }
  0x12   :  { %s5480_s27 = smov 0   ;;  %s5482_s28 = smov 0  }
  0x13 LB: > { %8016 = sst [smem:[#allocation16_spill]] %s5382_s20  ;;  %s38_s29 = sadd.s32 1, %s5406_s26  ;;  %s5414_s28 = sphi %s5482_s28, %s26_s28   ;;  %s5410_s27 = sphi %s5480_s27, %s8074_s27   ;;  %s5406_s26 = sphi %s5478_s26, %s8064_s26   ;;  %s5402_s25 = sphi %s5476_s25, %s8073_s25   ;;  %s5398_s24 = sphi %s5474_s24, %s8063_s24   ;;  %s5394_s23 = sphi %s5472_s23, %s8062_s23   ;;  %s5390_s22 = sphi %s5470_s22, %s8072_s22   ;;  %s5386_s21 = sphi %s5468_s21, %s8071_s21   ;;  %s5382_s20 = sphi %s5466_s20, %s8060_s20   ;;  %s5378_s19 = sphi %s5464_s19, %s8070_s19   ;;  %s5374_s18 = sphi %s5462_s18, %s8069_s18   ;;  %s5370_s17 = sphi %s5460_s17, %s8068_s17   ;;  %s5366_s16 = sphi %s5458_s16, %s8067_s16   ;;  %s5362_s15 = sphi %s5456_s15, %s8066_s15  }
  0x14   : > { %8017 = sst [smem:[#allocation17_spill]] %s5394_s23  ;;  %s41_s30 = sadd.s32 1, %s5410_s27 }
  0x15   : > { %8018 = sst [smem:[#allocation18_spill]] %s5398_s24  ;;  %p39_p0 = scmp.ge.s32.totalorder %s38_s29, 4 }
  0x16   : > { %8019 = sst [smem:[#allocation19_spill]] %s5402_s25  ;;  %p8000_p1 = scmp.eq.s32.totalorder %s5414_s28, 0 }
  0x17   : > { %8020 = sst [smem:[#allocation20_spill]] %s5406_s26  ;;  %s82_s5 = sadd.s32 1, %s5382_s20 }
  0x18   : > { %p89_p2 = scmp.ne.s32.totalorder %s5382_s20, %s5378_s19  ;;  %s8076_s29 = smov (%p39_p0, %s38_s29), 0 }
  0x19   : > { %8021 = sst [smem:[#allocation21_spill]] %s8076_s29  ;;  %s8078_s30 = smov (!%p39_p0, %s41_s30), %s5410_s27 }
  0x1a   : > { %s5537_s6 = ssub.s32 %s5406_s26, %s8076_s29  ;;  %p91_p3 = por %p89_p2, %p8000_p1 }
  0x1b   : > { %p43_p4 = scmp.ge.s32.totalorder %s8078_s30, 2  ;;  %p7999_p6 = scmp.lt.s32.totalorder %s5414_s28, 8 }
  0x1c   : > { %s225_s7 = sand.u32 1, %s5414_s28   ;;  %s227_s10 = sand.u32 1, %s5382_s20  }
  0x1d   : > { %s8080_s30 = smov (%p43_p4, %s8078_s30), 0  ;;  %s4976_s11 = smul.u32 2304, %s227_s10 }
  0x1e   : > { %8022 = sst [smem:[#allocation22_spill]] %s8080_s30  ;;  %s5549_s8 = ssub.s32 %s5410_s27, %s8080_s30 }
  0x1f   : > { %s79_s9 = sor.u32 %s5549_s8, %s5537_s6  ;;  %p5556_p8 = pnand %p7999_p6, %p91_p3 }
  0x20   : > { %p80_p7 = scmp.eq.s32.totalorder %s79_s9, 0  ;;  %s231_s14 = smul.u32 3, %s5410_s27 }
  0x21   : > { %s5012_s29 = smul.u32 576, %s5406_s26  ;;  %s229_s4 = scalar_lea.vmem [#allocation5], %s4976_s11 }
  0x22   : > { %s5561_s13 = scalar_select %p80_p7, %s5382_s20, %s82_s5  }
  0x23   : > { %s239_s25 = sshll.u32 %s229_s4, 4  ;;  %s236_s30 = sadd.s32 %s5012_s29, %s231_s14  ;;  %s5565_s25 = int_to_ptr.vmem [resolvable:$true] %s239_s25 }
  0x24   : > { %8024 = sst [smem:[#allocation23_spill]] %s5561_s13  ;;  %s4434_s24 = sshll.u32 %s236_s30, 7 }
  0x25   : > { %s8025_s1 = sld [smem:[#allocation27_spill]]  ;;  %p4437_p9 = scmp.ge.s32.totalorder %s5414_s28, 1 }
  0x26   : > { %s5573_s5 = scalar_lea.sflag [#allocation6], %s225_s7  ;;  %p5138_p11 = pneg %p5556_p8 }
  0x2b   : > { %s5570_s10 = scalar_lea.hbm %s8025_s1, %s4434_s24  ;;  %s5141_s3 = scalar_lea.hbm %s8025_s1, 294912 }
  0x2c   : > { %s5136_s13 = scalar_lea.hbm %s5570_s10, 36864  ;;  %p5142_p0 = scmp.lt.u32.totalorder %s5570_s10, %s8025_s1 }
  0x2d   : > { %p5137_p10 = scmp.ne.s32.totalorder %s5570_s10, %s5136_s13  ;;  %p5143_p2 = scmp.lt.u32.totalorder %s5141_s3, %s5136_s13 }
  0x2e   : > { %p5145_p4 = scmp.lt.u32.totalorder %s5136_s13, %s5570_s10 }
  0x2f   : > { %p5139_p12 = pnand %p5138_p11, %p5137_p10  ;;  %p5144_p3 = por %p5143_p2, %p5142_p0 }
  0x31   : > { %p5140_p13 = pneg %p5139_p12  ;;  %p5146_p7 = por %p5145_p4, %p5144_p3 }
  0x33   : > { %p5147_p5 = pnand %p5146_p7, %p5140_p13 }
  0x35   : > { %5150 = shalt.err (!%p5147_p5)
}
  0x36   : > { %s5151_s7 = scalar_lea.vmem %s5565_s25, 36864  ;;  %s5416_s11 = smov [#allocation5]  }
  0x37   : > { %p5152_p10 = scmp.ne.s32.totalorder %s5565_s25, %s5151_s7  ;;  %s5156_s14 = sshll.u32 %s5416_s11, 4  ;;  %s5157_s14 = int_to_ptr.vmem [resolvable:$false] %s5156_s14 }
  0x38   : > { %s5158_s9 = scalar_lea.vmem %s5157_s14, 73728  ;;  %p5159_p1 = scmp.lt.s32.totalorder %s5565_s25, %s5157_s14 }
  0x39   : > { %p5154_p12 = pnand %p5152_p10, %p5138_p11  ;;  %p5160_p0 = scmp.lt.s32.totalorder %s5158_s9, %s5151_s7 }
  0x3b   : > { %p5155_p6 = pneg %p5154_p12  ;;  %p5161_p2 = por %p5160_p0, %p5159_p1 }
  0x3d   : > { %p5162_p3 = pnand %p5161_p2, %p5155_p6 }
  0x3f   : > { %5165 = shalt.err (!%p5162_p3)
}
  0x40   : > { %s8003_s13 = smov 768   ;;  %s8001_s4 = smov 384  }
  0x41   : > { %s8002_s29 = smov 24   ;;  %p290_p1 = scmp.lt.s32.totalorder %s5414_s28, 9 }
  0x42   : > { %5000 = dma.hbm_to_vmem [thread:$0]  (!%p5556_p8), %s5570_s10, 36864, %s5565_s25, %s5573_s5, %s8003_s13, %s8001_s4, %s8002_s29  }
  0x43   : > { %p5607_p5 = pnand %p4437_p9, %p290_p1  ;;  %p52_p6 = scmp.eq.s32.totalorder %s5537_s6, 0 }
  0x44   : > { %s54_s24 = sadd.s32 1, %s5394_s23  ;;  %p61_p11 = scmp.ne.s32.totalorder %s5394_s23, %s5390_s22 }
  0x45   : > { %s5618_s30 = scalar_select %p52_p6, %s5394_s23, %s54_s24  }
  0x46   : > { %p8028_p4 = scmp.eq.s32.totalorder %s5414_s28, 0  ;;  %s201_s7 = sand.u32 1, %s5394_s23  }
  0x47   : > { %8027 = sst [smem:[#allocation24_spill]] %s5618_s30  ;;  %s4975_s12 = smul.u32 2304, %s201_s7 }
  0x48   : > { %p63_p7 = por %p8028_p4, %p61_p11  ;;  %s4443_s11 = smul.u32 768, %s5406_s26 }
  0x49   : > { %p8029_p10 = scmp.lt.s32.totalorder %s5414_s28, 8  ;;  %s8031_s0 = sld [smem:[#allocation26_spill]] }
  0x4a   : > { %s205_s9 = scalar_lea.vmem [#allocation2], %s4975_s12  ;;  %s5637_s4 = scalar_lea.sflag [#allocation3], %s201_s7 }
  0x4b   : > { %p5626_p12 = pnand %p8029_p10, %p63_p7  ;;  %s215_s24 = sshll.u32 %s205_s9, 4  ;;  %s5635_s24 = int_to_ptr.vmem [resolvable:$true] %s215_s24 }
  0x4d   : > { %p5168_p9 = pneg %p5626_p12 }
  0x4f   : > { %s5633_s6 = scalar_lea.hbm %s8031_s0, %s4443_s11  ;;  %s5171_s14 = scalar_lea.hbm %s8031_s0, 147456 }
  0x50   : > { %s5166_s29 = scalar_lea.hbm %s5633_s6, 36864  ;;  %p5172_p3 = scmp.lt.u32.totalorder %s5633_s6, %s8031_s0 }
  0x51   : > { %p5167_p8 = scmp.ne.s32.totalorder %s5633_s6, %s5166_s29  ;;  %p5173_p1 = scmp.lt.u32.totalorder %s5171_s14, %s5166_s29 }
  0x52   : > { %p5175_p11 = scmp.lt.u32.totalorder %s5166_s29, %s5633_s6 }
  0x53   : > { %p5169_p0 = pnand %p5168_p9, %p5167_p8  ;;  %p5174_p6 = por %p5173_p1, %p5172_p3 }
  0x55   : > { %p5170_p2 = pneg %p5169_p0  ;;  %p5176_p4 = por %p5175_p11, %p5174_p6 }
  0x57   : > { %p5177_p7 = pnand %p5176_p4, %p5170_p2 }
  0x59   : > { %5180 = shalt.err (!%p5177_p7)
}
  0x5a   : > { %s5181_s7 = scalar_lea.vmem %s5635_s24, 36864  ;;  %s5420_s12 = smov [#allocation2]  }
  0x5b   : > { %p5182_p10 = scmp.ne.s32.totalorder %s5635_s24, %s5181_s7  ;;  %s5186_s9 = sshll.u32 %s5420_s12, 4  ;;  %s5187_s9 = int_to_ptr.vmem [resolvable:$false] %s5186_s9 }
  0x5c   : > { %s5188_s1 = scalar_lea.vmem %s5187_s9, 73728  ;;  %p5189_p13 = scmp.lt.s32.totalorder %s5635_s24, %s5187_s9 }
  0x5d   : > { %p5184_p8 = pnand %p5182_p10, %p5168_p9  ;;  %p5190_p3 = scmp.lt.s32.totalorder %s5188_s1, %s5181_s7 }
  0x5f   : > { %p5185_p0 = pneg %p5184_p8  ;;  %p5191_p1 = por %p5190_p3, %p5189_p13 }
  0x61   : > { %p5192_p6 = pnand %p5191_p1, %p5185_p0 }
  0x63   : > { %5195 = shalt.err (!%p5192_p6)
}
  0x64   : > { %s5421_s13 = smov 3072   ;;  %s5422_s29 = smov 48  }
  0x65   : > { %s8032_s11 = smov 768   ;;  %s5667_s10 = sadd.s32 4294967295, %s5414_s28  }
  0x66   : > { %4997 = dma.hbm_to_vmem [thread:$0]  (!%p5626_p12), %s5633_s6, 36864, %s5635_s24, %s5637_s4, %s5421_s13, %s8032_s11, %s5422_s29  }
  0x67   : > { %s4430_s14 = sadd.s32 4294967294, %s5414_s28   ;;  %p68_p13 = scmp.eq.s32.totalorder %s5667_s10, 0 }
  0x68   : > { %p106_p9 = scmp.eq.s32.totalorder %s5549_s8, 0  ;;  %s108_s7 = sadd.s32 1, %s5370_s17 }
  0x69   : > { %p8033_p2 = scmp.ne.s32.totalorder %s5390_s22, %s5386_s21  ;;  %p8035_p4 = scmp.ne.s32.totalorder %s5378_s19, %s5374_s18 }
  0x6a   : > { %s5688_s4 = scalar_select %p106_p9, %s5370_s17, %s108_s7  }
  0x6b   : > { %p5676_p11 = por %p68_p13, %p8033_p2  ;;  %p5683_p7 = por %p8035_p4, %p68_p13 }
  0x6c   : > { %8037 = sst [smem:[#allocation25_spill]] %s5688_s4  ;;  %p115_p12 = scmp.ne.s32.totalorder %s5370_s17, %s5366_s16 }
  0x6d   : > { %s8034_s12 = scalar_select %p5676_p11, 1, 0 }
  0x6e   : > { %s8036_s25 = scalar_select %p5683_p7, 1, 0 }
  0x6f   : > { %p121_p10 = scmp.ne.s32.totalorder %s5366_s16, %s5362_s15  ;;  %p175_p8 = scmp.eq.s32.totalorder %s5667_s10, 7 }
  0x70   : > { %p181_p0 = scmp.eq.s32.totalorder %s4430_s14, 7  ;;  %p8038_p3 = scmp.eq.s32.totalorder %s5414_s28, 0 }
  0x71   : > { %p5697_p6 = por %p121_p10, %p68_p13  ;;  %p5701_p2 = por %p175_p8, %p115_p12 }
  0x72   : > { %p117_p1 = por %p115_p12, %p8038_p3  ;;  %p5705_p4 = por %p181_p0, %p121_p10 }
  0x73   : > { %s8039_s21 = scalar_select %p5697_p6, 1, 0 }
  0x74   : > { %s8040_s8 = scalar_select %p5701_p2, 1, 0 }
  0x75   : > { %s8041_s18 = scalar_select %p5705_p4, 1, 0 }
  0x76   : > { %s5710_s6 = sand.u32 1, %s5370_s17   ;;  %s4444_s24 = smul.u32 48, %s5410_s27 }
  0x77   : > { %s4978_s9 = smul.u32 3, %s5710_s6  ;;  %p8042_p9 = scmp.lt.s32.totalorder %s5414_s28, 8 }
  0x78   : > { %s5723_s14 = scalar_lea.hbm %s7992_s2, %s4444_s24  ;;  %s4979_s26 = smul.u32 1152, %s5710_s6 }
  0x79   : > { %p5716_p3 = pnand %p8042_p9, %p117_p1  ;;  %s253_s7 = scalar_lea.vmem [#allocation7], %s4978_s9 }
  0x7a   : > { %s261_s0 = sshll.u32 %s253_s7, 4  ;;  %s4445_s30 = smul.u32 384, %s5410_s27  ;;  %s5726_s0 = int_to_ptr.vmem [resolvable:$true] %s261_s0 }
  0x7b   : > { %s5196_s23 = scalar_lea.hbm %s5723_s14, 48  ;;  %p5198_p12 = pneg %p5716_p3 }
  0x7c   : > { %p5197_p13 = scmp.ne.s32.totalorder %s5723_s14, %s5196_s23  ;;  %s5201_s29 = scalar_lea.hbm %s7992_s2, 96 }
  0x7d   : > { %p5202_p0 = scmp.lt.u32.totalorder %s5723_s14, %s7992_s2  ;;  %p5203_p1 = scmp.lt.u32.totalorder %s5201_s29, %s5196_s23 }
  0x7e   : > { %p5199_p10 = pnand %p5198_p12, %p5197_p13  ;;  %p5205_p4 = scmp.lt.u32.totalorder %s5196_s23, %s5723_s14 }
  0x7f   : > { %p5204_p9 = por %p5203_p1, %p5202_p0 }
  0x80   : > { %p5200_p8 = pneg %p5199_p10 }
  0x81   : > { %p5206_p2 = por %p5205_p4, %p5204_p9 }
  0x83   : > { %p5207_p6 = pnand %p5206_p2, %p5200_p8 }
  0x85   : > { %5210 = shalt.err (!%p5207_p6)
}
  0x86   : > { %s5211_s9 = scalar_lea.vmem %s5726_s0, 48  ;;  %s5423_s7 = smov [#allocation7]  }
  0x87   : > { %p5212_p13 = scmp.ne.s32.totalorder %s5726_s0, %s5211_s9  ;;  %s5216_s24 = sshll.u32 %s5423_s7, 4  ;;  %s5217_s24 = int_to_ptr.vmem [resolvable:$false] %s5216_s24 }
  0x88   : > { %s5218_s20 = scalar_lea.vmem %s5217_s24, 96  ;;  %p5219_p11 = scmp.lt.s32.totalorder %s5726_s0, %s5217_s24 }
  0x89   : > { %p5214_p10 = pnand %p5212_p13, %p5198_p12  ;;  %p5220_p0 = scmp.lt.s32.totalorder %s5218_s20, %s5211_s9 }
  0x8b   : > { %p5215_p7 = pneg %p5214_p10  ;;  %p5221_p1 = por %p5220_p0, %p5219_p11 }
  0x8d   : > { %p5222_p4 = pnand %p5221_p1, %p5215_p7 }
  0x8f   : > { %5225 = shalt.err (!%p5222_p4)
}
  0x90   : > { %5003 = dma.hbm_to_vmem [thread:$0]  (!%p5716_p3), %s5723_s14, 48, %s5726_s0, %s5573_s5  }
  0x91   : > { %s8044_s13 = sld [smem:[#allocation28_spill]]  ;;  %s272_s9 = scalar_lea.vmem [#allocation8], %s4979_s26 }
  0x92   : > { %s282_s7 = sshll.u32 %s272_s9, 4  ;;  %s269_s24 = scalar_lea.sflag [#allocation9], %s5710_s6  ;;  %s5764_s7 = int_to_ptr.vmem [resolvable:$true] %s282_s7 }
  0x97   : > { %s5760_s29 = scalar_lea.hbm %s8044_s13, %s4445_s30  ;;  %s5231_s30 = scalar_lea.hbm %s8044_s13, 36864 }
  0x98   : > { %s5226_s20 = scalar_lea.hbm %s5760_s29, 18432  ;;  %p5232_p2 = scmp.lt.u32.totalorder %s5760_s29, %s8044_s13 }
  0x99   : > { %p5227_p11 = scmp.ne.s32.totalorder %s5760_s29, %s5226_s20  ;;  %p5233_p8 = scmp.lt.u32.totalorder %s5231_s30, %s5226_s20 }
  0x9a   : > { %p5235_p13 = scmp.lt.u32.totalorder %s5226_s20, %s5760_s29 }
  0x9b   : > { %p5229_p7 = pnand %p5227_p11, %p5198_p12  ;;  %p5234_p9 = por %p5233_p8, %p5232_p2 }
  0x9d   : > { %p5230_p6 = pneg %p5229_p7  ;;  %p5236_p10 = por %p5235_p13, %p5234_p9 }
  0x9f   : > { %p5237_p0 = pnand %p5236_p10, %p5230_p6 }
  0xa1   : > { %5240 = shalt.err (!%p5237_p0)
}
  0xa2   : > { %s5241_s26 = scalar_lea.vmem %s5764_s7, 18432  ;;  %s5424_s4 = smov [#allocation8]  }
  0xa3   : > { %p5242_p1 = scmp.ne.s32.totalorder %s5764_s7, %s5241_s26  ;;  %s5246_s9 = sshll.u32 %s5424_s4, 4  ;;  %s5247_s9 = int_to_ptr.vmem [resolvable:$false] %s5246_s9 }
  0xa4   : > { %s5248_s0 = scalar_lea.vmem %s5247_s9, 36864  ;;  %p5249_p7 = scmp.lt.s32.totalorder %s5764_s7, %s5247_s9 }
  0xa5   : > { %p5244_p4 = pnand %p5242_p1, %p5198_p12  ;;  %p5250_p2 = scmp.lt.s32.totalorder %s5248_s0, %s5241_s26 }
  0xa7   : > { %p5245_p11 = pneg %p5244_p4  ;;  %p5251_p8 = por %p5250_p2, %p5249_p7 }
  0xa9   : > { %p5252_p9 = pnand %p5251_p8, %p5245_p11 }
  0xab   : > { %5255 = shalt.err (!%p5252_p9)
}
  0xac   : > { %s8045_s20 = smov 24   ;;  %s8046_s5 = smov 384  }
  0xad   : > { %5006 = dma.hbm_to_vmem [thread:$0]  (!%p5716_p3), %s5760_s29, 18432, %s5764_s7, %s269_s24, %s8032_s11, %s8046_s5, %s8045_s20  }
  0xae   : > { %294 = sbr.rel (%p5607_p5) target bundleno = 1266 (0x4f2), region = 36  ;;  %s296_s30 = sand.u32 (!%p5607_p5), 1, %s5390_s22  }
  0xaf   : > { %s4980_s14 = smul.u32 (!%p5607_p5), 2304, %s296_s30  ;;  %s297_s23 = scalar_lea.sflag (!%p5607_p5), [#allocation3], %s296_s30 }
  0xb0   : > { %p8047_p12 = scmp.ne.s32.totalorder (!%p5607_p5), %s8034_s12, 0 }
  0xb1   : > { %s5798_s26 = scalar_lea.vmem (!%p5607_p5), [#allocation2], %s4980_s14 }
  0xb5   : > { %5341 = dma.done.wait (%p8047_p12), %s297_s23, 36864  }
  0xb6   : > { %5343 = vsyncadd (%p8047_p12), %s297_s23, 4294930432  ;;  %s305_s6 = sand.u32 1, %s5667_s10   ;;  %s307_s11 = sand.u32 1, %s5378_s19  }
  0xb7   : > { %s4981_s1 = smul.u32 2304, %s307_s11  ;;  %s306_s3 = scalar_lea.sflag [#allocation6], %s305_s6 }
  0xb8   : > { %p8048_p5 = scmp.ne.s32.totalorder %s8036_s25, 0 }
  0xb9   : > { %s5806_s29 = scalar_lea.vmem [#allocation5], %s4981_s1 }
  0xba   : > { %5345 = dma.done.wait (%p8048_p5), %s306_s3, 36864  }
  0xbb   : > { %5347 = vsyncadd (%p8048_p5), %s306_s3, 4294930432  ;;  %s5813_s7 = sand.u32 1, %s5366_s16   ;;  %p8049_p3 = scmp.ne.s32.totalorder %s8039_s21, 0 }
  0xbc   : > { %s4982_s12 = smul.u32 3, %s5813_s7 }
  0xbe   : > { %s5816_s24 = scalar_lea.vmem [#allocation7], %s4982_s12 }
  0xbf   : > { %5349 = dma.done.wait (%p8049_p3), %s306_s3, 48  }
  0xc0   : > { %5351 = vsyncadd (%p8049_p3), %s306_s3, 4294967248  ;;  %s4983_s10 = smul.u32 1152, %s5813_s7  ;;  %s324_s4 = scalar_lea.sflag [#allocation9], %s5813_s7 }
  0xc2   : > { %s5824_s25 = scalar_lea.vmem [#allocation8], %s4983_s10 }
  0xc3   : > { %5353 = dma.done.wait (%p8049_p3), %s324_s4, 18432  }
  0xc4   : > { %5355 = vsyncadd (%p8049_p3), %s324_s4, 4294948864  ;;  %s5830_s9 = scalar_lea.vmem [#allocation10], %s4983_s10  ;;  %s8050_s0 = sld [smem:[#allocation18_spill]] }
  0xca   : > { %p4438_p6 = scmp.ne.s32.totalorder %s8050_s0, 0 }
  0xcb   : > { %v5425_v0 = vmov (!%p4438_p6), 0.0  }
  0xcc   : > { %379 = sbr.rel (%p4438_p6) target bundleno = 276 (0x114), region = 56  ;;  %380 = vst [vmem:[%s5830_s9] sm:$0xff] (!%p4438_p6), %v5425_v0  ;;  %381 = vst [vmem:[%s5830_s9 + $0x8] sm:$0xff] (!%p4438_p6), %v5425_v0 }
  0xcd   : > { %382 = vst [vmem:[%s5830_s9 + $0x10] sm:$0xff] (!%p4438_p6), %v5425_v0  ;;  %383 = vst [vmem:[%s5830_s9 + $0x18] sm:$0xff] (!%p4438_p6), %v5425_v0 }
  0xce   : > { %384 = vst [vmem:[%s5830_s9 + $0x20] sm:$0xff] (!%p4438_p6), %v5425_v0  ;;  %385 = vst [vmem:[%s5830_s9 + $0x28] sm:$0xff] (!%p4438_p6), %v5425_v0 }
  0xcf   : > { %386 = vst [vmem:[%s5830_s9 + $0x30] sm:$0xff] (!%p4438_p6), %v5425_v0  ;;  %387 = vst [vmem:[%s5830_s9 + $0x38] sm:$0xff] (!%p4438_p6), %v5425_v0 }
  0xd0   : > { %388 = vst [vmem:[%s5830_s9 + $0x40] sm:$0xff] (!%p4438_p6), %v5425_v0  ;;  %389 = vst [vmem:[%s5830_s9 + $0x48] sm:$0xff] (!%p4438_p6), %v5425_v0 }
  0xd1   : > { %390 = vst [vmem:[%s5830_s9 + $0x50] sm:$0xff] (!%p4438_p6), %v5425_v0  ;;  %391 = vst [vmem:[%s5830_s9 + $0x58] sm:$0xff] (!%p4438_p6), %v5425_v0 }
  0xd2   : > { %392 = vst [vmem:[%s5830_s9 + $0x60] sm:$0xff] (!%p4438_p6), %v5425_v0  ;;  %393 = vst [vmem:[%s5830_s9 + $0x68] sm:$0xff] (!%p4438_p6), %v5425_v0 }
  0xd3   : > { %394 = vst [vmem:[%s5830_s9 + $0x70] sm:$0xff] %v5425_v0  ;;  %395 = vst [vmem:[%s5830_s9 + $0x78] sm:$0xff] %v5425_v0 }
  0xd4   : > { %396 = vst [vmem:[%s5830_s9 + $0x80] sm:$0xff] %v5425_v0  ;;  %397 = vst [vmem:[%s5830_s9 + $0x88] sm:$0xff] %v5425_v0 }
  0xd5   : > { %398 = vst [vmem:[%s5830_s9 + $0x90] sm:$0xff] %v5425_v0  ;;  %399 = vst [vmem:[%s5830_s9 + $0x98] sm:$0xff] %v5425_v0 }
  0xd6   : > { %400 = vst [vmem:[%s5830_s9 + $0xa0] sm:$0xff] %v5425_v0  ;;  %401 = vst [vmem:[%s5830_s9 + $0xa8] sm:$0xff] %v5425_v0 }
  0xd7   : > { %402 = vst [vmem:[%s5830_s9 + $0xb0] sm:$0xff] %v5425_v0  ;;  %403 = vst [vmem:[%s5830_s9 + $0xb8] sm:$0xff] %v5425_v0 }
  0xd8   : > { %404 = vst [vmem:[%s5830_s9 + $0xc0] sm:$0xff] %v5425_v0  ;;  %405 = vst [vmem:[%s5830_s9 + $0xc8] sm:$0xff] %v5425_v0 }
  0xd9   : > { %406 = vst [vmem:[%s5830_s9 + $0xd0] sm:$0xff] %v5425_v0  ;;  %407 = vst [vmem:[%s5830_s9 + $0xd8] sm:$0xff] %v5425_v0 }
  0xda   : > { %408 = vst [vmem:[%s5830_s9 + $0xe0] sm:$0xff] %v5425_v0  ;;  %409 = vst [vmem:[%s5830_s9 + $0xe8] sm:$0xff] %v5425_v0 }
  0xdb   : > { %410 = vst [vmem:[%s5830_s9 + $0xf0] sm:$0xff] %v5425_v0  ;;  %411 = vst [vmem:[%s5830_s9 + $0xf8] sm:$0xff] %v5425_v0 }
  0xdc   : > { %412 = vst [vmem:[%s5830_s9 + $0x100] sm:$0xff] %v5425_v0  ;;  %413 = vst [vmem:[%s5830_s9 + $0x108] sm:$0xff] %v5425_v0 }
  0xdd   : > { %414 = vst [vmem:[%s5830_s9 + $0x110] sm:$0xff] %v5425_v0  ;;  %415 = vst [vmem:[%s5830_s9 + $0x118] sm:$0xff] %v5425_v0 }
  0xde   : > { %416 = vst [vmem:[%s5830_s9 + $0x120] sm:$0xff] %v5425_v0  ;;  %417 = vst [vmem:[%s5830_s9 + $0x128] sm:$0xff] %v5425_v0 }
  0xdf   : > { %418 = vst [vmem:[%s5830_s9 + $0x130] sm:$0xff] %v5425_v0  ;;  %419 = vst [vmem:[%s5830_s9 + $0x138] sm:$0xff] %v5425_v0 }
  0xe0   : > { %420 = vst [vmem:[%s5830_s9 + $0x140] sm:$0xff] %v5425_v0  ;;  %421 = vst [vmem:[%s5830_s9 + $0x148] sm:$0xff] %v5425_v0 }
  0xe1   : > { %422 = vst [vmem:[%s5830_s9 + $0x150] sm:$0xff] %v5425_v0  ;;  %423 = vst [vmem:[%s5830_s9 + $0x158] sm:$0xff] %v5425_v0 }
  0xe2   : > { %424 = vst [vmem:[%s5830_s9 + $0x160] sm:$0xff] %v5425_v0  ;;  %425 = vst [vmem:[%s5830_s9 + $0x168] sm:$0xff] %v5425_v0 }
  0xe3   : > { %426 = vst [vmem:[%s5830_s9 + $0x170] sm:$0xff] %v5425_v0  ;;  %427 = vst [vmem:[%s5830_s9 + $0x178] sm:$0xff] %v5425_v0 }
  0xe4   : > { %428 = vst [vmem:[%s5830_s9 + $0x180] sm:$0xff] %v5425_v0  ;;  %429 = vst [vmem:[%s5830_s9 + $0x188] sm:$0xff] %v5425_v0 }
  0xe5   : > { %430 = vst [vmem:[%s5830_s9 + $0x190] sm:$0xff] %v5425_v0  ;;  %431 = vst [vmem:[%s5830_s9 + $0x198] sm:$0xff] %v5425_v0 }
  0xe6   : > { %432 = vst [vmem:[%s5830_s9 + $0x1a0] sm:$0xff] %v5425_v0  ;;  %433 = vst [vmem:[%s5830_s9 + $0x1a8] sm:$0xff] %v5425_v0 }
  0xe7   : > { %434 = vst [vmem:[%s5830_s9 + $0x1b0] sm:$0xff] %v5425_v0  ;;  %435 = vst [vmem:[%s5830_s9 + $0x1b8] sm:$0xff] %v5425_v0 }
  0xe8   : > { %436 = vst [vmem:[%s5830_s9 + $0x1c0] sm:$0xff] %v5425_v0  ;;  %437 = vst [vmem:[%s5830_s9 + $0x1c8] sm:$0xff] %v5425_v0 }
  0xe9   : > { %438 = vst [vmem:[%s5830_s9 + $0x1d0] sm:$0xff] %v5425_v0  ;;  %439 = vst [vmem:[%s5830_s9 + $0x1d8] sm:$0xff] %v5425_v0 }
  0xea   : > { %440 = vst [vmem:[%s5830_s9 + $0x1e0] sm:$0xff] %v5425_v0  ;;  %441 = vst [vmem:[%s5830_s9 + $0x1e8] sm:$0xff] %v5425_v0 }
  0xeb   : > { %442 = vst [vmem:[%s5830_s9 + $0x1f0] sm:$0xff] %v5425_v0  ;;  %443 = vst [vmem:[%s5830_s9 + $0x1f8] sm:$0xff] %v5425_v0 }
  0xec   : > { %444 = vst [vmem:[%s5830_s9 + $0x200] sm:$0xff] %v5425_v0  ;;  %445 = vst [vmem:[%s5830_s9 + $0x208] sm:$0xff] %v5425_v0 }
  0xed   : > { %446 = vst [vmem:[%s5830_s9 + $0x210] sm:$0xff] %v5425_v0  ;;  %447 = vst [vmem:[%s5830_s9 + $0x218] sm:$0xff] %v5425_v0 }
  0xee   : > { %448 = vst [vmem:[%s5830_s9 + $0x220] sm:$0xff] %v5425_v0  ;;  %449 = vst [vmem:[%s5830_s9 + $0x228] sm:$0xff] %v5425_v0 }
  0xef   : > { %450 = vst [vmem:[%s5830_s9 + $0x230] sm:$0xff] %v5425_v0  ;;  %451 = vst [vmem:[%s5830_s9 + $0x238] sm:$0xff] %v5425_v0 }
  0xf0   : > { %452 = vst [vmem:[%s5830_s9 + $0x240] sm:$0xff] %v5425_v0  ;;  %453 = vst [vmem:[%s5830_s9 + $0x248] sm:$0xff] %v5425_v0 }
  0xf1   : > { %454 = vst [vmem:[%s5830_s9 + $0x250] sm:$0xff] %v5425_v0  ;;  %455 = vst [vmem:[%s5830_s9 + $0x258] sm:$0xff] %v5425_v0 }
  0xf2   : > { %456 = vst [vmem:[%s5830_s9 + $0x260] sm:$0xff] %v5425_v0  ;;  %457 = vst [vmem:[%s5830_s9 + $0x268] sm:$0xff] %v5425_v0 }
  0xf3   : > { %458 = vst [vmem:[%s5830_s9 + $0x270] sm:$0xff] %v5425_v0  ;;  %459 = vst [vmem:[%s5830_s9 + $0x278] sm:$0xff] %v5425_v0 }
  0xf4   : > { %460 = vst [vmem:[%s5830_s9 + $0x280] sm:$0xff] %v5425_v0  ;;  %461 = vst [vmem:[%s5830_s9 + $0x288] sm:$0xff] %v5425_v0 }
  0xf5   : > { %462 = vst [vmem:[%s5830_s9 + $0x290] sm:$0xff] %v5425_v0  ;;  %463 = vst [vmem:[%s5830_s9 + $0x298] sm:$0xff] %v5425_v0 }
  0xf6   : > { %464 = vst [vmem:[%s5830_s9 + $0x2a0] sm:$0xff] %v5425_v0  ;;  %465 = vst [vmem:[%s5830_s9 + $0x2a8] sm:$0xff] %v5425_v0 }
  0xf7   : > { %466 = vst [vmem:[%s5830_s9 + $0x2b0] sm:$0xff] %v5425_v0  ;;  %467 = vst [vmem:[%s5830_s9 + $0x2b8] sm:$0xff] %v5425_v0 }
  0xf8   : > { %468 = vst [vmem:[%s5830_s9 + $0x2c0] sm:$0xff] %v5425_v0  ;;  %469 = vst [vmem:[%s5830_s9 + $0x2c8] sm:$0xff] %v5425_v0 }
  0xf9   : > { %470 = vst [vmem:[%s5830_s9 + $0x2d0] sm:$0xff] %v5425_v0  ;;  %471 = vst [vmem:[%s5830_s9 + $0x2d8] sm:$0xff] %v5425_v0 }
  0xfa   : > { %472 = vst [vmem:[%s5830_s9 + $0x2e0] sm:$0xff] %v5425_v0  ;;  %473 = vst [vmem:[%s5830_s9 + $0x2e8] sm:$0xff] %v5425_v0 }
  0xfb   : > { %474 = vst [vmem:[%s5830_s9 + $0x2f0] sm:$0xff] %v5425_v0  ;;  %475 = vst [vmem:[%s5830_s9 + $0x2f8] sm:$0xff] %v5425_v0 }
  0xfc   : > { %476 = vst [vmem:[%s5830_s9 + $0x300] sm:$0xff] %v5425_v0  ;;  %477 = vst [vmem:[%s5830_s9 + $0x308] sm:$0xff] %v5425_v0 }
  0xfd   : > { %478 = vst [vmem:[%s5830_s9 + $0x310] sm:$0xff] %v5425_v0  ;;  %479 = vst [vmem:[%s5830_s9 + $0x318] sm:$0xff] %v5425_v0 }
  0xfe   : > { %480 = vst [vmem:[%s5830_s9 + $0x320] sm:$0xff] %v5425_v0  ;;  %481 = vst [vmem:[%s5830_s9 + $0x328] sm:$0xff] %v5425_v0 }
  0xff   : > { %482 = vst [vmem:[%s5830_s9 + $0x330] sm:$0xff] %v5425_v0  ;;  %483 = vst [vmem:[%s5830_s9 + $0x338] sm:$0xff] %v5425_v0 }
 0x100   : > { %484 = vst [vmem:[%s5830_s9 + $0x340] sm:$0xff] %v5425_v0  ;;  %485 = vst [vmem:[%s5830_s9 + $0x348] sm:$0xff] %v5425_v0 }
 0x101   : > { %486 = vst [vmem:[%s5830_s9 + $0x350] sm:$0xff] %v5425_v0  ;;  %487 = vst [vmem:[%s5830_s9 + $0x358] sm:$0xff] %v5425_v0 }
 0x102   : > { %488 = vst [vmem:[%s5830_s9 + $0x360] sm:$0xff] %v5425_v0  ;;  %489 = vst [vmem:[%s5830_s9 + $0x368] sm:$0xff] %v5425_v0 }
 0x103   : > { %490 = vst [vmem:[%s5830_s9 + $0x370] sm:$0xff] %v5425_v0  ;;  %491 = vst [vmem:[%s5830_s9 + $0x378] sm:$0xff] %v5425_v0 }
 0x104   : > { %492 = vst [vmem:[%s5830_s9 + $0x380] sm:$0xff] %v5425_v0  ;;  %493 = vst [vmem:[%s5830_s9 + $0x388] sm:$0xff] %v5425_v0 }
 0x105   : > { %494 = vst [vmem:[%s5830_s9 + $0x390] sm:$0xff] %v5425_v0  ;;  %495 = vst [vmem:[%s5830_s9 + $0x398] sm:$0xff] %v5425_v0 }
 0x106   : > { %496 = vst [vmem:[%s5830_s9 + $0x3a0] sm:$0xff] %v5425_v0  ;;  %497 = vst [vmem:[%s5830_s9 + $0x3a8] sm:$0xff] %v5425_v0 }
 0x107   : > { %498 = vst [vmem:[%s5830_s9 + $0x3b0] sm:$0xff] %v5425_v0  ;;  %499 = vst [vmem:[%s5830_s9 + $0x3b8] sm:$0xff] %v5425_v0 }
 0x108   : > { %500 = vst [vmem:[%s5830_s9 + $0x3c0] sm:$0xff] %v5425_v0  ;;  %501 = vst [vmem:[%s5830_s9 + $0x3c8] sm:$0xff] %v5425_v0 }
 0x109   : > { %502 = vst [vmem:[%s5830_s9 + $0x3d0] sm:$0xff] %v5425_v0  ;;  %503 = vst [vmem:[%s5830_s9 + $0x3d8] sm:$0xff] %v5425_v0 }
 0x10a   : > { %504 = vst [vmem:[%s5830_s9 + $0x3e0] sm:$0xff] %v5425_v0  ;;  %505 = vst [vmem:[%s5830_s9 + $0x3e8] sm:$0xff] %v5425_v0 }
 0x10b   : > { %506 = vst [vmem:[%s5830_s9 + $0x3f0] sm:$0xff] %v5425_v0  ;;  %507 = vst [vmem:[%s5830_s9 + $0x3f8] sm:$0xff] %v5425_v0 }
 0x10c   : > { %508 = vst [vmem:[%s5830_s9 + $0x400] sm:$0xff] %v5425_v0  ;;  %509 = vst [vmem:[%s5830_s9 + $0x408] sm:$0xff] %v5425_v0 }
 0x10d   : > { %510 = vst [vmem:[%s5830_s9 + $0x410] sm:$0xff] %v5425_v0  ;;  %511 = vst [vmem:[%s5830_s9 + $0x418] sm:$0xff] %v5425_v0 }
 0x10e   : > { %512 = vst [vmem:[%s5830_s9 + $0x420] sm:$0xff] %v5425_v0  ;;  %513 = vst [vmem:[%s5830_s9 + $0x428] sm:$0xff] %v5425_v0 }
 0x10f   : > { %514 = vst [vmem:[%s5830_s9 + $0x430] sm:$0xff] %v5425_v0  ;;  %515 = vst [vmem:[%s5830_s9 + $0x438] sm:$0xff] %v5425_v0 }
 0x110   : > { %516 = vst [vmem:[%s5830_s9 + $0x440] sm:$0xff] %v5425_v0  ;;  %517 = vst [vmem:[%s5830_s9 + $0x448] sm:$0xff] %v5425_v0 }
 0x111   : > { %518 = vst [vmem:[%s5830_s9 + $0x450] sm:$0xff] %v5425_v0  ;;  %519 = vst [vmem:[%s5830_s9 + $0x458] sm:$0xff] %v5425_v0 }
 0x112   : > { %520 = vst [vmem:[%s5830_s9 + $0x460] sm:$0xff] %v5425_v0  ;;  %521 = vst [vmem:[%s5830_s9 + $0x468] sm:$0xff] %v5425_v0 }
 0x113   : > { %522 = vst [vmem:[%s5830_s9 + $0x470] sm:$0xff] %v5425_v0  ;;  %523 = vst [vmem:[%s5830_s9 + $0x478] sm:$0xff] %v5425_v0 }
 0x114 PF: > { %v957_v1 = vld [vmem:[%s5806_s29 + $0x8] sm:$0xff]  ;;  %v960_v2 = vld [vmem:[%s5806_s29 + $0x20] sm:$0xff]  ;;  %v958_v3 = vld [vmem:[%s5806_s29 + $0x10] sm:$0xff]  ;;  %v5426_v4 = vmov 0.0|0.0   ;;  %s8051_s21 = sld [smem:[#allocation18_spill]] }
 0x115   : > { %4639 = vmatprep.subr.bf16.mxu1 %v5426_v4  ;;  %v4447_v5 = vpack.c.bf16 %v960_v2, %v957_v1  ;;  %v961_v6 = vld [vmem:[%s5806_s29 + $0x28] sm:$0xff]  ;;  %v956_v7 = vld [vmem:[%s5806_s29] sm:$0xff]  ;;  %v959_v8 = vld [vmem:[%s5806_s29 + $0x18] sm:$0xff] }
 0x116   : > { %v4640_v9 = vpack.c.bf16 %v961_v6, %v958_v3  ;;  %v4449_v10 = vpack.c.bf16 %v959_v8, %v956_v7  ;;  %v963_v11 = vld [vmem:[%s5806_s29 + $0x38] sm:$0xff]  ;;  %v966_v12 = vld [vmem:[%s5806_s29 + $0x50] sm:$0xff]  ;;  %v964_v13 = vld [vmem:[%s5806_s29 + $0x40] sm:$0xff] }
 0x117   : > { %4448 = vmatprep.subr.bf16.mxu0 %v4447_v5  ;;  %v4451_v14 = vpack.c.bf16 %v966_v12, %v963_v11  ;;  %v967_v15 = vld [vmem:[%s5806_s29 + $0x58] sm:$0xff]  ;;  %v962_v16 = vld [vmem:[%s5806_s29 + $0x30] sm:$0xff]  ;;  %v965_v17 = vld [vmem:[%s5806_s29 + $0x48] sm:$0xff] }
 0x118   : > { %4641 = vmatpush1.bf16.msra.mxu1 %v4640_v9  ;;  %4450 = vmatpush1.bf16.msra.mxu0 %v4449_v10  ;;  %v4643_v18 = vpack.c.bf16 %v967_v15, %v964_v13  ;;  %v4453_v19 = vpack.c.bf16 %v965_v17, %v962_v16  ;;  %v969_v20 = vld [vmem:[%s5806_s29 + $0x68] sm:$0xff]  ;;  %v972_v21 = vld [vmem:[%s5806_s29 + $0x80] sm:$0xff]  ;;  %v970_v22 = vld [vmem:[%s5806_s29 + $0x70] sm:$0xff] }
 0x119   : > { %4642 = vmatprep.subr.bf16.mxu1 %v5426_v4  ;;  %4452 = vmatprep.subr.bf16.mxu0 %v4451_v14  ;;  %v4455_v23 = vpack.c.bf16 %v972_v21, %v969_v20  ;;  %v973_v24 = vld [vmem:[%s5806_s29 + $0x88] sm:$0xff]  ;;  %v968_v25 = vld [vmem:[%s5806_s29 + $0x60] sm:$0xff]  ;;  %v971_v26 = vld [vmem:[%s5806_s29 + $0x78] sm:$0xff] }
 0x11a   : > { %v975_v27 = vld [vmem:[%s5806_s29 + $0x98] sm:$0xff]  ;;  %v978_v28 = vld [vmem:[%s5806_s29 + $0xb0] sm:$0xff]  ;;  %v4646_v29 = vpack.c.bf16 %v973_v24, %v970_v22  ;;  %v4457_v30 = vpack.c.bf16 %v971_v26, %v968_v25  ;;  %v976_v31 = vld [vmem:[%s5806_s29 + $0xa0] sm:$0xff]  ;;  %p4439_p13 = scmp.ne.s32.totalorder %s8051_s21, 3 }
 0x11b   : > { %v4459_v32 = vpack.c.bf16 %v978_v28, %v975_v27  ;;  %v979_v33 = vld [vmem:[%s5806_s29 + $0xb8] sm:$0xff]  ;;  %v974_v34 = vld [vmem:[%s5806_s29 + $0x90] sm:$0xff]  ;;  %v977_v35 = vld [vmem:[%s5806_s29 + $0xa8] sm:$0xff] }
 0x11c   : > { %4644 = vmatpush1.bf16.msra.mxu1 %v4643_v18  ;;  %4454 = vmatpush1.bf16.msra.mxu0 %v4453_v19  ;;  %v981_v36 = vld [vmem:[%s5806_s29 + $0xc8] sm:$0xff]  ;;  %v984_v37 = vld [vmem:[%s5806_s29 + $0xe0] sm:$0xff]  ;;  %v4649_v38 = vpack.c.bf16 %v979_v33, %v976_v31  ;;  %v4461_v39 = vpack.c.bf16 %v977_v35, %v974_v34  ;;  %v982_v40 = vld [vmem:[%s5806_s29 + $0xd0] sm:$0xff] }
 0x11d   : > { %4645 = vmatprep.subr.bf16.mxu1 %v5426_v4  ;;  %4456 = vmatprep.subr.bf16.mxu0 %v4455_v23  ;;  %v4463_v41 = vpack.c.bf16 %v984_v37, %v981_v36  ;;  %v985_v42 = vld [vmem:[%s5806_s29 + $0xe8] sm:$0xff]  ;;  %v980_v43 = vld [vmem:[%s5806_s29 + $0xc0] sm:$0xff]  ;;  %v983_v44 = vld [vmem:[%s5806_s29 + $0xd8] sm:$0xff] }
 0x11e   : > { %v987_v45 = vld [vmem:[%s5806_s29 + $0xf8] sm:$0xff]  ;;  %v990_v46 = vld [vmem:[%s5806_s29 + $0x110] sm:$0xff]  ;;  %v4652_v47 = vpack.c.bf16 %v985_v42, %v982_v40  ;;  %v4465_v48 = vpack.c.bf16 %v983_v44, %v980_v43  ;;  %v988_v49 = vld [vmem:[%s5806_s29 + $0x100] sm:$0xff] }
 0x11f   : > { %v4467_v50 = vpack.c.bf16 %v990_v46, %v987_v45  ;;  %v991_v51 = vld [vmem:[%s5806_s29 + $0x118] sm:$0xff]  ;;  %v986_v52 = vld [vmem:[%s5806_s29 + $0xf0] sm:$0xff]  ;;  %v989_v53 = vld [vmem:[%s5806_s29 + $0x108] sm:$0xff] }
 0x120   : > { %4647 = vmatpush1.bf16.msra.mxu1 %v4646_v29  ;;  %4458 = vmatpush1.bf16.msra.mxu0 %v4457_v30  ;;  %v993_v54 = vld [vmem:[%s5806_s29 + $0x128] sm:$0xff]  ;;  %v996_v55 = vld [vmem:[%s5806_s29 + $0x140] sm:$0xff]  ;;  %v4655_v56 = vpack.c.bf16 %v991_v51, %v988_v49  ;;  %v4469_v57 = vpack.c.bf16 %v989_v53, %v986_v52  ;;  %v994_v58 = vld [vmem:[%s5806_s29 + $0x130] sm:$0xff] }
 0x121   : > { %4648 = vmatprep.subr.bf16.mxu1 %v5426_v4  ;;  %4460 = vmatprep.subr.bf16.mxu0 %v4459_v32  ;;  %v4471_v59 = vpack.c.bf16 %v996_v55, %v993_v54  ;;  %v997_v60 = vld [vmem:[%s5806_s29 + $0x148] sm:$0xff]  ;;  %v992_v61 = vld [vmem:[%s5806_s29 + $0x120] sm:$0xff]  ;;  %v995_v62 = vld [vmem:[%s5806_s29 + $0x138] sm:$0xff] }
 0x122   : > { %v999_v63 = vld [vmem:[%s5806_s29 + $0x158] sm:$0xff]  ;;  %v1002_v0 = vld [vmem:[%s5806_s29 + $0x170] sm:$0xff]  ;;  %v4658_v1 = vpack.c.bf16 %v997_v60, %v994_v58  ;;  %v4473_v2 = vpack.c.bf16 %v995_v62, %v992_v61  ;;  %v1000_v3 = vld [vmem:[%s5806_s29 + $0x160] sm:$0xff] }
 0x123   : > { %v4475_v5 = vpack.c.bf16 %v1002_v0, %v999_v63  ;;  %v1003_v6 = vld [vmem:[%s5806_s29 + $0x178] sm:$0xff]  ;;  %v998_v7 = vld [vmem:[%s5806_s29 + $0x150] sm:$0xff]  ;;  %v1001_v8 = vld [vmem:[%s5806_s29 + $0x168] sm:$0xff] }
 0x124   : > { %4650 = vmatpush1.bf16.msra.mxu1 %v4649_v38  ;;  %4462 = vmatpush1.bf16.msra.mxu0 %v4461_v39  ;;  %v1005_v9 = vld [vmem:[%s5806_s29 + $0x188] sm:$0xff]  ;;  %v1008_v10 = vld [vmem:[%s5806_s29 + $0x1a0] sm:$0xff]  ;;  %v4661_v11 = vpack.c.bf16 %v1003_v6, %v1000_v3  ;;  %v4477_v12 = vpack.c.bf16 %v1001_v8, %v998_v7  ;;  %v1006_v13 = vld [vmem:[%s5806_s29 + $0x190] sm:$0xff] }
 0x125   : > { %4651 = vmatprep.subr.bf16.mxu1 %v5426_v4  ;;  %4464 = vmatprep.subr.bf16.mxu0 %v4463_v41  ;;  %v4479_v14 = vpack.c.bf16 %v1008_v10, %v1005_v9  ;;  %v1009_v15 = vld [vmem:[%s5806_s29 + $0x1a8] sm:$0xff]  ;;  %v1004_v16 = vld [vmem:[%s5806_s29 + $0x180] sm:$0xff]  ;;  %v1007_v17 = vld [vmem:[%s5806_s29 + $0x198] sm:$0xff] }
 0x126   : > { %v1011_v18 = vld [vmem:[%s5806_s29 + $0x1b8] sm:$0xff]  ;;  %v1014_v19 = vld [vmem:[%s5806_s29 + $0x1d0] sm:$0xff]  ;;  %v4664_v20 = vpack.c.bf16 %v1009_v15, %v1006_v13  ;;  %v4481_v21 = vpack.c.bf16 %v1007_v17, %v1004_v16  ;;  %v1012_v22 = vld [vmem:[%s5806_s29 + $0x1c0] sm:$0xff] }
 0x127   : > { %v669_v23 = vld [vmem:[%s5798_s26 + $0x8] sm:$0xff]  ;;  %v4483_v24 = vpack.c.bf16 %v1014_v19, %v1011_v18  ;;  %v1015_v25 = vld [vmem:[%s5806_s29 + $0x1d8] sm:$0xff]  ;;  %v1010_v26 = vld [vmem:[%s5806_s29 + $0x1b0] sm:$0xff] }
 0x128   : > { %4653 = vmatpush1.bf16.msra.mxu1 %v4652_v47  ;;  %4466 = vmatpush1.bf16.msra.mxu0 %v4465_v48  ;;  %v1013_v27 = vld [vmem:[%s5806_s29 + $0x1c8] sm:$0xff]  ;;  %v1020_v29 = vld [vmem:[%s5806_s29 + $0x200] sm:$0xff]  ;;  %v4667_v30 = vpack.c.bf16 %v1015_v25, %v1012_v22  ;;  %v1018_v32 = vld [vmem:[%s5806_s29 + $0x1f0] sm:$0xff] }
 0x129   : > { %4654 = vmatprep.subr.bf16.mxu1 %v5426_v4  ;;  %4468 = vmatprep.subr.bf16.mxu0 %v4467_v50  ;;  %v1017_v28 = vld [vmem:[%s5806_s29 + $0x1e8] sm:$0xff]  ;;  %v4485_v31 = vpack.c.bf16 %v1013_v27, %v1010_v26  ;;  %v1016_v35 = vld [vmem:[%s5806_s29 + $0x1e0] sm:$0xff]  ;;  %v1019_v36 = vld [vmem:[%s5806_s29 + $0x1f8] sm:$0xff] }
 0x12a   : > { %2367 = vmatprep.mubr.f32.mxu1 %v669_v23  ;;  %1308 = vmatprep.mubr.f32.mxu0 %v669_v23  ;;  %v4487_v33 = vpack.c.bf16 %v1020_v29, %v1017_v28  ;;  %v1021_v34 = vld [vmem:[%s5806_s29 + $0x208] sm:$0xff]  ;;  %v1023_v37 = vld [vmem:[%s5806_s29 + $0x218] sm:$0xff]  ;;  %v1026_v38 = vld [vmem:[%s5806_s29 + $0x230] sm:$0xff]  ;;  %v4489_v40 = vpack.c.bf16 %v1019_v36, %v1016_v35 }
 0x12b   : > { %v4670_v39 = vpack.c.bf16 %v1021_v34, %v1018_v32  ;;  %v1024_v41 = vld [vmem:[%s5806_s29 + $0x220] sm:$0xff]  ;;  %v4491_v42 = vpack.c.bf16 %v1026_v38, %v1023_v37  ;;  %v1027_v43 = vld [vmem:[%s5806_s29 + $0x238] sm:$0xff]  ;;  %v1022_v44 = vld [vmem:[%s5806_s29 + $0x210] sm:$0xff] }
 0x12c   : > { %4656 = vmatpush1.bf16.msra.mxu1 %v4655_v56  ;;  %4470 = vmatpush1.bf16.msra.mxu0 %v4469_v57  ;;  %v1025_v45 = vld [vmem:[%s5806_s29 + $0x228] sm:$0xff]  ;;  %v1032_v47 = vld [vmem:[%s5806_s29 + $0x260] sm:$0xff]  ;;  %v4673_v48 = vpack.c.bf16 %v1027_v43, %v1024_v41  ;;  %v1030_v50 = vld [vmem:[%s5806_s29 + $0x250] sm:$0xff] }
 0x12d   : > { %4657 = vmatprep.subr.bf16.mxu1 %v5426_v4  ;;  %4472 = vmatprep.subr.bf16.mxu0 %v4471_v59  ;;  %v1029_v46 = vld [vmem:[%s5806_s29 + $0x248] sm:$0xff]  ;;  %v4493_v49 = vpack.c.bf16 %v1025_v45, %v1022_v44  ;;  %v1028_v53 = vld [vmem:[%s5806_s29 + $0x240] sm:$0xff]  ;;  %v1031_v54 = vld [vmem:[%s5806_s29 + $0x258] sm:$0xff] }
 0x12e   : > { %v4495_v51 = vpack.c.bf16 %v1032_v47, %v1029_v46  ;;  %v1033_v52 = vld [vmem:[%s5806_s29 + $0x268] sm:$0xff]  ;;  %v1035_v55 = vld [vmem:[%s5806_s29 + $0x278] sm:$0xff]  ;;  %v1038_v56 = vld [vmem:[%s5806_s29 + $0x290] sm:$0xff]  ;;  %v4497_v58 = vpack.c.bf16 %v1031_v54, %v1028_v53 }
 0x12f   : > { %v4676_v57 = vpack.c.bf16 %v1033_v52, %v1030_v50  ;;  %v1036_v59 = vld [vmem:[%s5806_s29 + $0x280] sm:$0xff]  ;;  %v4499_v60 = vpack.c.bf16 %v1038_v56, %v1035_v55  ;;  %v1039_v61 = vld [vmem:[%s5806_s29 + $0x298] sm:$0xff]  ;;  %v1034_v62 = vld [vmem:[%s5806_s29 + $0x270] sm:$0xff] }
 0x130   : > { %4659 = vmatpush1.bf16.msra.mxu1 %v4658_v1  ;;  %4474 = vmatpush1.bf16.msra.mxu0 %v4473_v2  ;;  %v1037_v63 = vld [vmem:[%s5806_s29 + $0x288] sm:$0xff]  ;;  %v1044_v1 = vld [vmem:[%s5806_s29 + $0x2c0] sm:$0xff]  ;;  %v4679_v2 = vpack.c.bf16 %v1039_v61, %v1036_v59  ;;  %v1043_v9 = vld [vmem:[%s5806_s29 + $0x2b8] sm:$0xff] }
 0x131   : > { %4660 = vmatprep.subr.bf16.mxu1 %v5426_v4  ;;  %4476 = vmatprep.subr.bf16.mxu0 %v4475_v5  ;;  %v1041_v0 = vld [vmem:[%s5806_s29 + $0x2a8] sm:$0xff]  ;;  %v4501_v3 = vpack.c.bf16 %v1037_v63, %v1034_v62  ;;  %v1042_v5 = vld [vmem:[%s5806_s29 + $0x2b0] sm:$0xff]  ;;  %v1040_v8 = vld [vmem:[%s5806_s29 + $0x2a0] sm:$0xff] }
 0x132   : > { %v4503_v6 = vpack.c.bf16 %v1044_v1, %v1041_v0  ;;  %v1045_v7 = vld [vmem:[%s5806_s29 + $0x2c8] sm:$0xff]  ;;  %v1047_v10 = vld [vmem:[%s5806_s29 + $0x2d8] sm:$0xff]  ;;  %v4505_v13 = vpack.c.bf16 %v1043_v9, %v1040_v8  ;;  %v1046_v17 = vld [vmem:[%s5806_s29 + $0x2d0] sm:$0xff] }
 0x133   : > { %v1051_v16 = vld [vmem:[%s5806_s29 + $0x2f8] sm:$0xff]  ;;  %v1049_v18 = vld [vmem:[%s5806_s29 + $0x2e8] sm:$0xff]  ;;  %v1054_v23 = vld [vmem:[%s5806_s29 + $0x310] sm:$0xff] }
 0x134   : > { %4662 = vmatpush1.bf16.msra.mxu1 %v4661_v11  ;;  %4478 = vmatpush1.bf16.msra.mxu0 %v4477_v12  ;;  %v1050_v11 = vld [vmem:[%s5806_s29 + $0x2f0] sm:$0xff]  ;;  %v4682_v12 = vpack.c.bf16 %v1045_v7, %v1042_v5  ;;  %v1053_v19 = vld [vmem:[%s5806_s29 + $0x308] sm:$0xff]  ;;  %v4509_v22 = vpack.c.bf16 %v1049_v18, %v1046_v17  ;;  %v1052_v26 = vld [vmem:[%s5806_s29 + $0x300] sm:$0xff] }
 0x135   : > { %4663 = vmatprep.subr.bf16.mxu1 %v5426_v4  ;;  %4480 = vmatprep.subr.bf16.mxu0 %v4479_v14  ;;  %v1048_v14 = vld [vmem:[%s5806_s29 + $0x2e0] sm:$0xff]  ;;  %v4507_v15 = vpack.c.bf16 %v1050_v11, %v1047_v10  ;;  %v1057_v25 = vld [vmem:[%s5806_s29 + $0x328] sm:$0xff]  ;;  %v1055_v27 = vld [vmem:[%s5806_s29 + $0x318] sm:$0xff] }
 0x136   : > { %v1059_v28 = vld [vmem:[%s5806_s29 + $0x338] sm:$0xff]  ;;  %v1062_v29 = vld [vmem:[%s5806_s29 + $0x350] sm:$0xff]  ;;  %v4513_v32 = vpack.c.bf16 %v1055_v27, %v1052_v26  ;;  %v1060_v34 = vld [vmem:[%s5806_s29 + $0x340] sm:$0xff] }
 0x137   : > { %v4515_v35 = vpack.c.bf16 %v1062_v29, %v1059_v28  ;;  %v1063_v36 = vld [vmem:[%s5806_s29 + $0x358] sm:$0xff]  ;;  %v1058_v37 = vld [vmem:[%s5806_s29 + $0x330] sm:$0xff]  ;;  %v1061_v38 = vld [vmem:[%s5806_s29 + $0x348] sm:$0xff] }
 0x138   : > { %4665 = vmatpush1.bf16.msra.mxu1 %v4664_v20  ;;  %4482 = vmatpush1.bf16.msra.mxu0 %v4481_v21  ;;  %v1056_v20 = vld [vmem:[%s5806_s29 + $0x320] sm:$0xff]  ;;  %v4685_v21 = vpack.c.bf16 %v1051_v16, %v1048_v14  ;;  %v674_v41 = vld [vmem:[%s5798_s26 + $0x30] sm:$0xff]  ;;  %v4691_v43 = vpack.c.bf16 %v1063_v36, %v1060_v34  ;;  %v4517_v44 = vpack.c.bf16 %v1061_v38, %v1058_v37  ;;  %v1069_v47 = vld [vmem:[%s5806_s29 + $0x388] sm:$0xff] }
 0x139   : > { %4666 = vmatprep.subr.bf16.mxu1 %v5426_v4  ;;  %4484 = vmatprep.subr.bf16.mxu0 %v4483_v24  ;;  %v4511_v24 = vpack.c.bf16 %v1056_v20, %v1053_v19  ;;  %v1066_v45 = vld [vmem:[%s5806_s29 + $0x370] sm:$0xff]  ;;  %v1071_v50 = vld [vmem:[%s5806_s29 + $0x398] sm:$0xff]  ;;  %v680_v52 = vld [vmem:[%s5798_s26 + $0x60] sm:$0xff] }
 0x13a   : > { %v687_v53 = vld [vmem:[%s5798_s26 + $0x98] sm:$0xff]  ;;  %v4694_v54 = vpack.c.bf16 %v1069_v47, %v1066_v45  ;;  %v1072_v56 = vld [vmem:[%s5806_s29 + $0x3a0] sm:$0xff]  ;;  %v1070_v59 = vld [vmem:[%s5806_s29 + $0x390] sm:$0xff] }
 0x13b   : > { %v1077_v61 = vld [vmem:[%s5806_s29 + $0x3c8] sm:$0xff]  ;;  %v1080_v62 = vld [vmem:[%s5806_s29 + $0x3e0] sm:$0xff]  ;;  %v686_v63 = vld [vmem:[%s5798_s26 + $0x90] sm:$0xff] }
 0x13c   : > { %4668 = vmatpush1.bf16.msra.mxu1 %v4667_v30  ;;  %4486 = vmatpush1.bf16.msra.mxu0 %v4485_v31  ;;  %v668_v30 = vld [vmem:[%s5798_s26] sm:$0xff]  ;;  %v4688_v31 = vpack.c.bf16 %v1057_v25, %v1054_v23  ;;  %v693_v0 = vld [vmem:[%s5798_s26 + $0xc8] sm:$0xff]  ;;  %v4527_v5 = vpack.c.bf16 %v1080_v62, %v1077_v61  ;;  %v1079_v8 = vld [vmem:[%s5806_s29 + $0x3d8] sm:$0xff] }
 0x13d   : > { %4669 = vmatprep.subr.bf16.mxu1 %v5426_v4  ;;  %4488 = vmatprep.subr.bf16.mxu0 %v4487_v33  ;;  %v675_v33 = vld [vmem:[%s5798_s26 + $0x38] sm:$0xff]  ;;  %v1076_v7 = vld [vmem:[%s5806_s29 + $0x3c0] sm:$0xff]  ;;  %v1086_v10 = vld [vmem:[%s5806_s29 + $0x410] sm:$0xff] }
 0x13e   : > { %v1083_v9 = vld [vmem:[%s5806_s29 + $0x3f8] sm:$0xff]  ;;  %v692_v11 = vld [vmem:[%s5798_s26 + $0xc0] sm:$0xff]  ;;  %v4529_v14 = vpack.c.bf16 %v1079_v8, %v1076_v7  ;;  %v1082_v18 = vld [vmem:[%s5806_s29 + $0x3f0] sm:$0xff] }
 0x13f   : > { %v4531_v16 = vpack.c.bf16 %v1086_v10, %v1083_v9  ;;  %v1087_v17 = vld [vmem:[%s5806_s29 + $0x418] sm:$0xff]  ;;  %v1085_v19 = vld [vmem:[%s5806_s29 + $0x408] sm:$0xff]  ;;  %v1090_v26 = vld [vmem:[%s5806_s29 + $0x430] sm:$0xff] }
 0x140   : > { %4671 = vmatpush1.bf16.msra.mxu1 %v4670_v39  ;;  %4490 = vmatpush1.bf16.msra.mxu0 %v4489_v40  ;;  %v1065_v39 = vld [vmem:[%s5806_s29 + $0x368] sm:$0xff]  ;;  %v1068_v40 = vld [vmem:[%s5806_s29 + $0x380] sm:$0xff]  ;;  %v4533_v25 = vpack.c.bf16 %v1085_v19, %v1082_v18  ;;  %v711_v34 = vld [vmem:[%s5798_s26 + $0x158] sm:$0xff] }
 0x141   : > { %4672 = vmatprep.subr.bf16.mxu1 %v5426_v4  ;;  %4492 = vmatprep.subr.bf16.mxu0 %v4491_v42  ;;  %v681_v42 = vld [vmem:[%s5798_s26 + $0x68] sm:$0xff]  ;;  %v4519_v46 = vpack.c.bf16 %v1068_v40, %v1065_v39  ;;  %v1088_v29 = vld [vmem:[%s5806_s29 + $0x420] sm:$0xff]  ;;  %v1099_v39 = vld [vmem:[%s5806_s29 + $0x478] sm:$0xff] }
 0x142   : > { %v1089_v20 = vld [vmem:[%s5806_s29 + $0x428] sm:$0xff]  ;;  %v1096_v37 = vld [vmem:[%s5806_s29 + $0x460] sm:$0xff]  ;;  %v1094_v40 = vld [vmem:[%s5806_s29 + $0x450] sm:$0xff] }
 0x143   : > { %v705_v23 = vld [vmem:[%s5798_s26 + $0x128] sm:$0xff]  ;;  %v1111_v61 = vld [vmem:[%s5806_s29 + $0x4d8] sm:$0xff]  ;;  %v1106_v62 = vld [vmem:[%s5806_s29 + $0x4b0] sm:$0xff] }
 0x144   : > { %4674 = vmatpush1.bf16.msra.mxu1 %v4673_v48  ;;  %4494 = vmatpush1.bf16.msra.mxu0 %v4493_v49  ;;  %v1064_v48 = vld [vmem:[%s5806_s29 + $0x360] sm:$0xff]  ;;  %v1067_v49 = vld [vmem:[%s5806_s29 + $0x378] sm:$0xff]  ;;  %v1093_v28 = vld [vmem:[%s5806_s29 + $0x448] sm:$0xff] }
 0x145   : > { %4675 = vmatprep.subr.bf16.mxu1 %v5426_v4  ;;  %4496 = vmatprep.subr.bf16.mxu0 %v4495_v51  ;;  %v1074_v51 = vld [vmem:[%s5806_s29 + $0x3b0] sm:$0xff]  ;;  %v4521_v55 = vpack.c.bf16 %v1067_v49, %v1064_v48  ;;  %v717_v45 = vld [vmem:[%s5798_s26 + $0x188] sm:$0xff]  ;;  %v1112_v10 = vld [vmem:[%s5806_s29 + $0x4e0] sm:$0xff] }
 0x146   : > { %v1102_v48 = vld [vmem:[%s5806_s29 + $0x490] sm:$0xff]  ;;  %v1117_v9 = vld [vmem:[%s5806_s29 + $0x508] sm:$0xff]  ;;  %v1120_v18 = vld [vmem:[%s5806_s29 + $0x520] sm:$0xff] }
 0x147   : > { %v1114_v7 = vld [vmem:[%s5806_s29 + $0x4f0] sm:$0xff] }
 0x148   : > { %4677 = vmatpush1.bf16.msra.mxu1 %v4676_v57  ;;  %4498 = vmatpush1.bf16.msra.mxu0 %v4497_v58  ;;  %v4523_v57 = vpack.c.bf16 %v1074_v51, %v1071_v50  ;;  %v1075_v58 = vld [vmem:[%s5806_s29 + $0x3b8] sm:$0xff]  ;;  %v1105_v50 = vld [vmem:[%s5806_s29 + $0x4a8] sm:$0xff]  ;;  %v1100_v51 = vld [vmem:[%s5806_s29 + $0x480] sm:$0xff] }
 0x149   : > { %4678 = vmatprep.subr.bf16.mxu1 %v5426_v4  ;;  %4500 = vmatprep.subr.bf16.mxu0 %v4499_v60  ;;  %v1073_v60 = vld [vmem:[%s5806_s29 + $0x3a8] sm:$0xff]  ;;  %v4697_v1 = vpack.c.bf16 %v1075_v58, %v1072_v56  ;;  %v723_v56 = vld [vmem:[%s5798_s26 + $0x1b8] sm:$0xff] }
 0x14c   : > { %4680 = vmatpush1.bf16.msra.mxu1 %v4679_v2  ;;  %4502 = vmatpush1.bf16.msra.mxu0 %v4501_v3  ;;  %v4525_v2 = vpack.c.bf16 %v1073_v60, %v1070_v59  ;;  %v1078_v3 = vld [vmem:[%s5806_s29 + $0x3d0] sm:$0xff]  ;;  %v1108_v59 = vld [vmem:[%s5806_s29 + $0x4c0] sm:$0xff] }
 0x14d   : > { %4681 = vmatprep.subr.bf16.mxu1 %v5426_v4  ;;  %4504 = vmatprep.subr.bf16.mxu0 %v4503_v6  ;;  %v1081_v6 = vld [vmem:[%s5806_s29 + $0x3e8] sm:$0xff] }
 0x150   : > { %4683 = vmatpush1.bf16.msra.mxu1 %v4682_v12  ;;  %4506 = vmatpush1.bf16.msra.mxu0 %v4505_v13  ;;  %v699_v12 = vld [vmem:[%s5798_s26 + $0xf8] sm:$0xff]  ;;  %v4700_v13 = vpack.c.bf16 %v1081_v6, %v1078_v3  ;;  %v729_v3 = vld [vmem:[%s5798_s26 + $0x1e8] sm:$0xff] }
 0x151   : > { %4684 = vmatprep.subr.bf16.mxu1 %v5426_v4  ;;  %4508 = vmatprep.subr.bf16.mxu0 %v4507_v15  ;;  %v1084_v15 = vld [vmem:[%s5806_s29 + $0x400] sm:$0xff] }
 0x154   : > { %4686 = vmatpush1.bf16.msra.mxu1 %v4685_v21  ;;  %4510 = vmatpush1.bf16.msra.mxu0 %v4509_v22  ;;  %v1092_v21 = vld [vmem:[%s5806_s29 + $0x440] sm:$0xff]  ;;  %v698_v22 = vld [vmem:[%s5798_s26 + $0xf0] sm:$0xff] }
 0x155   : > { %4687 = vmatprep.subr.bf16.mxu1 %v5426_v4  ;;  %4512 = vmatprep.subr.bf16.mxu0 %v4511_v24  ;;  %v4703_v24 = vpack.c.bf16 %v1087_v17, %v1084_v15  ;;  %v4535_v27 = vpack.c.bf16 %v1092_v21, %v1089_v20  ;;  %v735_v15 = vld [vmem:[%s5798_s26 + $0x218] sm:$0xff]  ;;  %v1118_v21 = vld [vmem:[%s5806_s29 + $0x510] sm:$0xff] }
 0x156   : > { %v1123_v20 = vld [vmem:[%s5806_s29 + $0x538] sm:$0xff] }
 0x157   : > { %2368 = vmatmul.mubr.f32.vlgmr.msra.gmra.mrb[0].mxu1 %v668_v30  ;;  %1309 = vmatmul.mubr.f32.vlgmr.msra.gmra.mrb[0].mxu0 %v668_v30  ;;  %v1091_v30 = vld [vmem:[%s5806_s29 + $0x438] sm:$0xff] }
 0x158   : > { %4689 = vmatpush1.bf16.msra.mxu1 %v4688_v31  ;;  %4514 = vmatpush1.bf16.msra.mxu0 %v4513_v32  ;;  %v1095_v31 = vld [vmem:[%s5806_s29 + $0x458] sm:$0xff]  ;;  %v1098_v32 = vld [vmem:[%s5806_s29 + $0x470] sm:$0xff]  ;;  %v4537_v36 = vpack.c.bf16 %v1091_v30, %v1088_v29 }
 0x159   : > { %2372 = vmatprep.mubr.f32.mxu1 %v675_v33  ;;  %1314 = vmatprep.mubr.f32.mxu0 %v675_v33  ;;  %v704_v33 = vld [vmem:[%s5798_s26 + $0x120] sm:$0xff]  ;;  %v4539_v38 = vpack.c.bf16 %v1098_v32, %v1095_v31  ;;  %v1126_v29 = vld [vmem:[%s5806_s29 + $0x550] sm:$0xff]  ;;  %v1129_v31 = vld [vmem:[%s5806_s29 + $0x568] sm:$0xff] }
 0x15a   : > { %4690 = vmatprep.subr.bf16.mxu1 %v5426_v4  ;;  %4516 = vmatprep.subr.bf16.mxu0 %v4515_v35  ;;  %v4706_v35 = vpack.c.bf16 %v1093_v28, %v1090_v26  ;;  %v741_v26 = vld [vmem:[%s5798_s26 + $0x248] sm:$0xff]  ;;  %v1124_v32 = vld [vmem:[%s5806_s29 + $0x540] sm:$0xff] }
 0x15b   : > { %2373 = vmatmul.mubr.f32.gmra.mrb[2].mxu1 %v674_v41  ;;  %1315 = vmatmul.mubr.f32.gmra.mrb[2].mxu0 %v674_v41  ;;  %v1097_v41 = vld [vmem:[%s5806_s29 + $0x468] sm:$0xff] }
 0x15c   : > { %2377 = vmatprep.mubr.f32.mxu1 %v681_v42  ;;  %1320 = vmatprep.mubr.f32.mxu0 %v681_v42  ;;  %v1101_v42 = vld [vmem:[%s5806_s29 + $0x488] sm:$0xff]  ;;  %v4541_v47 = vpack.c.bf16 %v1097_v41, %v1094_v40  ;;  %v1132_v40 = vld [vmem:[%s5806_s29 + $0x580] sm:$0xff] }
 0x15d   : > { %4692 = vmatpush1.bf16.msra.mxu1 %v4691_v43  ;;  %4518 = vmatpush1.bf16.msra.mxu0 %v4517_v44  ;;  %v1104_v43 = vld [vmem:[%s5806_s29 + $0x4a0] sm:$0xff]  ;;  %v710_v44 = vld [vmem:[%s5798_s26 + $0x150] sm:$0xff] }
 0x15e   : > { %4693 = vmatprep.subr.bf16.mxu1 %v5426_v4  ;;  %4520 = vmatprep.subr.bf16.mxu0 %v4519_v46  ;;  %v4709_v46 = vpack.c.bf16 %v1099_v39, %v1096_v37  ;;  %v4543_v49 = vpack.c.bf16 %v1104_v43, %v1101_v42  ;;  %v747_v37 = vld [vmem:[%s5798_s26 + $0x278] sm:$0xff]  ;;  %v1130_v43 = vld [vmem:[%s5806_s29 + $0x570] sm:$0xff] }
 0x15f   : > { %2378 = vmatmul.mubr.f32.gmra.mrb[4].mxu1 %v680_v52  ;;  %1321 = vmatmul.mubr.f32.gmra.mrb[4].mxu0 %v680_v52  ;;  %v1103_v52 = vld [vmem:[%s5806_s29 + $0x498] sm:$0xff] }
 0x160   : > { %2382 = vmatprep.mubr.f32.mxu1 %v687_v53  ;;  %1326 = vmatprep.mubr.f32.mxu0 %v687_v53  ;;  %v1107_v53 = vld [vmem:[%s5806_s29 + $0x4b8] sm:$0xff]  ;;  %v4545_v58 = vpack.c.bf16 %v1103_v52, %v1100_v51  ;;  %v1138_v51 = vld [vmem:[%s5806_s29 + $0x5b0] sm:$0xff] }
 0x161   : > { %4695 = vmatpush1.bf16.msra.mxu1 %v4694_v54  ;;  %4522 = vmatpush1.bf16.msra.mxu0 %v4521_v55  ;;  %v1110_v54 = vld [vmem:[%s5806_s29 + $0x4d0] sm:$0xff]  ;;  %v716_v55 = vld [vmem:[%s5798_s26 + $0x180] sm:$0xff]  ;;  %v1135_v42 = vld [vmem:[%s5806_s29 + $0x598] sm:$0xff] }
 0x162   : > { %4696 = vmatprep.subr.bf16.mxu1 %v5426_v4  ;;  %4524 = vmatprep.subr.bf16.mxu0 %v4523_v57  ;;  %v4712_v57 = vpack.c.bf16 %v1105_v50, %v1102_v48  ;;  %v4547_v60 = vpack.c.bf16 %v1110_v54, %v1107_v53  ;;  %v753_v48 = vld [vmem:[%s5798_s26 + $0x2a8] sm:$0xff]  ;;  %v1136_v54 = vld [vmem:[%s5806_s29 + $0x5a0] sm:$0xff] }
 0x163   : > { %2383 = vmatmul.mubr.f32.gmra.mrb[6].mxu1 %v686_v63  ;;  %1327 = vmatmul.mubr.f32.gmra.mrb[6].mxu0 %v686_v63  ;;  %v1109_v63 = vld [vmem:[%s5806_s29 + $0x4c8] sm:$0xff] }
 0x164   : > { %2387 = vmatprep.mubr.f32.mxu1 %v693_v0  ;;  %1332 = vmatprep.mubr.f32.mxu0 %v693_v0  ;;  %v1113_v0 = vld [vmem:[%s5806_s29 + $0x4e8] sm:$0xff]  ;;  %v4549_v6 = vpack.c.bf16 %v1109_v63, %v1106_v62  ;;  %v1144_v62 = vld [vmem:[%s5806_s29 + $0x5e0] sm:$0xff] }
 0x165   : > { %4698 = vmatpush1.bf16.msra.mxu1 %v4697_v1  ;;  %4526 = vmatpush1.bf16.msra.mxu0 %v4525_v2  ;;  %v1116_v1 = vld [vmem:[%s5806_s29 + $0x500] sm:$0xff]  ;;  %v722_v2 = vld [vmem:[%s5798_s26 + $0x1b0] sm:$0xff]  ;;  %v1141_v53 = vld [vmem:[%s5806_s29 + $0x5c8] sm:$0xff] }
 0x166   : > { %4699 = vmatprep.subr.bf16.mxu1 %v5426_v4  ;;  %4528 = vmatprep.subr.bf16.mxu0 %v4527_v5  ;;  %v4715_v5 = vpack.c.bf16 %v1111_v61, %v1108_v59  ;;  %v4551_v8 = vpack.c.bf16 %v1116_v1, %v1113_v0  ;;  %v759_v59 = vld [vmem:[%s5798_s26 + $0x2d8] sm:$0xff]  ;;  %v1142_v1 = vld [vmem:[%s5806_s29 + $0x5d0] sm:$0xff] }
 0x167   : > { %2388 = vmatmul.mubr.f32.gmra.mrb[8].mxu1 %v692_v11  ;;  %1333 = vmatmul.mubr.f32.gmra.mrb[8].mxu0 %v692_v11  ;;  %v1115_v11 = vld [vmem:[%s5806_s29 + $0x4f8] sm:$0xff] }
 0x168   : > { %2392 = vmatprep.mubr.f32.mxu1 %v699_v12  ;;  %1338 = vmatprep.mubr.f32.mxu0 %v699_v12  ;;  %v1119_v12 = vld [vmem:[%s5806_s29 + $0x518] sm:$0xff]  ;;  %v4553_v17 = vpack.c.bf16 %v1115_v11, %v1112_v10  ;;  %v1149_v10 = vld [vmem:[%s5806_s29 + $0x608] sm:$0xff]  ;;  %v1152_v11 = vld [vmem:[%s5806_s29 + $0x620] sm:$0xff] }
 0x169   : > { %4701 = vmatpush1.bf16.msra.mxu1 %v4700_v13  ;;  %4530 = vmatpush1.bf16.msra.mxu0 %v4529_v14  ;;  %v1122_v13 = vld [vmem:[%s5806_s29 + $0x530] sm:$0xff]  ;;  %v728_v14 = vld [vmem:[%s5798_s26 + $0x1e0] sm:$0xff]  ;;  %v1147_v0 = vld [vmem:[%s5806_s29 + $0x5f8] sm:$0xff] }
 0x16a   : > { %4702 = vmatprep.subr.bf16.mxu1 %v5426_v4  ;;  %4532 = vmatprep.subr.bf16.mxu0 %v4531_v16  ;;  %v4718_v16 = vpack.c.bf16 %v1117_v9, %v1114_v7  ;;  %v4555_v19 = vpack.c.bf16 %v1122_v13, %v1119_v12  ;;  %v771_v9 = vld [vmem:[%s5798_s26 + $0x338] sm:$0xff]  ;;  %v770_v12 = vld [vmem:[%s5798_s26 + $0x330] sm:$0xff]  ;;  %v4575_v13 = vpack.c.bf16 %v1152_v11, %v1149_v10 }
 0x16b   : > { %2393 = vmatmul.mubr.f32.gmra.mrb[10].mxu1 %v698_v22  ;;  %1339 = vmatmul.mubr.f32.gmra.mrb[10].mxu0 %v698_v22  ;;  %v1121_v22 = vld [vmem:[%s5806_s29 + $0x528] sm:$0xff]  ;;  %v950_v10 = vld [vmem:[%s5798_s26 + $0x8d0] sm:$0xff]  ;;  %v671_v11 = vld [vmem:[%s5798_s26 + $0x18] sm:$0xff] }
 0x16c   : > { %2397 = vmatprep.mubr.f32.mxu1 %v705_v23  ;;  %1344 = vmatprep.mubr.f32.mxu0 %v705_v23  ;;  %v1125_v23 = vld [vmem:[%s5806_s29 + $0x548] sm:$0xff]  ;;  %v4557_v28 = vpack.c.bf16 %v1121_v22, %v1118_v21  ;;  %v794_v21 = vld [vmem:[%s5798_s26 + $0x3f0] sm:$0xff] }
 0x16d   : > { %4704 = vmatpush1.bf16.msra.mxu1 %v4703_v24  ;;  %4534 = vmatpush1.bf16.msra.mxu0 %v4533_v25  ;;  %v1128_v24 = vld [vmem:[%s5806_s29 + $0x560] sm:$0xff]  ;;  %v734_v25 = vld [vmem:[%s5798_s26 + $0x210] sm:$0xff]  ;;  %v801_v22 = vld [vmem:[%s5798_s26 + $0x428] sm:$0xff] }
 0x16e   : > { %4705 = vmatprep.subr.bf16.mxu1 %v5426_v4  ;;  %4536 = vmatprep.subr.bf16.mxu0 %v4535_v27  ;;  %v4721_v27 = vpack.c.bf16 %v1123_v20, %v1120_v18  ;;  %v4559_v30 = vpack.c.bf16 %v1128_v24, %v1125_v23  ;;  %v789_v18 = vld [vmem:[%s5798_s26 + $0x3c8] sm:$0xff]  ;;  %v795_v20 = vld [vmem:[%s5798_s26 + $0x3f8] sm:$0xff]  ;;  %v800_v23 = vld [vmem:[%s5798_s26 + $0x420] sm:$0xff] }
 0x16f   : > { %2398 = vmatmul.mubr.f32.gmra.mrb[12].mxu1 %v704_v33  ;;  %1345 = vmatmul.mubr.f32.gmra.mrb[12].mxu0 %v704_v33  ;;  %v1127_v33 = vld [vmem:[%s5806_s29 + $0x558] sm:$0xff] }
 0x170   : > { %2402 = vmatprep.mubr.f32.mxu1 %v711_v34  ;;  %1350 = vmatprep.mubr.f32.mxu0 %v711_v34  ;;  %v1131_v34 = vld [vmem:[%s5806_s29 + $0x578] sm:$0xff]  ;;  %v4561_v39 = vpack.c.bf16 %v1127_v33, %v1124_v32  ;;  %v830_v33 = vld [vmem:[%s5798_s26 + $0x510] sm:$0xff] }
 0x171   : > { %4707 = vmatpush1.bf16.msra.mxu1 %v4706_v35  ;;  %4538 = vmatpush1.bf16.msra.mxu0 %v4537_v36  ;;  %v1134_v35 = vld [vmem:[%s5806_s29 + $0x590] sm:$0xff]  ;;  %v740_v36 = vld [vmem:[%s5798_s26 + $0x240] sm:$0xff]  ;;  %v807_v24 = vld [vmem:[%s5798_s26 + $0x458] sm:$0xff] }
 0x172   : > { %4708 = vmatprep.subr.bf16.mxu1 %v5426_v4  ;;  %4540 = vmatprep.subr.bf16.mxu0 %v4539_v38  ;;  %v4724_v38 = vpack.c.bf16 %v1129_v31, %v1126_v29  ;;  %v4563_v41 = vpack.c.bf16 %v1134_v35, %v1131_v34  ;;  %v818_v29 = vld [vmem:[%s5798_s26 + $0x4b0] sm:$0xff]  ;;  %v824_v31 = vld [vmem:[%s5798_s26 + $0x4e0] sm:$0xff]  ;;  %v831_v32 = vld [vmem:[%s5798_s26 + $0x518] sm:$0xff] }
 0x173   : > { %2403 = vmatmul.mubr.f32.gmra.mrb[14].mxu1 %v710_v44  ;;  %1351 = vmatmul.mubr.f32.gmra.mrb[14].mxu0 %v710_v44  ;;  %v1133_v44 = vld [vmem:[%s5806_s29 + $0x588] sm:$0xff]  ;;  %v836_v35 = vld [vmem:[%s5798_s26 + $0x540] sm:$0xff] }
 0x174   : > { %2407 = vmatprep.mubr.f32.mxu1 %v717_v45  ;;  %1356 = vmatprep.mubr.f32.mxu0 %v717_v45  ;;  %v1137_v45 = vld [vmem:[%s5806_s29 + $0x5a8] sm:$0xff]  ;;  %v4565_v50 = vpack.c.bf16 %v1133_v44, %v1130_v43  ;;  %v860_v43 = vld [vmem:[%s5798_s26 + $0x600] sm:$0xff]  ;;  %v867_v44 = vld [vmem:[%s5798_s26 + $0x638] sm:$0xff] }
 0x175   : > { %4710 = vmatpush1.bf16.msra.mxu1 %v4709_v46  ;;  %4542 = vmatpush1.bf16.msra.mxu0 %v4541_v47  ;;  %v1140_v46 = vld [vmem:[%s5806_s29 + $0x5c0] sm:$0xff]  ;;  %v746_v47 = vld [vmem:[%s5798_s26 + $0x270] sm:$0xff]  ;;  %v837_v34 = vld [vmem:[%s5798_s26 + $0x548] sm:$0xff] }
 0x176   : > { %4711 = vmatprep.subr.bf16.mxu1 %v5426_v4  ;;  %4544 = vmatprep.subr.bf16.mxu0 %v4543_v49  ;;  %v4727_v49 = vpack.c.bf16 %v1135_v42, %v1132_v40  ;;  %v4567_v52 = vpack.c.bf16 %v1140_v46, %v1137_v45  ;;  %v855_v40 = vld [vmem:[%s5798_s26 + $0x5d8] sm:$0xff]  ;;  %v861_v42 = vld [vmem:[%s5798_s26 + $0x608] sm:$0xff]  ;;  %v866_v45 = vld [vmem:[%s5798_s26 + $0x630] sm:$0xff] }
 0x177   : > { %2408 = vmatmul.mubr.f32.gmra.mrb[16].mxu1 %v716_v55  ;;  %1357 = vmatmul.mubr.f32.gmra.mrb[16].mxu0 %v716_v55  ;;  %v1139_v55 = vld [vmem:[%s5806_s29 + $0x5b8] sm:$0xff]  ;;  %v873_v46 = vld [vmem:[%s5798_s26 + $0x668] sm:$0xff] }
 0x178   : > { %2412 = vmatprep.mubr.f32.mxu1 %v723_v56  ;;  %1362 = vmatprep.mubr.f32.mxu0 %v723_v56  ;;  %v1143_v56 = vld [vmem:[%s5806_s29 + $0x5d8] sm:$0xff]  ;;  %v4569_v61 = vpack.c.bf16 %v1139_v55, %v1136_v54  ;;  %v897_v54 = vld [vmem:[%s5798_s26 + $0x728] sm:$0xff]  ;;  %v896_v55 = vld [vmem:[%s5798_s26 + $0x720] sm:$0xff] }
 0x179   : > { %4713 = vmatpush1.bf16.msra.mxu1 %v4712_v57  ;;  %4546 = vmatpush1.bf16.msra.mxu0 %v4545_v58  ;;  %v1146_v57 = vld [vmem:[%s5806_s29 + $0x5f0] sm:$0xff]  ;;  %v752_v58 = vld [vmem:[%s5798_s26 + $0x2a0] sm:$0xff] }
 0x17a   : > { %4714 = vmatprep.subr.bf16.mxu1 %v5426_v4  ;;  %4548 = vmatprep.subr.bf16.mxu0 %v4547_v60  ;;  %v4730_v60 = vpack.c.bf16 %v1141_v53, %v1138_v51  ;;  %v4571_v63 = vpack.c.bf16 %v1146_v57, %v1143_v56  ;;  %v884_v51 = vld [vmem:[%s5798_s26 + $0x6c0] sm:$0xff]  ;;  %v890_v53 = vld [vmem:[%s5798_s26 + $0x6f0] sm:$0xff]  ;;  %v903_v56 = vld [vmem:[%s5798_s26 + $0x758] sm:$0xff] }
 0x17b   : > { %2413 = vmatmul.mubr.f32.gmra.mrb[18].mxu1 %v722_v2  ;;  %1363 = vmatmul.mubr.f32.gmra.mrb[18].mxu0 %v722_v2  ;;  %v1145_v2 = vld [vmem:[%s5806_s29 + $0x5e8] sm:$0xff]  ;;  %v902_v57 = vld [vmem:[%s5798_s26 + $0x750] sm:$0xff] }
 0x17c   : > { %2417 = vmatprep.mubr.f32.mxu1 %v729_v3  ;;  %1368 = vmatprep.mubr.f32.mxu0 %v729_v3  ;;  %v758_v3 = vld [vmem:[%s5798_s26 + $0x2d0] sm:$0xff]  ;;  %v4573_v7 = vpack.c.bf16 %v1145_v2, %v1142_v1  ;;  %v933_v2 = vld [vmem:[%s5798_s26 + $0x848] sm:$0xff] }
 0x17d   : > { %4716 = vmatpush1.bf16.msra.mxu1 %v4715_v5  ;;  %4550 = vmatpush1.bf16.msra.mxu0 %v4549_v6  ;;  %v765_v5 = vld [vmem:[%s5798_s26 + $0x308] sm:$0xff]  ;;  %v4733_v6 = vpack.c.bf16 %v1147_v0, %v1144_v62  ;;  %v927_v0 = vld [vmem:[%s5798_s26 + $0x818] sm:$0xff]  ;;  %v926_v1 = vld [vmem:[%s5798_s26 + $0x810] sm:$0xff] }
 0x17e   : > { %4717 = vmatprep.subr.bf16.mxu1 %v5426_v4  ;;  %4552 = vmatprep.subr.bf16.mxu0 %v4551_v8  ;;  %v764_v8 = vld [vmem:[%s5798_s26 + $0x300] sm:$0xff]  ;;  %v921_v62 = vld [vmem:[%s5798_s26 + $0x7e8] sm:$0xff] }
 0x17f   : > { %2418 = vmatmul.mubr.f32.gmra.mrb[20].mxu1 %v728_v14  ;;  %1369 = vmatmul.mubr.f32.gmra.mrb[20].mxu0 %v728_v14  ;;  %v777_v14 = vld [vmem:[%s5798_s26 + $0x368] sm:$0xff] }
 0x180   : > { %2422 = vmatprep.mubr.f32.mxu1 %v735_v15  ;;  %1374 = vmatprep.mubr.f32.mxu0 %v735_v15  ;;  %v776_v15 = vld [vmem:[%s5798_s26 + $0x360] sm:$0xff] }
 0x181   : > { %4719 = vmatpush1.bf16.msra.mxu1 %v4718_v16  ;;  %4554 = vmatpush1.bf16.msra.mxu0 %v4553_v17  ;;  %v783_v16 = vld [vmem:[%s5798_s26 + $0x398] sm:$0xff]  ;;  %v782_v17 = vld [vmem:[%s5798_s26 + $0x390] sm:$0xff] }
 0x182   : > { %4720 = vmatprep.subr.bf16.mxu1 %v5426_v4  ;;  %4556 = vmatprep.subr.bf16.mxu0 %v4555_v19  ;;  %v788_v19 = vld [vmem:[%s5798_s26 + $0x3c0] sm:$0xff] }
 0x183   : > { %2423 = vmatmul.mubr.f32.gmra.mrb[22].mxu1 %v734_v25  ;;  %1375 = vmatmul.mubr.f32.gmra.mrb[22].mxu0 %v734_v25  ;;  %v806_v25 = vld [vmem:[%s5798_s26 + $0x450] sm:$0xff] }
 0x184   : > { %2427 = vmatprep.mubr.f32.mxu1 %v741_v26  ;;  %1380 = vmatprep.mubr.f32.mxu0 %v741_v26  ;;  %v813_v26 = vld [vmem:[%s5798_s26 + $0x488] sm:$0xff] }
 0x185   : > { %4722 = vmatpush1.bf16.msra.mxu1 %v4721_v27  ;;  %4558 = vmatpush1.bf16.msra.mxu0 %v4557_v28  ;;  %v812_v27 = vld [vmem:[%s5798_s26 + $0x480] sm:$0xff]  ;;  %v819_v28 = vld [vmem:[%s5798_s26 + $0x4b8] sm:$0xff] }
 0x186   : > { %4723 = vmatprep.subr.bf16.mxu1 %v5426_v4  ;;  %4560 = vmatprep.subr.bf16.mxu0 %v4559_v30  ;;  %v825_v30 = vld [vmem:[%s5798_s26 + $0x4e8] sm:$0xff] }
 0x187   : > { %2428 = vmatmul.mubr.f32.gmra.mrb[24].mxu1 %v740_v36  ;;  %1381 = vmatmul.mubr.f32.gmra.mrb[24].mxu0 %v740_v36  ;;  %v843_v36 = vld [vmem:[%s5798_s26 + $0x578] sm:$0xff] }
 0x188   : > { %2432 = vmatprep.mubr.f32.mxu1 %v747_v37  ;;  %1386 = vmatprep.mubr.f32.mxu0 %v747_v37  ;;  %v842_v37 = vld [vmem:[%s5798_s26 + $0x570] sm:$0xff] }
 0x189   : > { %4725 = vmatpush1.bf16.msra.mxu1 %v4724_v38  ;;  %4562 = vmatpush1.bf16.msra.mxu0 %v4561_v39  ;;  %v849_v38 = vld [vmem:[%s5798_s26 + $0x5a8] sm:$0xff]  ;;  %v848_v39 = vld [vmem:[%s5798_s26 + $0x5a0] sm:$0xff] }
 0x18a   : > { %4726 = vmatprep.subr.bf16.mxu1 %v5426_v4  ;;  %4564 = vmatprep.subr.bf16.mxu0 %v4563_v41  ;;  %v854_v41 = vld [vmem:[%s5798_s26 + $0x5d0] sm:$0xff] }
 0x18b   : > { %2433 = vmatmul.mubr.f32.gmra.mrb[26].mxu1 %v746_v47  ;;  %1387 = vmatmul.mubr.f32.gmra.mrb[26].mxu0 %v746_v47  ;;  %v872_v47 = vld [vmem:[%s5798_s26 + $0x660] sm:$0xff] }
 0x18c   : > { %2437 = vmatprep.mubr.f32.mxu1 %v753_v48  ;;  %1392 = vmatprep.mubr.f32.mxu0 %v753_v48  ;;  %v879_v48 = vld [vmem:[%s5798_s26 + $0x698] sm:$0xff] }
 0x18d   : > { %4728 = vmatpush1.bf16.msra.mxu1 %v4727_v49  ;;  %4566 = vmatpush1.bf16.msra.mxu0 %v4565_v50  ;;  %v878_v49 = vld [vmem:[%s5798_s26 + $0x690] sm:$0xff]  ;;  %v885_v50 = vld [vmem:[%s5798_s26 + $0x6c8] sm:$0xff] }
 0x18e   : > { %4729 = vmatprep.subr.bf16.mxu1 %v5426_v4  ;;  %4568 = vmatprep.subr.bf16.mxu0 %v4567_v52  ;;  %v891_v52 = vld [vmem:[%s5798_s26 + $0x6f8] sm:$0xff] }
 0x18f   : > { %2438 = vmatmul.mubr.f32.gmra.mrb[28].mxu1 %v752_v58  ;;  %1393 = vmatmul.mubr.f32.gmra.mrb[28].mxu0 %v752_v58  ;;  %v909_v58 = vld [vmem:[%s5798_s26 + $0x788] sm:$0xff] }
 0x190   : > { %2442 = vmatprep.mubr.f32.mxu1 %v759_v59  ;;  %1398 = vmatprep.mubr.f32.mxu0 %v759_v59  ;;  %v908_v59 = vld [vmem:[%s5798_s26 + $0x780] sm:$0xff] }
 0x191   : > { %4731 = vmatpush1.bf16.msra.mxu1 %v4730_v60  ;;  %4570 = vmatpush1.bf16.msra.mxu0 %v4569_v61  ;;  %v915_v60 = vld [vmem:[%s5798_s26 + $0x7b8] sm:$0xff]  ;;  %v914_v61 = vld [vmem:[%s5798_s26 + $0x7b0] sm:$0xff] }
 0x192   : > { %4732 = vmatprep.subr.bf16.mxu1 %v5426_v4  ;;  %4572 = vmatprep.subr.bf16.mxu0 %v4571_v63  ;;  %v920_v63 = vld [vmem:[%s5798_s26 + $0x7e0] sm:$0xff] }
 0x193   : > { %2443 = vmatmul.mubr.f32.gmra.mrb[30].mxu1 %v758_v3  ;;  %1399 = vmatmul.mubr.f32.gmra.mrb[30].mxu0 %v758_v3  ;;  %v932_v3 = vld [vmem:[%s5798_s26 + $0x840] sm:$0xff] }
 0x194   : > { %2447 = vmatprep.mubr.f32.mxu1 %v765_v5  ;;  %1404 = vmatprep.mubr.f32.mxu0 %v765_v5  ;;  %v939_v5 = vld [vmem:[%s5798_s26 + $0x878] sm:$0xff] }
 0x195   : > { %4734 = vmatpush1.bf16.msra.mxu1 %v4733_v6  ;;  %4574 = vmatpush1.bf16.msra.mxu0 %v4573_v7  ;;  %v938_v6 = vld [vmem:[%s5798_s26 + $0x870] sm:$0xff]  ;;  %v945_v7 = vld [vmem:[%s5798_s26 + $0x8a8] sm:$0xff] }
 0x196   : > { %4735 = vmatprep.subr.bf16.mxu1 %v5426_v4  ;;  %4576 = vmatprep.subr.bf16.mxu0 %v4575_v13  ;;  %v1153_v13 = vld [vmem:[%s5806_s29 + $0x628] sm:$0xff] }
 0x197   : > { %2448 = vmatmul.mubr.f32.gmra.mrb[32].mxu1 %v764_v8  ;;  %1405 = vmatmul.mubr.f32.gmra.mrb[32].mxu0 %v764_v8  ;;  %v944_v8 = vld [vmem:[%s5798_s26 + $0x8a0] sm:$0xff] }
 0x198   : > { %2452 = vmatprep.mubr.f32.mxu1 %v771_v9  ;;  %1410 = vmatprep.mubr.f32.mxu0 %v771_v9  ;;  %v951_v9 = vld [vmem:[%s5798_s26 + $0x8d8] sm:$0xff] }
 0x19b   : > { %2453 = vmatmul.mubr.f32.gmra.mrb[34].mxu1 %v770_v12  ;;  %1411 = vmatmul.mubr.f32.gmra.mrb[34].mxu0 %v770_v12  ;;  %v1150_v12 = vld [vmem:[%s5806_s29 + $0x610] sm:$0xff] }
 0x19c   : > { %2457 = vmatprep.mubr.f32.mxu1 %v777_v14  ;;  %1416 = vmatprep.mubr.f32.mxu0 %v777_v14  ;;  %v1148_v14 = vld [vmem:[%s5806_s29 + $0x600] sm:$0xff] }
 0x19f   : > { %2458 = vmatmul.mubr.f32.gmra.mrb[36].mxu1 %v776_v15  ;;  %1417 = vmatmul.mubr.f32.gmra.mrb[36].mxu0 %v776_v15  ;;  %v1151_v15 = vld [vmem:[%s5806_s29 + $0x618] sm:$0xff] }
 0x1a0   : > { %2462 = vmatprep.mubr.f32.mxu1 %v783_v16  ;;  %1422 = vmatprep.mubr.f32.mxu0 %v783_v16  ;;  %v1155_v16 = vld [vmem:[%s5806_s29 + $0x638] sm:$0xff] }
 0x1a3   : > { %2463 = vmatmul.mubr.f32.gmra.mrb[38].mxu1 %v782_v17  ;;  %1423 = vmatmul.mubr.f32.gmra.mrb[38].mxu0 %v782_v17  ;;  %v1158_v17 = vld [vmem:[%s5806_s29 + $0x650] sm:$0xff] }
 0x1a4   : > { %2467 = vmatprep.mubr.f32.mxu1 %v789_v18  ;;  %1428 = vmatprep.mubr.f32.mxu0 %v789_v18  ;;  %v670_v18 = vld [vmem:[%s5798_s26 + $0x10] sm:$0xff] }
 0x1a7   : > { %2468 = vmatmul.mubr.f32.gmra.mrb[40].mxu1 %v788_v19  ;;  %1429 = vmatmul.mubr.f32.gmra.mrb[40].mxu0 %v788_v19  ;;  %v4736_v19 = vpack.c.bf16 %v1153_v13, %v1150_v12 }
 0x1a8   : > { %2472 = vmatprep.mubr.f32.mxu1 %v795_v20  ;;  %1434 = vmatprep.mubr.f32.mxu0 %v795_v20  ;;  %v4577_v20 = vpack.c.bf16 %v1151_v15, %v1148_v14  ;;  %v1186_v14 = vld [vmem:[%s5806_s29 + $0x730] sm:$0xff] }
 0x1ab   : > { %2473 = vmatmul.mubr.f32.gmra.mrb[42].mxu1 %v794_v21  ;;  %1435 = vmatmul.mubr.f32.gmra.mrb[42].mxu0 %v794_v21  ;;  %v677_v21 = vld [vmem:[%s5798_s26 + $0x48] sm:$0xff] }
 0x1ac   : > { %2477 = vmatprep.mubr.f32.mxu1 %v801_v22  ;;  %1440 = vmatprep.mubr.f32.mxu0 %v801_v22  ;;  %v1156_v22 = vld [vmem:[%s5806_s29 + $0x640] sm:$0xff] }
 0x1af   : > { %2478 = vmatmul.mubr.f32.gmra.mrb[44].mxu1 %v800_v23  ;;  %1441 = vmatmul.mubr.f32.gmra.mrb[44].mxu0 %v800_v23  ;;  %v4579_v23 = vpack.c.bf16 %v1158_v17, %v1155_v16  ;;  %v1189_v17 = vld [vmem:[%s5806_s29 + $0x748] sm:$0xff] }
 0x1b0   : > { %2482 = vmatprep.mubr.f32.mxu1 %v807_v24  ;;  %1446 = vmatprep.mubr.f32.mxu0 %v807_v24  ;;  %v1159_v24 = vld [vmem:[%s5806_s29 + $0x658] sm:$0xff] }
 0x1b3   : > { %2483 = vmatmul.mubr.f32.gmra.mrb[46].mxu1 %v806_v25  ;;  %1447 = vmatmul.mubr.f32.gmra.mrb[46].mxu0 %v806_v25  ;;  %v1154_v25 = vld [vmem:[%s5806_s29 + $0x630] sm:$0xff] }
 0x1b4   : > { %2487 = vmatprep.mubr.f32.mxu1 %v813_v26  ;;  %1452 = vmatprep.mubr.f32.mxu0 %v813_v26  ;;  %v1157_v26 = vld [vmem:[%s5806_s29 + $0x648] sm:$0xff] }
 0x1b7   : > { %2488 = vmatmul.mubr.f32.gmra.mrb[48].mxu1 %v812_v27  ;;  %1453 = vmatmul.mubr.f32.gmra.mrb[48].mxu0 %v812_v27  ;;  %v1161_v27 = vld [vmem:[%s5806_s29 + $0x668] sm:$0xff] }
 0x1b8   : > { %2492 = vmatprep.mubr.f32.mxu1 %v819_v28  ;;  %1458 = vmatprep.mubr.f32.mxu0 %v819_v28  ;;  %v1164_v28 = vld [vmem:[%s5806_s29 + $0x680] sm:$0xff] }
 0x1bb   : > { %2493 = vmatmul.mubr.f32.gmra.mrb[50].mxu1 %v818_v29  ;;  %1459 = vmatmul.mubr.f32.gmra.mrb[50].mxu0 %v818_v29  ;;  %v676_v29 = vld [vmem:[%s5798_s26 + $0x40] sm:$0xff] }
 0x1bc   : > { %2497 = vmatprep.mubr.f32.mxu1 %v825_v30  ;;  %1464 = vmatprep.mubr.f32.mxu0 %v825_v30  ;;  %v683_v30 = vld [vmem:[%s5798_s26 + $0x78] sm:$0xff] }
 0x1bf   : > { %2498 = vmatmul.mubr.f32.gmra.mrb[52].mxu1 %v824_v31  ;;  %1465 = vmatmul.mubr.f32.gmra.mrb[52].mxu0 %v824_v31  ;;  %v4739_v31 = vpack.c.bf16 %v1159_v24, %v1156_v22  ;;  %v1194_v22 = vld [vmem:[%s5806_s29 + $0x770] sm:$0xff]  ;;  %v713_v24 = vld [vmem:[%s5798_s26 + $0x168] sm:$0xff] }
 0x1c0   : > { %2502 = vmatprep.mubr.f32.mxu1 %v831_v32  ;;  %1470 = vmatprep.mubr.f32.mxu0 %v831_v32  ;;  %v4581_v32 = vpack.c.bf16 %v1157_v26, %v1154_v25  ;;  %v4754_v25 = vpack.c.bf16 %v1189_v17, %v1186_v14  ;;  %v1216_v17 = vld [vmem:[%s5806_s29 + $0x820] sm:$0xff] }
 0x1c3   : > { %2503 = vmatmul.mubr.f32.gmra.mrb[54].mxu1 %v830_v33  ;;  %1471 = vmatmul.mubr.f32.gmra.mrb[54].mxu0 %v830_v33  ;;  %v1162_v33 = vld [vmem:[%s5806_s29 + $0x670] sm:$0xff] }
 0x1c4   : > { %2507 = vmatprep.mubr.f32.mxu1 %v837_v34  ;;  %1476 = vmatprep.mubr.f32.mxu0 %v837_v34  ;;  %v4583_v34 = vpack.c.bf16 %v1164_v28, %v1161_v27  ;;  %v1192_v27 = vld [vmem:[%s5806_s29 + $0x760] sm:$0xff] }
 0x1c7   : > { %2508 = vmatmul.mubr.f32.gmra.mrb[56].mxu1 %v836_v35  ;;  %1477 = vmatmul.mubr.f32.gmra.mrb[56].mxu0 %v836_v35  ;;  %v1165_v35 = vld [vmem:[%s5806_s29 + $0x688] sm:$0xff] }
 0x1c8   : > { %2512 = vmatprep.mubr.f32.mxu1 %v843_v36  ;;  %1482 = vmatprep.mubr.f32.mxu0 %v843_v36  ;;  %v1160_v36 = vld [vmem:[%s5806_s29 + $0x660] sm:$0xff] }
 0x1cb   : > { %2513 = vmatmul.mubr.f32.gmra.mrb[58].mxu1 %v842_v37  ;;  %1483 = vmatmul.mubr.f32.gmra.mrb[58].mxu0 %v842_v37  ;;  %v1163_v37 = vld [vmem:[%s5806_s29 + $0x678] sm:$0xff] }
 0x1cc   : > { %2517 = vmatprep.mubr.f32.mxu1 %v849_v38  ;;  %1488 = vmatprep.mubr.f32.mxu0 %v849_v38  ;;  %v1167_v38 = vld [vmem:[%s5806_s29 + $0x698] sm:$0xff] }
 0x1cf   : > { %2518 = vmatmul.mubr.f32.gmra.mrb[60].mxu1 %v848_v39  ;;  %1489 = vmatmul.mubr.f32.gmra.mrb[60].mxu0 %v848_v39  ;;  %v1170_v39 = vld [vmem:[%s5806_s29 + $0x6b0] sm:$0xff] }
 0x1d0   : > { %2522 = vmatprep.mubr.f32.mxu1 %v855_v40  ;;  %1494 = vmatprep.mubr.f32.mxu0 %v855_v40  ;;  %v682_v40 = vld [vmem:[%s5798_s26 + $0x70] sm:$0xff] }
 0x1d3   : > { %2523 = vmatmul.mubr.f32.gmra.mrb[62].mxu1 %v854_v41  ;;  %1495 = vmatmul.mubr.f32.gmra.mrb[62].mxu0 %v854_v41  ;;  %v689_v41 = vld [vmem:[%s5798_s26 + $0xa8] sm:$0xff] }
 0x1d4   : > { %2527 = vmatprep.mubr.f32.mxu1 %v861_v42  ;;  %1500 = vmatprep.mubr.f32.mxu0 %v861_v42  ;;  %v4742_v42 = vpack.c.bf16 %v1165_v35, %v1162_v33  ;;  %v1200_v35 = vld [vmem:[%s5806_s29 + $0x7a0] sm:$0xff] }
 0x1d7   : > { %2528 = vmatmul.mubr.f32.gmra.mrb[64].mxu1 %v860_v43  ;;  %1501 = vmatmul.mubr.f32.gmra.mrb[64].mxu0 %v860_v43  ;;  %v4585_v43 = vpack.c.bf16 %v1163_v37, %v1160_v36  ;;  %v712_v36 = vld [vmem:[%s5798_s26 + $0x160] sm:$0xff]  ;;  %v719_v37 = vld [vmem:[%s5798_s26 + $0x198] sm:$0xff] }
 0x1d8   : > { %2532 = vmatprep.mubr.f32.mxu1 %v867_v44  ;;  %1506 = vmatprep.mubr.f32.mxu0 %v867_v44  ;;  %v1168_v44 = vld [vmem:[%s5806_s29 + $0x6a0] sm:$0xff] }
 0x1db   : > { %2533 = vmatmul.mubr.f32.gmra.mrb[66].mxu1 %v866_v45  ;;  %1507 = vmatmul.mubr.f32.gmra.mrb[66].mxu0 %v866_v45  ;;  %v4587_v45 = vpack.c.bf16 %v1170_v39, %v1167_v38 }
 0x1dc   : > { %2537 = vmatprep.mubr.f32.mxu1 %v873_v46  ;;  %1512 = vmatprep.mubr.f32.mxu0 %v873_v46  ;;  %v1171_v46 = vld [vmem:[%s5806_s29 + $0x6b8] sm:$0xff] }
 0x1df   : > { %2538 = vmatmul.mubr.f32.gmra.mrb[68].mxu1 %v872_v47  ;;  %1513 = vmatmul.mubr.f32.gmra.mrb[68].mxu0 %v872_v47  ;;  %v1166_v47 = vld [vmem:[%s5806_s29 + $0x690] sm:$0xff] }
 0x1e0   : > { %2542 = vmatprep.mubr.f32.mxu1 %v879_v48  ;;  %1518 = vmatprep.mubr.f32.mxu0 %v879_v48  ;;  %v1169_v48 = vld [vmem:[%s5806_s29 + $0x6a8] sm:$0xff] }
 0x1e3   : > { %2543 = vmatmul.mubr.f32.gmra.mrb[70].mxu1 %v878_v49  ;;  %1519 = vmatmul.mubr.f32.gmra.mrb[70].mxu0 %v878_v49  ;;  %v1173_v49 = vld [vmem:[%s5806_s29 + $0x6c8] sm:$0xff] }
 0x1e4   : > { %2547 = vmatprep.mubr.f32.mxu1 %v885_v50  ;;  %1524 = vmatprep.mubr.f32.mxu0 %v885_v50  ;;  %v1176_v50 = vld [vmem:[%s5806_s29 + $0x6e0] sm:$0xff] }
 0x1e7   : > { %2548 = vmatmul.mubr.f32.gmra.mrb[72].mxu1 %v884_v51  ;;  %1525 = vmatmul.mubr.f32.gmra.mrb[72].mxu0 %v884_v51  ;;  %v688_v51 = vld [vmem:[%s5798_s26 + $0xa0] sm:$0xff] }
 0x1e8   : > { %2552 = vmatprep.mubr.f32.mxu1 %v891_v52  ;;  %1530 = vmatprep.mubr.f32.mxu0 %v891_v52  ;;  %v695_v52 = vld [vmem:[%s5798_s26 + $0xd8] sm:$0xff] }
 0x1eb   : > { %2553 = vmatmul.mubr.f32.gmra.mrb[74].mxu1 %v890_v53  ;;  %1531 = vmatmul.mubr.f32.gmra.mrb[74].mxu0 %v890_v53  ;;  %v4745_v53 = vpack.c.bf16 %v1171_v46, %v1168_v44  ;;  %v1196_v44 = vld [vmem:[%s5806_s29 + $0x780] sm:$0xff] }
 0x1ec   : > { %2557 = vmatprep.mubr.f32.mxu1 %v897_v54  ;;  %1536 = vmatprep.mubr.f32.mxu0 %v897_v54  ;;  %v4589_v54 = vpack.c.bf16 %v1169_v48, %v1166_v47  ;;  %v1203_v47 = vld [vmem:[%s5806_s29 + $0x7b8] sm:$0xff]  ;;  %v1206_v48 = vld [vmem:[%s5806_s29 + $0x7d0] sm:$0xff] }
 0x1ef   : > { %2558 = vmatmul.mubr.f32.gmra.mrb[76].mxu1 %v896_v55  ;;  %1537 = vmatmul.mubr.f32.gmra.mrb[76].mxu0 %v896_v55  ;;  %v1174_v55 = vld [vmem:[%s5806_s29 + $0x6d0] sm:$0xff] }
 0x1f0   : > { %2562 = vmatprep.mubr.f32.mxu1 %v903_v56  ;;  %1542 = vmatprep.mubr.f32.mxu0 %v903_v56  ;;  %v4591_v56 = vpack.c.bf16 %v1176_v50, %v1173_v49  ;;  %v718_v49 = vld [vmem:[%s5798_s26 + $0x190] sm:$0xff]  ;;  %v725_v50 = vld [vmem:[%s5798_s26 + $0x1c8] sm:$0xff] }
 0x1f3   : > { %2563 = vmatmul.mubr.f32.gmra.mrb[78].mxu1 %v902_v57  ;;  %1543 = vmatmul.mubr.f32.gmra.mrb[78].mxu0 %v902_v57  ;;  %v1177_v57 = vld [vmem:[%s5806_s29 + $0x6e8] sm:$0xff] }
 0x1f4   : > { %2567 = vmatprep.mubr.f32.mxu1 %v909_v58  ;;  %1548 = vmatprep.mubr.f32.mxu0 %v909_v58  ;;  %v1172_v58 = vld [vmem:[%s5806_s29 + $0x6c0] sm:$0xff] }
 0x1f7   : > { %2568 = vmatmul.mubr.f32.gmra.mrb[80].mxu1 %v908_v59  ;;  %1549 = vmatmul.mubr.f32.gmra.mrb[80].mxu0 %v908_v59  ;;  %v1175_v59 = vld [vmem:[%s5806_s29 + $0x6d8] sm:$0xff] }
 0x1f8   : > { %2572 = vmatprep.mubr.f32.mxu1 %v915_v60  ;;  %1554 = vmatprep.mubr.f32.mxu0 %v915_v60  ;;  %v1179_v60 = vld [vmem:[%s5806_s29 + $0x6f8] sm:$0xff] }
 0x1fb   : > { %2573 = vmatmul.mubr.f32.gmra.mrb[82].mxu1 %v914_v61  ;;  %1555 = vmatmul.mubr.f32.gmra.mrb[82].mxu0 %v914_v61  ;;  %v1182_v61 = vld [vmem:[%s5806_s29 + $0x710] sm:$0xff] }
 0x1fc   : > { %2577 = vmatprep.mubr.f32.mxu1 %v921_v62  ;;  %1560 = vmatprep.mubr.f32.mxu0 %v921_v62  ;;  %v694_v62 = vld [vmem:[%s5798_s26 + $0xd0] sm:$0xff] }
 0x1ff   : > { %2578 = vmatmul.mubr.f32.gmra.mrb[84].mxu1 %v920_v63  ;;  %1561 = vmatmul.mubr.f32.gmra.mrb[84].mxu0 %v920_v63  ;;  %v701_v63 = vld [vmem:[%s5798_s26 + $0x108] sm:$0xff] }
 0x200   : > { %2582 = vmatprep.mubr.f32.mxu1 %v927_v0  ;;  %1566 = vmatprep.mubr.f32.mxu0 %v927_v0  ;;  %v4748_v0 = vpack.c.bf16 %v1177_v57, %v1174_v55  ;;  %v4611_v55 = vpack.c.bf16 %v1206_v48, %v1203_v47  ;;  %v1202_v57 = vld [vmem:[%s5806_s29 + $0x7b0] sm:$0xff]  ;;  %v1231_v48 = vld [vmem:[%s5806_s29 + $0x898] sm:$0xff] }
 0x203   : > { %2583 = vmatmul.mubr.f32.gmra.mrb[86].mxu1 %v926_v1  ;;  %1567 = vmatmul.mubr.f32.gmra.mrb[86].mxu0 %v926_v1  ;;  %v4593_v1 = vpack.c.bf16 %v1175_v59, %v1172_v58  ;;  %v1205_v58 = vld [vmem:[%s5806_s29 + $0x7c8] sm:$0xff] }
 0x204   : > { %2587 = vmatprep.mubr.f32.mxu1 %v933_v2  ;;  %1572 = vmatprep.mubr.f32.mxu0 %v933_v2  ;;  %v1180_v2 = vld [vmem:[%s5806_s29 + $0x700] sm:$0xff] }
 0x207   : > { %2588 = vmatmul.mubr.f32.gmra.mrb[88].mxu1 %v932_v3  ;;  %1573 = vmatmul.mubr.f32.gmra.mrb[88].mxu0 %v932_v3  ;;  %v4595_v3 = vpack.c.bf16 %v1182_v61, %v1179_v60  ;;  %v1209_v60 = vld [vmem:[%s5806_s29 + $0x7e8] sm:$0xff]  ;;  %v1212_v61 = vld [vmem:[%s5806_s29 + $0x800] sm:$0xff] }
 0x208   : > { %2592 = vmatprep.mubr.f32.mxu1 %v939_v5  ;;  %1578 = vmatprep.mubr.f32.mxu0 %v939_v5  ;;  %v1183_v5 = vld [vmem:[%s5806_s29 + $0x718] sm:$0xff] }
 0x209   : > { %v4751_v12 = vpack.c.bf16 %v1183_v5, %v1180_v2  ;;  %v1210_v2 = vld [vmem:[%s5806_s29 + $0x7f0] sm:$0xff]  ;;  %v4615_v5 = vpack.c.bf16 %v1212_v61, %v1209_v60 }
 0x20b   : > { %2593 = vmatmul.mubr.f32.gmra.mrb[90].mxu1 %v938_v6  ;;  %1579 = vmatmul.mubr.f32.gmra.mrb[90].mxu0 %v938_v6  ;;  %v1178_v6 = vld [vmem:[%s5806_s29 + $0x6f0] sm:$0xff] }
 0x20c   : > { %2597 = vmatprep.mubr.f32.mxu1 %v945_v7  ;;  %1584 = vmatprep.mubr.f32.mxu0 %v945_v7  ;;  %v1181_v7 = vld [vmem:[%s5806_s29 + $0x708] sm:$0xff] }
 0x20d   : > { %v4597_v13 = vpack.c.bf16 %v1181_v7, %v1178_v6  ;;  %v1213_v6 = vld [vmem:[%s5806_s29 + $0x808] sm:$0xff]  ;;  %v1208_v7 = vld [vmem:[%s5806_s29 + $0x7e0] sm:$0xff] }
 0x20e   : > { %v4766_v14 = vpack.c.bf16 %v1213_v6, %v1210_v2  ;;  %v1239_v2 = vld [vmem:[%s5806_s29 + $0x8d8] sm:$0xff]  ;;  %v754_v6 = vld [vmem:[%s5798_s26 + $0x2b0] sm:$0xff] }
 0x20f   : > { %2598 = vmatmul.mubr.f32.gmra.mrb[92].mxu1 %v944_v8  ;;  %1585 = vmatmul.mubr.f32.gmra.mrb[92].mxu0 %v944_v8  ;;  %v1185_v8 = vld [vmem:[%s5806_s29 + $0x728] sm:$0xff] }
 0x210   : > { %2602 = vmatprep.mubr.f32.mxu1 %v951_v9  ;;  %1590 = vmatprep.mubr.f32.mxu0 %v951_v9  ;;  %v1188_v9 = vld [vmem:[%s5806_s29 + $0x740] sm:$0xff] }
 0x211   : > { %v4599_v16 = vpack.c.bf16 %v1188_v9, %v1185_v8  ;;  %v1211_v8 = vld [vmem:[%s5806_s29 + $0x7f8] sm:$0xff] }
 0x213   : > { %2603 = vmatmul.mubr.f32.gmra.mrb[94].mxu1 %v950_v10  ;;  %1591 = vmatmul.mubr.f32.gmra.mrb[94].mxu0 %v950_v10  ;;  %v700_v10 = vld [vmem:[%s5798_s26 + $0x100] sm:$0xff] }
 0x214   : > { %2672 = vmatprep.mubr.f32.mxu1 %v671_v11  ;;  %1661 = vmatprep.mubr.f32.mxu0 %v671_v11  ;;  %v707_v11 = vld [vmem:[%s5798_s26 + $0x138] sm:$0xff] }
 0x217   : > { %2673 = vmatmul.mubr.f32.vlgmr.msra.gmra.mrb[96].mxu1 %v670_v18  ;;  %1662 = vmatmul.mubr.f32.vlgmr.msra.gmra.mrb[0].mxu0 %v670_v18  ;;  %v1184_v18 = vld [vmem:[%s5806_s29 + $0x720] sm:$0xff] }
 0x218   : > { %4737 = vmatpush1.bf16.msra.mxu1 %v4736_v19  ;;  %4578 = vmatpush1.bf16.msra.mxu0 %v4577_v20  ;;  %v1187_v19 = vld [vmem:[%s5806_s29 + $0x738] sm:$0xff] }
 0x219   : > { %2677 = vmatprep.mubr.f32.mxu1 %v677_v21  ;;  %1667 = vmatprep.mubr.f32.mxu0 %v677_v21  ;;  %v1191_v21 = vld [vmem:[%s5806_s29 + $0x758] sm:$0xff]  ;;  %v4601_v26 = vpack.c.bf16 %v1187_v19, %v1184_v18 }
 0x21a   : > { %4738 = vmatprep.subr.bf16.mxu1 %v5426_v4  ;;  %4580 = vmatprep.subr.bf16.mxu0 %v4579_v23  ;;  %v706_v23 = vld [vmem:[%s5798_s26 + $0x130] sm:$0xff] }
 0x21b   : > { %2678 = vmatmul.mubr.f32.gmra.mrb[98].mxu1 %v676_v29  ;;  %1668 = vmatmul.mubr.f32.gmra.mrb[2].mxu0 %v676_v29  ;;  %v4603_v29 = vpack.c.bf16 %v1194_v22, %v1191_v21  ;;  %v1214_v21 = vld [vmem:[%s5806_s29 + $0x810] sm:$0xff]  ;;  %v1217_v22 = vld [vmem:[%s5806_s29 + $0x828] sm:$0xff] }
 0x21c   : > { %2682 = vmatprep.mubr.f32.mxu1 %v683_v30  ;;  %1673 = vmatprep.mubr.f32.mxu0 %v683_v30  ;;  %v1195_v30 = vld [vmem:[%s5806_s29 + $0x778] sm:$0xff] }
 0x21d   : > { %4740 = vmatpush1.bf16.msra.mxu1 %v4739_v31  ;;  %4582 = vmatpush1.bf16.msra.mxu0 %v4581_v32  ;;  %v1190_v31 = vld [vmem:[%s5806_s29 + $0x750] sm:$0xff]  ;;  %v1193_v32 = vld [vmem:[%s5806_s29 + $0x768] sm:$0xff]  ;;  %v4757_v38 = vpack.c.bf16 %v1195_v30, %v1192_v27  ;;  %v743_v27 = vld [vmem:[%s5798_s26 + $0x258] sm:$0xff]  ;;  %v4621_v30 = vpack.c.bf16 %v1217_v22, %v1214_v21 }
 0x21e   : > { %4741 = vmatprep.subr.bf16.mxu1 %v5426_v4  ;;  %4584 = vmatprep.subr.bf16.mxu0 %v4583_v34  ;;  %v1197_v34 = vld [vmem:[%s5806_s29 + $0x788] sm:$0xff]  ;;  %v4605_v39 = vpack.c.bf16 %v1193_v32, %v1190_v31  ;;  %v1222_v31 = vld [vmem:[%s5806_s29 + $0x850] sm:$0xff] }
 0x21f   : > { %2683 = vmatmul.mubr.f32.gmra.mrb[100].mxu1 %v682_v40  ;;  %1674 = vmatmul.mubr.f32.gmra.mrb[4].mxu0 %v682_v40  ;;  %v1198_v40 = vld [vmem:[%s5806_s29 + $0x790] sm:$0xff] }
 0x220   : > { %2687 = vmatprep.mubr.f32.mxu1 %v689_v41  ;;  %1679 = vmatprep.mubr.f32.mxu0 %v689_v41 }
 0x221   : > { %4743 = vmatpush1.bf16.msra.mxu1 %v4742_v42  ;;  %4586 = vmatpush1.bf16.msra.mxu0 %v4585_v43  ;;  %v4607_v42 = vpack.c.bf16 %v1200_v35, %v1197_v34  ;;  %v1201_v43 = vld [vmem:[%s5806_s29 + $0x7a8] sm:$0xff]  ;;  %v1220_v35 = vld [vmem:[%s5806_s29 + $0x840] sm:$0xff] }
 0x222   : > { %4744 = vmatprep.subr.bf16.mxu1 %v5426_v4  ;;  %4588 = vmatprep.subr.bf16.mxu0 %v4587_v45  ;;  %v1199_v45 = vld [vmem:[%s5806_s29 + $0x798] sm:$0xff]  ;;  %v1225_v34 = vld [vmem:[%s5806_s29 + $0x868] sm:$0xff] }
 0x223   : > { %2688 = vmatmul.mubr.f32.gmra.mrb[102].mxu1 %v688_v51  ;;  %1680 = vmatmul.mubr.f32.gmra.mrb[6].mxu0 %v688_v51  ;;  %v4760_v51 = vpack.c.bf16 %v1201_v43, %v1198_v40  ;;  %v742_v40 = vld [vmem:[%s5798_s26 + $0x250] sm:$0xff]  ;;  %v4772_v43 = vpack.c.bf16 %v1225_v34, %v1222_v31 }
 0x224   : > { %2692 = vmatprep.mubr.f32.mxu1 %v695_v52  ;;  %1685 = vmatprep.mubr.f32.mxu0 %v695_v52  ;;  %v4609_v52 = vpack.c.bf16 %v1199_v45, %v1196_v44  ;;  %v1228_v45 = vld [vmem:[%s5806_s29 + $0x880] sm:$0xff]  ;;  %v778_v34 = vld [vmem:[%s5798_s26 + $0x370] sm:$0xff] }
 0x225   : > { %4746 = vmatpush1.bf16.msra.mxu1 %v4745_v53  ;;  %4590 = vmatpush1.bf16.msra.mxu0 %v4589_v54  ;;  %v1204_v53 = vld [vmem:[%s5806_s29 + $0x7c0] sm:$0xff] }
 0x226   : > { %4747 = vmatprep.subr.bf16.mxu1 %v5426_v4  ;;  %4592 = vmatprep.subr.bf16.mxu0 %v4591_v56  ;;  %v1207_v56 = vld [vmem:[%s5806_s29 + $0x7d8] sm:$0xff] }
 0x227   : > { %2693 = vmatmul.mubr.f32.gmra.mrb[104].mxu1 %v694_v62  ;;  %1686 = vmatmul.mubr.f32.gmra.mrb[8].mxu0 %v694_v62  ;;  %v724_v62 = vld [vmem:[%s5798_s26 + $0x1c0] sm:$0xff] }
 0x228   : > { %2697 = vmatprep.mubr.f32.mxu1 %v701_v63  ;;  %1691 = vmatprep.mubr.f32.mxu0 %v701_v63  ;;  %v731_v63 = vld [vmem:[%s5798_s26 + $0x1f8] sm:$0xff] }
 0x229   : > { %4749 = vmatpush1.bf16.msra.mxu1 %v4748_v0  ;;  %4594 = vmatpush1.bf16.msra.mxu0 %v4593_v1  ;;  %v4763_v0 = vpack.c.bf16 %v1207_v56, %v1204_v53  ;;  %v4613_v1 = vpack.c.bf16 %v1205_v58, %v1202_v57  ;;  %v1236_v53 = vld [vmem:[%s5806_s29 + $0x8c0] sm:$0xff]  ;;  %v755_v56 = vld [vmem:[%s5798_s26 + $0x2b8] sm:$0xff]  ;;  %v4775_v57 = vpack.c.bf16 %v1231_v48, %v1228_v45 }
 0x22a   : > { %v6498_v15 = vpop.f32.mrb[0].mxu1  ;;  %4750 = vmatprep.subr.bf16.mxu1 %v5426_v4  ;;  %4596 = vmatprep.subr.bf16.mxu0 %v4595_v3  ;;  %v796_v48 = vld [vmem:[%s5798_s26 + $0x400] sm:$0xff] }
 0x22b   : > { %v2371_v20 = vpop.f32.mrb[1].mxu1  ;;  %2698 = vmatmul.mubr.f32.gmra.mrb[106].mxu1 %v700_v10  ;;  %1692 = vmatmul.mubr.f32.gmra.mrb[10].mxu0 %v700_v10  ;;  %v1215_v10 = vld [vmem:[%s5806_s29 + $0x818] sm:$0xff] }
 0x22c   : > { %2702 = vmatprep.mubr.f32.mxu1 %v707_v11  ;;  %1697 = vmatprep.mubr.f32.mxu0 %v707_v11  ;;  %v1218_v11 = vld [vmem:[%s5806_s29 + $0x830] sm:$0xff]  ;;  %v1219_v20 = vld [vmem:[%s5806_s29 + $0x838] sm:$0xff] }
 0x22d   : > { %4752 = vmatpush1.bf16.msra.mxu1 %v4751_v12  ;;  %4598 = vmatpush1.bf16.msra.mxu0 %v4597_v13  ;;  %v730_v12 = vld [vmem:[%s5798_s26 + $0x1f0] sm:$0xff]  ;;  %v737_v13 = vld [vmem:[%s5798_s26 + $0x228] sm:$0xff]  ;;  %v4619_v19 = vpack.c.bf16 %v1218_v11, %v1215_v10  ;;  %v1240_v10 = vld [vmem:[%s5806_s29 + $0x8e0] sm:$0xff] }
 0x22e   : > { %v6509_v28 = vpop.f32.mrb[2].mxu1  ;;  %4753 = vmatprep.subr.bf16.mxu1 %v5426_v4  ;;  %4600 = vmatprep.subr.bf16.mxu0 %v4599_v16  ;;  %v4617_v16 = vpack.c.bf16 %v1211_v8, %v1208_v7  ;;  %v761_v7 = vld [vmem:[%s5798_s26 + $0x2e8] sm:$0xff] }
 0x22f   : > { %v2376_v33 = vpop.f32.mrb[3].mxu1  ;;  %2703 = vmatmul.mubr.f32.gmra.mrb[108].mxu1 %v706_v23  ;;  %1698 = vmatmul.mubr.f32.gmra.mrb[12].mxu0 %v706_v23 }
 0x230   : > { %2707 = vmatprep.mubr.f32.mxu1 %v713_v24  ;;  %1703 = vmatprep.mubr.f32.mxu0 %v713_v24  ;;  %v1221_v24 = vld [vmem:[%s5806_s29 + $0x848] sm:$0xff] }
 0x231   : > { %4755 = vmatpush1.bf16.msra.mxu1 %v4754_v25  ;;  %4602 = vmatpush1.bf16.msra.mxu0 %v4601_v26  ;;  %v1224_v25 = vld [vmem:[%s5806_s29 + $0x860] sm:$0xff] }
 0x232   : > { %v6520_v41 = vpop.f32.mrb[4].mxu1  ;;  %4756 = vmatprep.subr.bf16.mxu1 %v5426_v4  ;;  %4604 = vmatprep.subr.bf16.mxu0 %v4603_v29  ;;  %v736_v26 = vld [vmem:[%s5798_s26 + $0x220] sm:$0xff]  ;;  %v4769_v29 = vpack.c.bf16 %v1219_v20, %v1216_v17  ;;  %v4623_v33 = vpack.c.bf16 %v1224_v25, %v1221_v24  ;;  %v767_v20 = vld [vmem:[%s5798_s26 + $0x318] sm:$0xff]  ;;  %v766_v25 = vld [vmem:[%s5798_s26 + $0x310] sm:$0xff] }
 0x233   : > { %v2381_v46 = vpop.f32.mrb[5].mxu1  ;;  %2708 = vmatmul.mubr.f32.gmra.mrb[110].mxu1 %v712_v36  ;;  %1704 = vmatmul.mubr.f32.gmra.mrb[14].mxu0 %v712_v36  ;;  %v1223_v36 = vld [vmem:[%s5806_s29 + $0x858] sm:$0xff] }
 0x234   : > { %2712 = vmatprep.mubr.f32.mxu1 %v719_v37  ;;  %1709 = vmatprep.mubr.f32.mxu0 %v719_v37  ;;  %v4625_v44 = vpack.c.bf16 %v1223_v36, %v1220_v35  ;;  %v785_v35 = vld [vmem:[%s5798_s26 + $0x3a8] sm:$0xff] }
 0x235   : > { %4758 = vmatpush1.bf16.msra.mxu1 %v4757_v38  ;;  %4606 = vmatpush1.bf16.msra.mxu0 %v4605_v39  ;;  %v1227_v38 = vld [vmem:[%s5806_s29 + $0x878] sm:$0xff]  ;;  %v1230_v39 = vld [vmem:[%s5806_s29 + $0x890] sm:$0xff] }
 0x236   : > { %v6531_v54 = vpop.f32.mrb[6].mxu1  ;;  %4759 = vmatprep.subr.bf16.mxu1 %v5426_v4  ;;  %4608 = vmatprep.subr.bf16.mxu0 %v4607_v42  ;;  %v749_v42 = vld [vmem:[%s5798_s26 + $0x288] sm:$0xff]  ;;  %v4627_v47 = vpack.c.bf16 %v1230_v39, %v1227_v38  ;;  %v784_v38 = vld [vmem:[%s5798_s26 + $0x3a0] sm:$0xff]  ;;  %v791_v39 = vld [vmem:[%s5798_s26 + $0x3d8] sm:$0xff] }
 0x237   : > { %v2386_v59 = vpop.f32.mrb[7].mxu1  ;;  %2713 = vmatmul.mubr.f32.gmra.mrb[112].mxu1 %v718_v49  ;;  %1710 = vmatmul.mubr.f32.gmra.mrb[16].mxu0 %v718_v49  ;;  %v1226_v49 = vld [vmem:[%s5806_s29 + $0x870] sm:$0xff] }
 0x238   : > { %2717 = vmatprep.mubr.f32.mxu1 %v725_v50  ;;  %1715 = vmatprep.mubr.f32.mxu0 %v725_v50  ;;  %v1229_v50 = vld [vmem:[%s5806_s29 + $0x888] sm:$0xff]  ;;  %v1234_v59 = vld [vmem:[%s5806_s29 + $0x8b0] sm:$0xff] }
 0x239   : > { %4761 = vmatpush1.bf16.msra.mxu1 %v4760_v51  ;;  %4610 = vmatpush1.bf16.msra.mxu0 %v4609_v52  ;;  %v1233_v52 = vld [vmem:[%s5806_s29 + $0x8a8] sm:$0xff]  ;;  %v4629_v58 = vpack.c.bf16 %v1229_v50, %v1226_v49  ;;  %v803_v49 = vld [vmem:[%s5798_s26 + $0x438] sm:$0xff] }
 0x23a   : > { %v6542_v3 = vpop.f32.mrb[8].mxu1  ;;  %4762 = vmatprep.subr.bf16.mxu1 %v5426_v4  ;;  %4612 = vmatprep.subr.bf16.mxu0 %v4611_v55  ;;  %v748_v55 = vld [vmem:[%s5798_s26 + $0x280] sm:$0xff]  ;;  %v4631_v61 = vpack.c.bf16 %v1236_v53, %v1233_v52  ;;  %v802_v52 = vld [vmem:[%s5798_s26 + $0x430] sm:$0xff]  ;;  %v809_v53 = vld [vmem:[%s5798_s26 + $0x468] sm:$0xff] }
 0x23b   : > { %v2391_v9 = vpop.f32.mrb[9].mxu1  ;;  %2718 = vmatmul.mubr.f32.gmra.mrb[114].mxu1 %v724_v62  ;;  %1716 = vmatmul.mubr.f32.gmra.mrb[18].mxu0 %v724_v62  ;;  %v1237_v62 = vld [vmem:[%s5806_s29 + $0x8c8] sm:$0xff] }
 0x23c   : > { %2722 = vmatprep.mubr.f32.mxu1 %v731_v63  ;;  %1721 = vmatprep.mubr.f32.mxu0 %v731_v63  ;;  %v1232_v63 = vld [vmem:[%s5806_s29 + $0x8a0] sm:$0xff]  ;;  %v4778_v8 = vpack.c.bf16 %v1237_v62, %v1234_v59  ;;  %v814_v62 = vld [vmem:[%s5798_s26 + $0x490] sm:$0xff] }
 0x23d   : > { %4764 = vmatpush1.bf16.msra.mxu1 %v4763_v0  ;;  %4614 = vmatpush1.bf16.msra.mxu0 %v4613_v1  ;;  %v1235_v0 = vld [vmem:[%s5806_s29 + $0x8b8] sm:$0xff] }
 0x23e   : > { %v6553_v18 = vpop.f32.mrb[10].mxu1  ;;  %4765 = vmatprep.subr.bf16.mxu1 %v5426_v4  ;;  %4616 = vmatprep.subr.bf16.mxu0 %v4615_v5  ;;  %v1242_v5 = vld [vmem:[%s5806_s29 + $0x8f0] sm:$0xff]  ;;  %v4633_v9 = vpack.c.bf16 %v1235_v0, %v1232_v63  ;;  %v821_v63 = vld [vmem:[%s5798_s26 + $0x4c8] sm:$0xff] }
 0x23f   : > { %v2396_v23 = vpop.f32.mrb[11].mxu1  ;;  %2723 = vmatmul.mubr.f32.gmra.mrb[116].mxu1 %v730_v12  ;;  %1722 = vmatmul.mubr.f32.gmra.mrb[20].mxu0 %v730_v12  ;;  %v4635_v12 = vpack.c.bf16 %v1242_v5, %v1239_v2  ;;  %v820_v2 = vld [vmem:[%s5798_s26 + $0x4c0] sm:$0xff]  ;;  %v827_v5 = vld [vmem:[%s5798_s26 + $0x4f8] sm:$0xff] }
 0x240   : > { %2727 = vmatprep.mubr.f32.mxu1 %v737_v13  ;;  %1727 = vmatprep.mubr.f32.mxu0 %v737_v13  ;;  %v1243_v13 = vld [vmem:[%s5806_s29 + $0x8f8] sm:$0xff] }
 0x241   : > { %4767 = vmatpush1.bf16.msra.mxu1 %v4766_v14  ;;  %4618 = vmatpush1.bf16.msra.mxu0 %v4617_v16  ;;  %v1238_v14 = vld [vmem:[%s5806_s29 + $0x8d0] sm:$0xff]  ;;  %v1241_v16 = vld [vmem:[%s5806_s29 + $0x8e8] sm:$0xff]  ;;  %v4781_v21 = vpack.c.bf16 %v1243_v13, %v1240_v10  ;;  %v832_v13 = vld [vmem:[%s5798_s26 + $0x520] sm:$0xff] }
 0x242   : > { %v6564_v32 = vpop.f32.mrb[12].mxu1  ;;  %4768 = vmatprep.subr.bf16.mxu1 %v5426_v4  ;;  %4620 = vmatprep.subr.bf16.mxu0 %v4619_v19  ;;  %v760_v19 = vld [vmem:[%s5798_s26 + $0x2e0] sm:$0xff]  ;;  %v4637_v22 = vpack.c.bf16 %v1241_v16, %v1238_v14  ;;  %v839_v14 = vld [vmem:[%s5798_s26 + $0x558] sm:$0xff] }
 0x243   : > { %v2401_v37 = vpop.f32.mrb[13].mxu1  ;;  %2728 = vmatmul.mubr.f32.gmra.mrb[118].mxu1 %v736_v26  ;;  %1728 = vmatmul.mubr.f32.gmra.mrb[22].mxu0 %v736_v26  ;;  %v773_v26 = vld [vmem:[%s5798_s26 + $0x348] sm:$0xff] }
 0x244   : > { %2732 = vmatprep.mubr.f32.mxu1 %v743_v27  ;;  %1733 = vmatprep.mubr.f32.mxu0 %v743_v27 }
 0x245   : > { %4770 = vmatpush1.bf16.msra.mxu1 %v4769_v29  ;;  %4622 = vmatpush1.bf16.msra.mxu0 %v4621_v30  ;;  %v779_v30 = vld [vmem:[%s5798_s26 + $0x378] sm:$0xff] }
 0x246   : > { %v6575_v46 = vpop.f32.mrb[14].mxu1  ;;  %4771 = vmatprep.subr.bf16.mxu1 %v5426_v4  ;;  %4624 = vmatprep.subr.bf16.mxu0 %v4623_v33 }
 0x247   : > { %v2406_v51 = vpop.f32.mrb[15].mxu1  ;;  %2733 = vmatmul.mubr.f32.gmra.mrb[120].mxu1 %v742_v40  ;;  %1734 = vmatmul.mubr.f32.gmra.mrb[24].mxu0 %v742_v40 }
 0x248   : > { %2737 = vmatprep.mubr.f32.mxu1 %v749_v42  ;;  %1739 = vmatprep.mubr.f32.mxu0 %v749_v42 }
 0x249   : > { %4773 = vmatpush1.bf16.msra.mxu1 %v4772_v43  ;;  %4626 = vmatpush1.bf16.msra.mxu0 %v4625_v44  ;;  %v790_v43 = vld [vmem:[%s5798_s26 + $0x3d0] sm:$0xff]  ;;  %v797_v44 = vld [vmem:[%s5798_s26 + $0x408] sm:$0xff] }
 0x24a   : > { %v6586_v60 = vpop.f32.mrb[16].mxu1  ;;  %4774 = vmatprep.subr.bf16.mxu1 %v5426_v4  ;;  %4628 = vmatprep.subr.bf16.mxu0 %v4627_v47 }
 0x24b   : > { %v2411_v1 = vpop.f32.mrb[17].mxu1  ;;  %2738 = vmatmul.mubr.f32.gmra.mrb[122].mxu1 %v748_v55  ;;  %1740 = vmatmul.mubr.f32.gmra.mrb[26].mxu0 %v748_v55 }
 0x24c   : > { %2742 = vmatprep.mubr.f32.mxu1 %v755_v56  ;;  %1745 = vmatprep.mubr.f32.mxu0 %v755_v56 }
 0x24d   : > { %4776 = vmatpush1.bf16.msra.mxu1 %v4775_v57  ;;  %4630 = vmatpush1.bf16.msra.mxu0 %v4629_v58  ;;  %v808_v57 = vld [vmem:[%s5798_s26 + $0x460] sm:$0xff]  ;;  %v815_v58 = vld [vmem:[%s5798_s26 + $0x498] sm:$0xff] }
 0x24e   : > { %v6597_v11 = vpop.f32.mrb[18].mxu1  ;;  %4777 = vmatprep.subr.bf16.mxu1 %v5426_v4  ;;  %4632 = vmatprep.subr.bf16.mxu0 %v4631_v61 }
 0x24f   : > { %v2416_v17 = vpop.f32.mrb[19].mxu1  ;;  %2743 = vmatmul.mubr.f32.gmra.mrb[124].mxu1 %v754_v6  ;;  %1746 = vmatmul.mubr.f32.gmra.mrb[28].mxu0 %v754_v6 }
 0x250   : > { %2747 = vmatprep.mubr.f32.mxu1 %v761_v7  ;;  %1751 = vmatprep.mubr.f32.mxu0 %v761_v7 }
 0x251   : > { %4779 = vmatpush1.bf16.msra.mxu1 %v4778_v8  ;;  %4634 = vmatpush1.bf16.msra.mxu0 %v4633_v9  ;;  %v826_v8 = vld [vmem:[%s5798_s26 + $0x4f0] sm:$0xff]  ;;  %v833_v9 = vld [vmem:[%s5798_s26 + $0x528] sm:$0xff] }
 0x252   : > { %v6605_v23 = vpop.f32.mrb[20].mxu1  ;;  %4780 = vmatprep.subr.bf16.mxu1 %v5426_v4  ;;  %4636 = vmatprep.subr.bf16.mxu0 %v4635_v12  ;;  %v772_v4 = vld [vmem:[%s5798_s26 + $0x340] sm:$0xff] }
 0x253   : > { %v2421_v24 = vpop.f32.mrb[21].mxu1  ;;  %2748 = vmatmul.mubr.f32.gmra.mrb[126].mxu1 %v760_v19  ;;  %1752 = vmatmul.mubr.f32.gmra.mrb[30].mxu0 %v760_v19  ;;  %v838_v19 = vld [vmem:[%s5798_s26 + $0x550] sm:$0xff] }
 0x254   : > { %2752 = vmatprep.mubr.f32.mxu1 %v767_v20  ;;  %1757 = vmatprep.mubr.f32.mxu0 %v767_v20  ;;  %v845_v20 = vld [vmem:[%s5798_s26 + $0x588] sm:$0xff]  ;;  %v844_v24 = vld [vmem:[%s5798_s26 + $0x580] sm:$0xff] }
 0x255   : > { %4782 = vmatpush1.bf16.msra.mxu1 %v4781_v21  ;;  %4638 = vmatpush1.bf16.msra.mxu0 %v4637_v22 }
 0x256   : > { %v6610_v27 = vpop.f32.mrb[22].mxu1 }
 0x257   : > { %v2426_v29 = vpop.f32.mrb[23].mxu1  ;;  %2753 = vmatmul.mubr.f32.gmra.mrb[128].mxu1 %v766_v25  ;;  %1758 = vmatmul.mubr.f32.gmra.mrb[32].mxu0 %v766_v25  ;;  %v851_v25 = vld [vmem:[%s5798_s26 + $0x5b8] sm:$0xff] }
 0x258   : > { %2757 = vmatprep.mubr.f32.mxu1 %v773_v26  ;;  %1763 = vmatprep.mubr.f32.mxu0 %v773_v26 }
 0x25a   : > { %v6614_v31 = vpop.f32.mrb[24].mxu1 }
 0x25b   : > { %v2431_v33 = vpop.f32.mrb[25].mxu1  ;;  %2758 = vmatmul.mubr.f32.gmra.mrb[130].mxu1 %v772_v4  ;;  %1764 = vmatmul.mubr.f32.gmra.mrb[34].mxu0 %v772_v4  ;;  %v850_v4 = vld [vmem:[%s5798_s26 + $0x5b0] sm:$0xff] }
 0x25c   : > { %2762 = vmatprep.mubr.f32.mxu1 %v779_v30  ;;  %1769 = vmatprep.mubr.f32.mxu0 %v779_v30  ;;  %v857_v30 = vld [vmem:[%s5798_s26 + $0x5e8] sm:$0xff] }
 0x25e   : > { %v6618_v36 = vpop.f32.mrb[26].mxu1 }
 0x25f   : > { %v2436_v37 = vpop.f32.mrb[27].mxu1  ;;  %2763 = vmatmul.mubr.f32.gmra.mrb[132].mxu1 %v778_v34  ;;  %1770 = vmatmul.mubr.f32.gmra.mrb[36].mxu0 %v778_v34 }
 0x260   : > { %2767 = vmatprep.mubr.f32.mxu1 %v785_v35  ;;  %1775 = vmatprep.mubr.f32.mxu0 %v785_v35  ;;  %v856_v35 = vld [vmem:[%s5798_s26 + $0x5e0] sm:$0xff]  ;;  %v863_v37 = vld [vmem:[%s5798_s26 + $0x618] sm:$0xff] }
 0x262   : > { %v6622_v40 = vpop.f32.mrb[28].mxu1 }
 0x263   : > { %v2441_v42 = vpop.f32.mrb[29].mxu1  ;;  %2768 = vmatmul.mubr.f32.gmra.mrb[134].mxu1 %v784_v38  ;;  %1776 = vmatmul.mubr.f32.gmra.mrb[38].mxu0 %v784_v38 }
 0x264   : > { %2772 = vmatprep.mubr.f32.mxu1 %v791_v39  ;;  %1781 = vmatprep.mubr.f32.mxu0 %v791_v39  ;;  %v862_v42 = vld [vmem:[%s5798_s26 + $0x610] sm:$0xff] }
 0x266   : > { %v6626_v45 = vpop.f32.mrb[30].mxu1 }
 0x267   : > { %v2446_v47 = vpop.f32.mrb[31].mxu1  ;;  %2773 = vmatmul.mubr.f32.gmra.mrb[136].mxu1 %v790_v43  ;;  %1782 = vmatmul.mubr.f32.gmra.mrb[40].mxu0 %v790_v43  ;;  %v869_v43 = vld [vmem:[%s5798_s26 + $0x648] sm:$0xff] }
 0x268   : > { %2777 = vmatprep.mubr.f32.mxu1 %v797_v44  ;;  %1787 = vmatprep.mubr.f32.mxu0 %v797_v44 }
 0x26a   : > { %v6630_v50 = vpop.f32.mrb[32].mxu1 }
 0x26b   : > { %v2451_v51 = vpop.f32.mrb[33].mxu1  ;;  %2778 = vmatmul.mubr.f32.gmra.mrb[138].mxu1 %v796_v48  ;;  %1788 = vmatmul.mubr.f32.gmra.mrb[42].mxu0 %v796_v48  ;;  %v868_v48 = vld [vmem:[%s5798_s26 + $0x640] sm:$0xff] }
 0x26c   : > { %2782 = vmatprep.mubr.f32.mxu1 %v803_v49  ;;  %1793 = vmatprep.mubr.f32.mxu0 %v803_v49  ;;  %v875_v49 = vld [vmem:[%s5798_s26 + $0x678] sm:$0xff] }
 0x26e   : > { %v6634_v55 = vpop.f32.mrb[34].mxu1 }
 0x26f   : > { %v2456_v56 = vpop.f32.mrb[35].mxu1  ;;  %2783 = vmatmul.mubr.f32.gmra.mrb[140].mxu1 %v802_v52  ;;  %1794 = vmatmul.mubr.f32.gmra.mrb[44].mxu0 %v802_v52 }
 0x270   : > { %2787 = vmatprep.mubr.f32.mxu1 %v809_v53  ;;  %1799 = vmatprep.mubr.f32.mxu0 %v809_v53  ;;  %v874_v53 = vld [vmem:[%s5798_s26 + $0x670] sm:$0xff]  ;;  %v881_v56 = vld [vmem:[%s5798_s26 + $0x6a8] sm:$0xff] }
 0x272   : > { %v6638_v59 = vpop.f32.mrb[36].mxu1 }
 0x273   : > { %v2461_v61 = vpop.f32.mrb[37].mxu1  ;;  %2788 = vmatmul.mubr.f32.gmra.mrb[142].mxu1 %v808_v57  ;;  %1800 = vmatmul.mubr.f32.gmra.mrb[46].mxu0 %v808_v57 }
 0x274   : > { %2792 = vmatprep.mubr.f32.mxu1 %v815_v58  ;;  %1805 = vmatprep.mubr.f32.mxu0 %v815_v58  ;;  %v880_v61 = vld [vmem:[%s5798_s26 + $0x6a0] sm:$0xff] }
 0x276   : > { %v6642_v0 = vpop.f32.mrb[38].mxu1 }
 0x277   : > { %v2466_v1 = vpop.f32.mrb[39].mxu1  ;;  %2793 = vmatmul.mubr.f32.gmra.mrb[144].mxu1 %v814_v62  ;;  %1806 = vmatmul.mubr.f32.gmra.mrb[48].mxu0 %v814_v62  ;;  %v887_v62 = vld [vmem:[%s5798_s26 + $0x6d8] sm:$0xff] }
 0x278   : > { %2797 = vmatprep.mubr.f32.mxu1 %v821_v63  ;;  %1811 = vmatprep.mubr.f32.mxu0 %v821_v63 }
 0x27a   : > { %v6646_v6 = vpop.f32.mrb[40].mxu1 }
 0x27b   : > { %v2471_v7 = vpop.f32.mrb[41].mxu1  ;;  %2798 = vmatmul.mubr.f32.gmra.mrb[146].mxu1 %v820_v2  ;;  %1812 = vmatmul.mubr.f32.gmra.mrb[50].mxu0 %v820_v2  ;;  %v886_v2 = vld [vmem:[%s5798_s26 + $0x6d0] sm:$0xff] }
 0x27c   : > { %2802 = vmatprep.mubr.f32.mxu1 %v827_v5  ;;  %1817 = vmatprep.mubr.f32.mxu0 %v827_v5  ;;  %v893_v5 = vld [vmem:[%s5798_s26 + $0x708] sm:$0xff] }
 0x27e   : > { %v6650_v10 = vpop.f32.mrb[42].mxu1 }
 0x27f   : > { %v2476_v12 = vpop.f32.mrb[43].mxu1  ;;  %2803 = vmatmul.mubr.f32.gmra.mrb[148].mxu1 %v826_v8  ;;  %1818 = vmatmul.mubr.f32.gmra.mrb[52].mxu0 %v826_v8 }
 0x280   : > { %2807 = vmatprep.mubr.f32.mxu1 %v833_v9  ;;  %1823 = vmatprep.mubr.f32.mxu0 %v833_v9  ;;  %v892_v9 = vld [vmem:[%s5798_s26 + $0x700] sm:$0xff]  ;;  %v899_v12 = vld [vmem:[%s5798_s26 + $0x738] sm:$0xff] }
 0x282   : > { %v6654_v16 = vpop.f32.mrb[44].mxu1 }
 0x283   : > { %v2481_v17 = vpop.f32.mrb[45].mxu1  ;;  %2808 = vmatmul.mubr.f32.gmra.mrb[150].mxu1 %v832_v13  ;;  %1824 = vmatmul.mubr.f32.gmra.mrb[54].mxu0 %v832_v13 }
 0x284   : > { %2812 = vmatprep.mubr.f32.mxu1 %v839_v14  ;;  %1829 = vmatprep.mubr.f32.mxu0 %v839_v14  ;;  %v898_v17 = vld [vmem:[%s5798_s26 + $0x730] sm:$0xff] }
 0x286   : > { %v6658_v21 = vpop.f32.mrb[46].mxu1 }
 0x287   : > { %v2486_v22 = vpop.f32.mrb[47].mxu1  ;;  %2813 = vmatmul.mubr.f32.gmra.mrb[152].mxu1 %v838_v19  ;;  %1830 = vmatmul.mubr.f32.gmra.mrb[56].mxu0 %v838_v19  ;;  %v905_v19 = vld [vmem:[%s5798_s26 + $0x768] sm:$0xff] }
 0x288   : > { %2817 = vmatprep.mubr.f32.mxu1 %v845_v20  ;;  %1835 = vmatprep.mubr.f32.mxu0 %v845_v20 }
 0x28a   : > { %v6662_v26 = vpop.f32.mrb[48].mxu1 }
 0x28b   : > { %v2491_v29 = vpop.f32.mrb[49].mxu1  ;;  %2818 = vmatmul.mubr.f32.gmra.mrb[154].mxu1 %v844_v24  ;;  %1836 = vmatmul.mubr.f32.gmra.mrb[58].mxu0 %v844_v24  ;;  %v904_v24 = vld [vmem:[%s5798_s26 + $0x760] sm:$0xff] }
 0x28c   : > { %2822 = vmatprep.mubr.f32.mxu1 %v851_v25  ;;  %1841 = vmatprep.mubr.f32.mxu0 %v851_v25  ;;  %v911_v25 = vld [vmem:[%s5798_s26 + $0x798] sm:$0xff] }
 0x28e   : > { %v6666_v33 = vpop.f32.mrb[50].mxu1 }
 0x28f   : > { %v2496_v34 = vpop.f32.mrb[51].mxu1  ;;  %2823 = vmatmul.mubr.f32.gmra.mrb[156].mxu1 %v850_v4  ;;  %1842 = vmatmul.mubr.f32.gmra.mrb[60].mxu0 %v850_v4 }
 0x290   : > { %2827 = vmatprep.mubr.f32.mxu1 %v857_v30  ;;  %1847 = vmatprep.mubr.f32.mxu0 %v857_v30  ;;  %v910_v30 = vld [vmem:[%s5798_s26 + $0x790] sm:$0xff]  ;;  %v917_v34 = vld [vmem:[%s5798_s26 + $0x7c8] sm:$0xff] }
 0x292   : > { %v6670_v38 = vpop.f32.mrb[52].mxu1 }
 0x293   : > { %v2501_v39 = vpop.f32.mrb[53].mxu1  ;;  %2828 = vmatmul.mubr.f32.gmra.mrb[158].mxu1 %v856_v35  ;;  %1848 = vmatmul.mubr.f32.gmra.mrb[62].mxu0 %v856_v35 }
 0x294   : > { %2832 = vmatprep.mubr.f32.mxu1 %v863_v37  ;;  %1853 = vmatprep.mubr.f32.mxu0 %v863_v37  ;;  %v916_v39 = vld [vmem:[%s5798_s26 + $0x7c0] sm:$0xff] }
 0x296   : > { %v6674_v44 = vpop.f32.mrb[54].mxu1 }
 0x297   : > { %v2506_v47 = vpop.f32.mrb[55].mxu1  ;;  %2833 = vmatmul.mubr.f32.gmra.mrb[160].mxu1 %v862_v42  ;;  %1854 = vmatmul.mubr.f32.gmra.mrb[64].mxu0 %v862_v42  ;;  %v923_v42 = vld [vmem:[%s5798_s26 + $0x7f8] sm:$0xff] }
 0x298   : > { %2837 = vmatprep.mubr.f32.mxu1 %v869_v43  ;;  %1859 = vmatprep.mubr.f32.mxu0 %v869_v43 }
 0x29a   : > { %v6678_v51 = vpop.f32.mrb[56].mxu1 }
 0x29b   : > { %v2511_v52 = vpop.f32.mrb[57].mxu1  ;;  %2838 = vmatmul.mubr.f32.gmra.mrb[162].mxu1 %v868_v48  ;;  %1860 = vmatmul.mubr.f32.gmra.mrb[66].mxu0 %v868_v48  ;;  %v922_v48 = vld [vmem:[%s5798_s26 + $0x7f0] sm:$0xff] }
 0x29c   : > { %2842 = vmatprep.mubr.f32.mxu1 %v875_v49  ;;  %1865 = vmatprep.mubr.f32.mxu0 %v875_v49  ;;  %v929_v49 = vld [vmem:[%s5798_s26 + $0x828] sm:$0xff] }
 0x29e   : > { %v6682_v57 = vpop.f32.mrb[58].mxu1 }
 0x29f   : > { %v2516_v58 = vpop.f32.mrb[59].mxu1  ;;  %2843 = vmatmul.mubr.f32.gmra.mrb[164].mxu1 %v874_v53  ;;  %1866 = vmatmul.mubr.f32.gmra.mrb[68].mxu0 %v874_v53 }
 0x2a0   : > { %2847 = vmatprep.mubr.f32.mxu1 %v881_v56  ;;  %1871 = vmatprep.mubr.f32.mxu0 %v881_v56  ;;  %v928_v56 = vld [vmem:[%s5798_s26 + $0x820] sm:$0xff]  ;;  %v935_v58 = vld [vmem:[%s5798_s26 + $0x858] sm:$0xff] }
 0x2a2   : > { %v6686_v63 = vpop.f32.mrb[60].mxu1 }
 0x2a3   : > { %v2521_v1 = vpop.f32.mrb[61].mxu1  ;;  %2848 = vmatmul.mubr.f32.gmra.mrb[166].mxu1 %v880_v61  ;;  %1872 = vmatmul.mubr.f32.gmra.mrb[70].mxu0 %v880_v61 }
 0x2a4   : > { %2852 = vmatprep.mubr.f32.mxu1 %v887_v62  ;;  %1877 = vmatprep.mubr.f32.mxu0 %v887_v62  ;;  %v934_v1 = vld [vmem:[%s5798_s26 + $0x850] sm:$0xff] }
 0x2a6   : > { %v6690_v7 = vpop.f32.mrb[62].mxu1 }
 0x2a7   : > { %v2526_v8 = vpop.f32.mrb[63].mxu1  ;;  %2853 = vmatmul.mubr.f32.gmra.mrb[168].mxu1 %v886_v2  ;;  %1878 = vmatmul.mubr.f32.gmra.mrb[72].mxu0 %v886_v2  ;;  %v941_v2 = vld [vmem:[%s5798_s26 + $0x888] sm:$0xff] }
 0x2a8   : > { %2857 = vmatprep.mubr.f32.mxu1 %v893_v5  ;;  %1883 = vmatprep.mubr.f32.mxu0 %v893_v5 }
 0x2aa   : > { %v6694_v13 = vpop.f32.mrb[64].mxu1 }
 0x2ab   : > { %v2531_v14 = vpop.f32.mrb[65].mxu1  ;;  %2858 = vmatmul.mubr.f32.gmra.mrb[170].mxu1 %v892_v9  ;;  %1884 = vmatmul.mubr.f32.gmra.mrb[74].mxu0 %v892_v9  ;;  %v940_v9 = vld [vmem:[%s5798_s26 + $0x880] sm:$0xff] }
 0x2ac   : > { %2862 = vmatprep.mubr.f32.mxu1 %v899_v12  ;;  %1889 = vmatprep.mubr.f32.mxu0 %v899_v12  ;;  %v947_v12 = vld [vmem:[%s5798_s26 + $0x8b8] sm:$0xff] }
 0x2ae   : > { %v6698_v20 = vpop.f32.mrb[66].mxu1 }
 0x2af   : > { %v2536_v22 = vpop.f32.mrb[67].mxu1  ;;  %2863 = vmatmul.mubr.f32.gmra.mrb[172].mxu1 %v898_v17  ;;  %1890 = vmatmul.mubr.f32.gmra.mrb[76].mxu0 %v898_v17 }
 0x2b0   : > { %2867 = vmatprep.mubr.f32.mxu1 %v905_v19  ;;  %1895 = vmatprep.mubr.f32.mxu0 %v905_v19  ;;  %v946_v19 = vld [vmem:[%s5798_s26 + $0x8b0] sm:$0xff]  ;;  %v953_v22 = vld [vmem:[%s5798_s26 + $0x8e8] sm:$0xff] }
 0x2b2   : > { %v6702_v29 = vpop.f32.mrb[68].mxu1 }
 0x2b3   : > { %v2541_v4 = vpop.f32.mrb[69].mxu1  ;;  %2868 = vmatmul.mubr.f32.gmra.mrb[174].mxu1 %v904_v24  ;;  %1896 = vmatmul.mubr.f32.gmra.mrb[78].mxu0 %v904_v24 }
 0x2b4   : > { %2872 = vmatprep.mubr.f32.mxu1 %v911_v25  ;;  %1901 = vmatprep.mubr.f32.mxu0 %v911_v25  ;;  %v952_v4 = vld [vmem:[%s5798_s26 + $0x8e0] sm:$0xff] }
 0x2b6   : > { %v6706_v35 = vpop.f32.mrb[70].mxu1 }
 0x2b7   : > { %v2546_v37 = vpop.f32.mrb[71].mxu1  ;;  %2873 = vmatmul.mubr.f32.gmra.mrb[176].mxu1 %v910_v30  ;;  %1902 = vmatmul.mubr.f32.gmra.mrb[80].mxu0 %v910_v30  ;;  %v673_v30 = vld [vmem:[%s5798_s26 + $0x28] sm:$0xff] }
 0x2b8   : > { %2877 = vmatprep.mubr.f32.mxu1 %v917_v34  ;;  %1907 = vmatprep.mubr.f32.mxu0 %v917_v34 }
 0x2ba   : > { %v6710_v43 = vpop.f32.mrb[72].mxu1 }
 0x2bb   : > { %v2551_v47 = vpop.f32.mrb[73].mxu1  ;;  %2878 = vmatmul.mubr.f32.gmra.mrb[178].mxu1 %v916_v39  ;;  %1908 = vmatmul.mubr.f32.gmra.mrb[82].mxu0 %v916_v39  ;;  %v672_v39 = vld [vmem:[%s5798_s26 + $0x20] sm:$0xff] }
 0x2bc   : > { %2882 = vmatprep.mubr.f32.mxu1 %v923_v42  ;;  %1913 = vmatprep.mubr.f32.mxu0 %v923_v42  ;;  %v679_v42 = vld [vmem:[%s5798_s26 + $0x58] sm:$0xff] }
 0x2be   : > { %v6714_v52 = vpop.f32.mrb[74].mxu1 }
 0x2bf   : > { %v2556_v53 = vpop.f32.mrb[75].mxu1  ;;  %2883 = vmatmul.mubr.f32.gmra.mrb[180].mxu1 %v922_v48  ;;  %1914 = vmatmul.mubr.f32.gmra.mrb[84].mxu0 %v922_v48 }
 0x2c0   : > { %2887 = vmatprep.mubr.f32.mxu1 %v929_v49  ;;  %1919 = vmatprep.mubr.f32.mxu0 %v929_v49  ;;  %v678_v49 = vld [vmem:[%s5798_s26 + $0x50] sm:$0xff]  ;;  %v685_v53 = vld [vmem:[%s5798_s26 + $0x88] sm:$0xff] }
 0x2c2   : > { %v6718_v61 = vpop.f32.mrb[76].mxu1 }
 0x2c3   : > { %v2561_v62 = vpop.f32.mrb[77].mxu1  ;;  %2888 = vmatmul.mubr.f32.gmra.mrb[182].mxu1 %v928_v56  ;;  %1920 = vmatmul.mubr.f32.gmra.mrb[86].mxu0 %v928_v56 }
 0x2c4   : > { %2892 = vmatprep.mubr.f32.mxu1 %v935_v58  ;;  %1925 = vmatprep.mubr.f32.mxu0 %v935_v58  ;;  %v684_v62 = vld [vmem:[%s5798_s26 + $0x80] sm:$0xff] }
 0x2c6   : > { %v6722_v5 = vpop.f32.mrb[78].mxu1 }
 0x2c7   : > { %v2566_v8 = vpop.f32.mrb[79].mxu1  ;;  %2893 = vmatmul.mubr.f32.gmra.mrb[184].mxu1 %v934_v1  ;;  %1926 = vmatmul.mubr.f32.gmra.mrb[88].mxu0 %v934_v1  ;;  %v691_v1 = vld [vmem:[%s5798_s26 + $0xb8] sm:$0xff] }
 0x2c8   : > { %2897 = vmatprep.mubr.f32.mxu1 %v941_v2  ;;  %1931 = vmatprep.mubr.f32.mxu0 %v941_v2 }
 0x2ca   : > { %v6726_v14 = vpop.f32.mrb[80].mxu1 }
 0x2cb   : > { %v2571_v17 = vpop.f32.mrb[81].mxu1  ;;  %2898 = vmatmul.mubr.f32.gmra.mrb[186].mxu1 %v940_v9  ;;  %1932 = vmatmul.mubr.f32.gmra.mrb[90].mxu0 %v940_v9  ;;  %v690_v9 = vld [vmem:[%s5798_s26 + $0xb0] sm:$0xff] }
 0x2cc   : > { %2902 = vmatprep.mubr.f32.mxu1 %v947_v12  ;;  %1937 = vmatprep.mubr.f32.mxu0 %v947_v12  ;;  %v697_v12 = vld [vmem:[%s5798_s26 + $0xe8] sm:$0xff] }
 0x2ce   : > { %v6730_v24 = vpop.f32.mrb[82].mxu1 }
 0x2cf   : > { %v2576_v25 = vpop.f32.mrb[83].mxu1  ;;  %2903 = vmatmul.mubr.f32.gmra.mrb[188].mxu1 %v946_v19  ;;  %1938 = vmatmul.mubr.f32.gmra.mrb[92].mxu0 %v946_v19 }
 0x2d0   : > { %2907 = vmatprep.mubr.f32.mxu1 %v953_v22  ;;  %1943 = vmatprep.mubr.f32.mxu0 %v953_v22  ;;  %v696_v22 = vld [vmem:[%s5798_s26 + $0xe0] sm:$0xff]  ;;  %v703_v25 = vld [vmem:[%s5798_s26 + $0x118] sm:$0xff] }
 0x2d2   : > { %v6734_v34 = vpop.f32.mrb[84].mxu1 }
 0x2d3   : > { %v2581_v37 = vpop.f32.mrb[85].mxu1  ;;  %2908 = vmatmul.mubr.f32.gmra.mrb[190].mxu1 %v952_v4  ;;  %1944 = vmatmul.mubr.f32.gmra.mrb[94].mxu0 %v952_v4 }
 0x2d4   : > { %2977 = vmatprep.mubr.f32.mxu1 %v673_v30  ;;  %2014 = vmatprep.mubr.f32.mxu0 %v673_v30  ;;  %v702_v37 = vld [vmem:[%s5798_s26 + $0x110] sm:$0xff] }
 0x2d6   : > { %v6738_v47 = vpop.f32.mrb[86].mxu1 }
 0x2d7   : > { %v2586_v48 = vpop.f32.mrb[87].mxu1  ;;  %2978 = vmatmul.mubr.f32.vlgmr.msra.gmra.mrb[192].mxu1 %v672_v39  ;;  %2015 = vmatmul.mubr.f32.vlgmr.msra.gmra.mrb[0].mxu0 %v672_v39  ;;  %v709_v39 = vld [vmem:[%s5798_s26 + $0x148] sm:$0xff] }
 0x2d8   : > { %2982 = vmatprep.mubr.f32.mxu1 %v679_v42  ;;  %2020 = vmatprep.mubr.f32.mxu0 %v679_v42 }
 0x2da   : > { %v6742_v56 = vpop.f32.mrb[88].mxu1 }
 0x2db   : > { %v2591_v58 = vpop.f32.mrb[89].mxu1  ;;  %2983 = vmatmul.mubr.f32.gmra.mrb[194].mxu1 %v678_v49  ;;  %2021 = vmatmul.mubr.f32.gmra.mrb[2].mxu0 %v678_v49 }
 0x2dc   : > { %2987 = vmatprep.mubr.f32.mxu1 %v685_v53  ;;  %2026 = vmatprep.mubr.f32.mxu0 %v685_v53  ;;  %v708_v53 = vld [vmem:[%s5798_s26 + $0x140] sm:$0xff]  ;;  %v715_v58 = vld [vmem:[%s5798_s26 + $0x178] sm:$0xff] }
 0x2de   : > { %v6746_v2 = vpop.f32.mrb[90].mxu1 }
 0x2df   : > { %v2596_v8 = vpop.f32.mrb[91].mxu1  ;;  %2988 = vmatmul.mubr.f32.gmra.mrb[196].mxu1 %v684_v62  ;;  %2027 = vmatmul.mubr.f32.gmra.mrb[4].mxu0 %v684_v62 }
 0x2e0   : > { %2992 = vmatprep.mubr.f32.mxu1 %v691_v1  ;;  %2032 = vmatprep.mubr.f32.mxu0 %v691_v1 }
 0x2e2   : > { %v6750_v17 = vpop.f32.mrb[92].mxu1 }
 0x2e3   : > { %v2601_v19 = vpop.f32.mrb[93].mxu1  ;;  %2993 = vmatmul.mubr.f32.gmra.mrb[198].mxu1 %v690_v9  ;;  %2033 = vmatmul.mubr.f32.gmra.mrb[6].mxu0 %v690_v9  ;;  %v721_v9 = vld [vmem:[%s5798_s26 + $0x1a8] sm:$0xff] }
 0x2e4   : > { %2997 = vmatprep.mubr.f32.mxu1 %v697_v12  ;;  %2038 = vmatprep.mubr.f32.mxu0 %v697_v12 }
 0x2e6   : > { %v6754_v4 = vpop.f32.mrb[94].mxu1 }
 0x2e7   : > { %v2606_v30 = vpop.f32.mrb[95].mxu1  ;;  %2998 = vmatmul.mubr.f32.gmra.mrb[200].mxu1 %v696_v22  ;;  %2039 = vmatmul.mubr.f32.gmra.mrb[8].mxu0 %v696_v22 }
 0x2e8   : > { %3002 = vmatprep.mubr.f32.mxu1 %v703_v25  ;;  %2044 = vmatprep.mubr.f32.mxu0 %v703_v25  ;;  %v727_v25 = vld [vmem:[%s5798_s26 + $0x1d8] sm:$0xff] }
 0x2ea   : > { %v2674_v42 = vpop.f32.mrb[96].mxu1 }
 0x2eb   : > { %v6759_v48 = vadd.f32 %v2674_v42, %v6498_v15  ;;  %v2676_v49 = vpop.f32.mrb[97].mxu1  ;;  %3003 = vmatmul.mubr.f32.gmra.mrb[202].mxu1 %v702_v37  ;;  %2045 = vmatmul.mubr.f32.gmra.mrb[10].mxu0 %v702_v37  ;;  %v714_v15 = vld [vmem:[%s5798_s26 + $0x170] sm:$0xff]  ;;  %v733_v42 = vld [vmem:[%s5798_s26 + $0x208] sm:$0xff] }
 0x2ec   : > { %3007 = vmatprep.mubr.f32.mxu1 %v709_v39  ;;  %2050 = vmatprep.mubr.f32.mxu0 %v709_v39 }
 0x2ee   : > { %v2679_v62 = vpop.f32.mrb[98].mxu1 }
 0x2ef   : > { %v6764_v1 = vadd.f32 %v2679_v62, %v6509_v28  ;;  %v2681_v8 = vpop.f32.mrb[99].mxu1  ;;  %3008 = vmatmul.mubr.f32.gmra.mrb[204].mxu1 %v708_v53  ;;  %2051 = vmatmul.mubr.f32.gmra.mrb[12].mxu0 %v708_v53  ;;  %v720_v28 = vld [vmem:[%s5798_s26 + $0x1a0] sm:$0xff]  ;;  %v739_v62 = vld [vmem:[%s5798_s26 + $0x238] sm:$0xff] }
 0x2f0   : > { %3012 = vmatprep.mubr.f32.mxu1 %v715_v58  ;;  %2056 = vmatprep.mubr.f32.mxu0 %v715_v58 }
 0x2f2   : > { %v2684_v12 = vpop.f32.mrb[100].mxu1 }
 0x2f3   : > { %v6769_v19 = vadd.f32 %v2684_v12, %v6520_v41  ;;  %v2686_v22 = vpop.f32.mrb[101].mxu1  ;;  %3013 = vmatmul.mubr.f32.gmra.mrb[206].mxu1 %v714_v15  ;;  %2057 = vmatmul.mubr.f32.gmra.mrb[14].mxu0 %v714_v15  ;;  %v726_v41 = vld [vmem:[%s5798_s26 + $0x1d0] sm:$0xff]  ;;  %v745_v12 = vld [vmem:[%s5798_s26 + $0x268] sm:$0xff] }
 0x2f4   : > { %3017 = vmatprep.mubr.f32.mxu1 %v721_v9  ;;  %2062 = vmatprep.mubr.f32.mxu0 %v721_v9 }
 0x2f6   : > { %v2689_v30 = vpop.f32.mrb[102].mxu1 }
 0x2f7   : > { %v6774_v37 = vadd.f32 %v2689_v30, %v6531_v54  ;;  %v2691_v39 = vpop.f32.mrb[103].mxu1  ;;  %3018 = vmatmul.mubr.f32.gmra.mrb[208].mxu1 %v720_v28  ;;  %2063 = vmatmul.mubr.f32.gmra.mrb[16].mxu0 %v720_v28  ;;  %v732_v54 = vld [vmem:[%s5798_s26 + $0x200] sm:$0xff]  ;;  %v751_v30 = vld [vmem:[%s5798_s26 + $0x298] sm:$0xff] }
 0x2f8   : > { %3022 = vmatprep.mubr.f32.mxu1 %v727_v25  ;;  %2068 = vmatprep.mubr.f32.mxu0 %v727_v25 }
 0x2fa   : > { %v2694_v49 = vpop.f32.mrb[104].mxu1 }
 0x2fb   : > { %v6779_v53 = vadd.f32 %v2694_v49, %v6542_v3  ;;  %v2696_v58 = vpop.f32.mrb[105].mxu1  ;;  %3023 = vmatmul.mubr.f32.gmra.mrb[210].mxu1 %v726_v41  ;;  %2069 = vmatmul.mubr.f32.gmra.mrb[18].mxu0 %v726_v41  ;;  %v738_v3 = vld [vmem:[%s5798_s26 + $0x230] sm:$0xff]  ;;  %v757_v49 = vld [vmem:[%s5798_s26 + $0x2c8] sm:$0xff] }
 0x2fc   : > { %3027 = vmatprep.mubr.f32.mxu1 %v733_v42  ;;  %2074 = vmatprep.mubr.f32.mxu0 %v733_v42 }
 0x2fe   : > { %v2699_v8 = vpop.f32.mrb[106].mxu1 }
 0x2ff   : > { %v6784_v15 = vadd.f32 %v2699_v8, %v6553_v18  ;;  %v2701_v9 = vpop.f32.mrb[107].mxu1  ;;  %3028 = vmatmul.mubr.f32.gmra.mrb[212].mxu1 %v732_v54  ;;  %2075 = vmatmul.mubr.f32.gmra.mrb[20].mxu0 %v732_v54  ;;  %v744_v18 = vld [vmem:[%s5798_s26 + $0x260] sm:$0xff]  ;;  %v763_v8 = vld [vmem:[%s5798_s26 + $0x2f8] sm:$0xff] }
 0x300   : > { %3032 = vmatprep.mubr.f32.mxu1 %v739_v62  ;;  %2080 = vmatprep.mubr.f32.mxu0 %v739_v62 }
 0x302   : > { %v2704_v22 = vpop.f32.mrb[108].mxu1 }
 0x303   : > { %v6789_v28 = vadd.f32 %v2704_v22, %v6564_v32  ;;  %v2706_v25 = vpop.f32.mrb[109].mxu1  ;;  %3033 = vmatmul.mubr.f32.gmra.mrb[214].mxu1 %v738_v3  ;;  %2081 = vmatmul.mubr.f32.gmra.mrb[22].mxu0 %v738_v3  ;;  %v750_v32 = vld [vmem:[%s5798_s26 + $0x290] sm:$0xff]  ;;  %v769_v22 = vld [vmem:[%s5798_s26 + $0x328] sm:$0xff] }
 0x304   : > { %3037 = vmatprep.mubr.f32.mxu1 %v745_v12  ;;  %2086 = vmatprep.mubr.f32.mxu0 %v745_v12 }
 0x306   : > { %v2709_v39 = vpop.f32.mrb[110].mxu1 }
 0x307   : > { %v6794_v41 = vadd.f32 %v2709_v39, %v6575_v46  ;;  %v2711_v42 = vpop.f32.mrb[111].mxu1  ;;  %3038 = vmatmul.mubr.f32.gmra.mrb[216].mxu1 %v744_v18  ;;  %2087 = vmatmul.mubr.f32.gmra.mrb[24].mxu0 %v744_v18  ;;  %v756_v46 = vld [vmem:[%s5798_s26 + $0x2c0] sm:$0xff]  ;;  %v775_v39 = vld [vmem:[%s5798_s26 + $0x358] sm:$0xff] }
 0x308   : > { %3042 = vmatprep.mubr.f32.mxu1 %v751_v30  ;;  %2092 = vmatprep.mubr.f32.mxu0 %v751_v30 }
 0x30a   : > { %v2714_v58 = vpop.f32.mrb[112].mxu1 }
 0x30b   : > { %v6799_v54 = vadd.f32 %v2714_v58, %v6586_v60  ;;  %v2716_v62 = vpop.f32.mrb[113].mxu1  ;;  %3043 = vmatmul.mubr.f32.gmra.mrb[218].mxu1 %v750_v32  ;;  %2093 = vmatmul.mubr.f32.gmra.mrb[26].mxu0 %v750_v32  ;;  %v762_v60 = vld [vmem:[%s5798_s26 + $0x2f0] sm:$0xff]  ;;  %v781_v58 = vld [vmem:[%s5798_s26 + $0x388] sm:$0xff] }
 0x30c   : > { %3047 = vmatprep.mubr.f32.mxu1 %v757_v49  ;;  %2098 = vmatprep.mubr.f32.mxu0 %v757_v49 }
 0x30e   : > { %v2719_v9 = vpop.f32.mrb[114].mxu1 }
 0x30f   : > { %v6804_v3 = vadd.f32 %v2719_v9, %v6597_v11  ;;  %v2721_v12 = vpop.f32.mrb[115].mxu1  ;;  %3048 = vmatmul.mubr.f32.gmra.mrb[220].mxu1 %v756_v46  ;;  %2099 = vmatmul.mubr.f32.gmra.mrb[28].mxu0 %v756_v46  ;;  %v768_v11 = vld [vmem:[%s5798_s26 + $0x320] sm:$0xff]  ;;  %v787_v9 = vld [vmem:[%s5798_s26 + $0x3b8] sm:$0xff] }
 0x310   : > { %3052 = vmatprep.mubr.f32.mxu1 %v763_v8  ;;  %2104 = vmatprep.mubr.f32.mxu0 %v763_v8 }
 0x312   : > { %v2724_v25 = vpop.f32.mrb[116].mxu1 }
 0x313   : > { %v6809_v18 = vadd.f32 %v2724_v25, %v6605_v23  ;;  %v2726_v30 = vpop.f32.mrb[117].mxu1  ;;  %3053 = vmatmul.mubr.f32.gmra.mrb[222].mxu1 %v762_v60  ;;  %2105 = vmatmul.mubr.f32.gmra.mrb[30].mxu0 %v762_v60  ;;  %v774_v23 = vld [vmem:[%s5798_s26 + $0x350] sm:$0xff]  ;;  %v793_v25 = vld [vmem:[%s5798_s26 + $0x3e8] sm:$0xff] }
 0x314   : > { %3057 = vmatprep.mubr.f32.mxu1 %v769_v22  ;;  %2110 = vmatprep.mubr.f32.mxu0 %v769_v22 }
 0x316   : > { %v2729_v42 = vpop.f32.mrb[118].mxu1 }
 0x317   : > { %v6814_v32 = vadd.f32 %v2729_v42, %v6610_v27  ;;  %v2731_v49 = vpop.f32.mrb[119].mxu1  ;;  %3058 = vmatmul.mubr.f32.gmra.mrb[224].mxu1 %v768_v11  ;;  %2111 = vmatmul.mubr.f32.gmra.mrb[32].mxu0 %v768_v11  ;;  %v780_v27 = vld [vmem:[%s5798_s26 + $0x380] sm:$0xff]  ;;  %v799_v42 = vld [vmem:[%s5798_s26 + $0x418] sm:$0xff] }
 0x318   : > { %3062 = vmatprep.mubr.f32.mxu1 %v775_v39  ;;  %2116 = vmatprep.mubr.f32.mxu0 %v775_v39 }
 0x31a   : > { %v2734_v62 = vpop.f32.mrb[120].mxu1 }
 0x31b   : > { %v6819_v46 = vadd.f32 %v2734_v62, %v6614_v31  ;;  %v2736_v8 = vpop.f32.mrb[121].mxu1  ;;  %3063 = vmatmul.mubr.f32.gmra.mrb[226].mxu1 %v774_v23  ;;  %2117 = vmatmul.mubr.f32.gmra.mrb[34].mxu0 %v774_v23  ;;  %v786_v31 = vld [vmem:[%s5798_s26 + $0x3b0] sm:$0xff]  ;;  %v805_v62 = vld [vmem:[%s5798_s26 + $0x448] sm:$0xff] }
 0x31c   : > { %3067 = vmatprep.mubr.f32.mxu1 %v781_v58  ;;  %2122 = vmatprep.mubr.f32.mxu0 %v781_v58 }
 0x31e   : > { %v2739_v12 = vpop.f32.mrb[122].mxu1 }
 0x31f   : > { %v6824_v60 = vadd.f32 %v2739_v12, %v6618_v36  ;;  %v2741_v22 = vpop.f32.mrb[123].mxu1  ;;  %3068 = vmatmul.mubr.f32.gmra.mrb[228].mxu1 %v780_v27  ;;  %2123 = vmatmul.mubr.f32.gmra.mrb[36].mxu0 %v780_v27  ;;  %v792_v36 = vld [vmem:[%s5798_s26 + $0x3e0] sm:$0xff]  ;;  %v811_v12 = vld [vmem:[%s5798_s26 + $0x478] sm:$0xff] }
 0x320   : > { %3072 = vmatprep.mubr.f32.mxu1 %v787_v9  ;;  %2128 = vmatprep.mubr.f32.mxu0 %v787_v9 }
 0x322   : > { %v2744_v30 = vpop.f32.mrb[124].mxu1 }
 0x323   : > { %v6829_v11 = vadd.f32 %v2744_v30, %v6622_v40  ;;  %v2746_v39 = vpop.f32.mrb[125].mxu1  ;;  %3073 = vmatmul.mubr.f32.gmra.mrb[230].mxu1 %v786_v31  ;;  %2129 = vmatmul.mubr.f32.gmra.mrb[38].mxu0 %v786_v31  ;;  %v798_v40 = vld [vmem:[%s5798_s26 + $0x410] sm:$0xff]  ;;  %v817_v30 = vld [vmem:[%s5798_s26 + $0x4a8] sm:$0xff] }
 0x324   : > { %3077 = vmatprep.mubr.f32.mxu1 %v793_v25  ;;  %2134 = vmatprep.mubr.f32.mxu0 %v793_v25 }
 0x326   : > { %v2749_v49 = vpop.f32.mrb[126].mxu1 }
 0x327   : > { %v6834_v23 = vadd.f32 %v2749_v49, %v6626_v45  ;;  %v2751_v58 = vpop.f32.mrb[127].mxu1  ;;  %3078 = vmatmul.mubr.f32.gmra.mrb[232].mxu1 %v792_v36  ;;  %2135 = vmatmul.mubr.f32.gmra.mrb[40].mxu0 %v792_v36  ;;  %v804_v45 = vld [vmem:[%s5798_s26 + $0x440] sm:$0xff]  ;;  %v823_v49 = vld [vmem:[%s5798_s26 + $0x4d8] sm:$0xff] }
 0x328   : > { %3082 = vmatprep.mubr.f32.mxu1 %v799_v42  ;;  %2140 = vmatprep.mubr.f32.mxu0 %v799_v42 }
 0x32a   : > { %v2754_v8 = vpop.f32.mrb[128].mxu1 }
 0x32b   : > { %v6839_v27 = vadd.f32 %v2754_v8, %v6630_v50  ;;  %v2756_v9 = vpop.f32.mrb[129].mxu1  ;;  %3083 = vmatmul.mubr.f32.gmra.mrb[234].mxu1 %v798_v40  ;;  %2141 = vmatmul.mubr.f32.gmra.mrb[42].mxu0 %v798_v40  ;;  %v810_v50 = vld [vmem:[%s5798_s26 + $0x470] sm:$0xff]  ;;  %v829_v8 = vld [vmem:[%s5798_s26 + $0x508] sm:$0xff] }
 0x32c   : > { %3087 = vmatprep.mubr.f32.mxu1 %v805_v62  ;;  %2146 = vmatprep.mubr.f32.mxu0 %v805_v62 }
 0x32e   : > { %v2759_v22 = vpop.f32.mrb[130].mxu1 }
 0x32f   : > { %v6844_v31 = vadd.f32 %v2759_v22, %v6634_v55  ;;  %v2761_v25 = vpop.f32.mrb[131].mxu1  ;;  %3088 = vmatmul.mubr.f32.gmra.mrb[236].mxu1 %v804_v45  ;;  %2147 = vmatmul.mubr.f32.gmra.mrb[44].mxu0 %v804_v45  ;;  %v816_v55 = vld [vmem:[%s5798_s26 + $0x4a0] sm:$0xff]  ;;  %v835_v22 = vld [vmem:[%s5798_s26 + $0x538] sm:$0xff] }
 0x330   : > { %3092 = vmatprep.mubr.f32.mxu1 %v811_v12  ;;  %2152 = vmatprep.mubr.f32.mxu0 %v811_v12 }
 0x332   : > { %v2764_v39 = vpop.f32.mrb[132].mxu1 }
 0x333   : > { %v6849_v36 = vadd.f32 %v2764_v39, %v6638_v59  ;;  %v2766_v42 = vpop.f32.mrb[133].mxu1  ;;  %3093 = vmatmul.mubr.f32.gmra.mrb[238].mxu1 %v810_v50  ;;  %2153 = vmatmul.mubr.f32.gmra.mrb[46].mxu0 %v810_v50  ;;  %v822_v59 = vld [vmem:[%s5798_s26 + $0x4d0] sm:$0xff]  ;;  %v841_v39 = vld [vmem:[%s5798_s26 + $0x568] sm:$0xff] }
 0x334   : > { %3097 = vmatprep.mubr.f32.mxu1 %v817_v30  ;;  %2158 = vmatprep.mubr.f32.mxu0 %v817_v30 }
 0x336   : > { %v2769_v58 = vpop.f32.mrb[134].mxu1 }
 0x337   : > { %v6854_v40 = vadd.f32 %v2769_v58, %v6642_v0  ;;  %v2771_v62 = vpop.f32.mrb[135].mxu1  ;;  %3098 = vmatmul.mubr.f32.gmra.mrb[240].mxu1 %v816_v55  ;;  %2159 = vmatmul.mubr.f32.gmra.mrb[48].mxu0 %v816_v55  ;;  %v828_v0 = vld [vmem:[%s5798_s26 + $0x500] sm:$0xff]  ;;  %v847_v58 = vld [vmem:[%s5798_s26 + $0x598] sm:$0xff] }
 0x338   : > { %3102 = vmatprep.mubr.f32.mxu1 %v823_v49  ;;  %2164 = vmatprep.mubr.f32.mxu0 %v823_v49 }
 0x33a   : > { %v2774_v9 = vpop.f32.mrb[136].mxu1 }
 0x33b   : > { %v6859_v45 = vadd.f32 %v2774_v9, %v6646_v6  ;;  %v2776_v12 = vpop.f32.mrb[137].mxu1  ;;  %3103 = vmatmul.mubr.f32.gmra.mrb[242].mxu1 %v822_v59  ;;  %2165 = vmatmul.mubr.f32.gmra.mrb[50].mxu0 %v822_v59  ;;  %v834_v6 = vld [vmem:[%s5798_s26 + $0x530] sm:$0xff]  ;;  %v853_v9 = vld [vmem:[%s5798_s26 + $0x5c8] sm:$0xff] }
 0x33c   : > { %3107 = vmatprep.mubr.f32.mxu1 %v829_v8  ;;  %2170 = vmatprep.mubr.f32.mxu0 %v829_v8 }
 0x33e   : > { %v2779_v25 = vpop.f32.mrb[138].mxu1 }
 0x33f   : > { %v6864_v50 = vadd.f32 %v2779_v25, %v6650_v10  ;;  %v2781_v30 = vpop.f32.mrb[139].mxu1  ;;  %3108 = vmatmul.mubr.f32.gmra.mrb[244].mxu1 %v828_v0  ;;  %2171 = vmatmul.mubr.f32.gmra.mrb[52].mxu0 %v828_v0  ;;  %v840_v10 = vld [vmem:[%s5798_s26 + $0x560] sm:$0xff]  ;;  %v859_v25 = vld [vmem:[%s5798_s26 + $0x5f8] sm:$0xff] }
 0x340   : > { %3112 = vmatprep.mubr.f32.mxu1 %v835_v22  ;;  %2176 = vmatprep.mubr.f32.mxu0 %v835_v22 }
 0x342   : > { %v2784_v42 = vpop.f32.mrb[140].mxu1 }
 0x343   : > { %v6869_v55 = vadd.f32 %v2784_v42, %v6654_v16  ;;  %v2786_v49 = vpop.f32.mrb[141].mxu1  ;;  %3113 = vmatmul.mubr.f32.gmra.mrb[246].mxu1 %v834_v6  ;;  %2177 = vmatmul.mubr.f32.gmra.mrb[54].mxu0 %v834_v6  ;;  %v846_v16 = vld [vmem:[%s5798_s26 + $0x590] sm:$0xff]  ;;  %v865_v42 = vld [vmem:[%s5798_s26 + $0x628] sm:$0xff] }
 0x344   : > { %3117 = vmatprep.mubr.f32.mxu1 %v841_v39  ;;  %2182 = vmatprep.mubr.f32.mxu0 %v841_v39 }
 0x346   : > { %v2789_v62 = vpop.f32.mrb[142].mxu1 }
 0x347   : > { %v6874_v59 = vadd.f32 %v2789_v62, %v6658_v21  ;;  %v2791_v8 = vpop.f32.mrb[143].mxu1  ;;  %3118 = vmatmul.mubr.f32.gmra.mrb[248].mxu1 %v840_v10  ;;  %2183 = vmatmul.mubr.f32.gmra.mrb[56].mxu0 %v840_v10  ;;  %v852_v21 = vld [vmem:[%s5798_s26 + $0x5c0] sm:$0xff]  ;;  %v871_v62 = vld [vmem:[%s5798_s26 + $0x658] sm:$0xff] }
 0x348   : > { %3122 = vmatprep.mubr.f32.mxu1 %v847_v58  ;;  %2188 = vmatprep.mubr.f32.mxu0 %v847_v58 }
 0x34a   : > { %v2794_v12 = vpop.f32.mrb[144].mxu1 }
 0x34b   : > { %v6879_v0 = vadd.f32 %v2794_v12, %v6662_v26  ;;  %v2796_v22 = vpop.f32.mrb[145].mxu1  ;;  %3123 = vmatmul.mubr.f32.gmra.mrb[250].mxu1 %v846_v16  ;;  %2189 = vmatmul.mubr.f32.gmra.mrb[58].mxu0 %v846_v16  ;;  %v858_v26 = vld [vmem:[%s5798_s26 + $0x5f0] sm:$0xff]  ;;  %v877_v12 = vld [vmem:[%s5798_s26 + $0x688] sm:$0xff] }
 0x34c   : > { %3127 = vmatprep.mubr.f32.mxu1 %v853_v9  ;;  %2194 = vmatprep.mubr.f32.mxu0 %v853_v9 }
 0x34e   : > { %v2799_v30 = vpop.f32.mrb[146].mxu1 }
 0x34f   : > { %v6884_v6 = vadd.f32 %v2799_v30, %v6666_v33  ;;  %v2801_v39 = vpop.f32.mrb[147].mxu1  ;;  %3128 = vmatmul.mubr.f32.gmra.mrb[252].mxu1 %v852_v21  ;;  %2195 = vmatmul.mubr.f32.gmra.mrb[60].mxu0 %v852_v21  ;;  %v864_v33 = vld [vmem:[%s5798_s26 + $0x620] sm:$0xff]  ;;  %v883_v30 = vld [vmem:[%s5798_s26 + $0x6b8] sm:$0xff] }
 0x350   : > { %3132 = vmatprep.mubr.f32.mxu1 %v859_v25  ;;  %2200 = vmatprep.mubr.f32.mxu0 %v859_v25 }
 0x352   : > { %v2804_v49 = vpop.f32.mrb[148].mxu1 }
 0x353   : > { %v6889_v10 = vadd.f32 %v2804_v49, %v6670_v38  ;;  %v2806_v58 = vpop.f32.mrb[149].mxu1  ;;  %3133 = vmatmul.mubr.f32.gmra.mrb[254].mxu1 %v858_v26  ;;  %2201 = vmatmul.mubr.f32.gmra.mrb[62].mxu0 %v858_v26  ;;  %v870_v38 = vld [vmem:[%s5798_s26 + $0x650] sm:$0xff]  ;;  %v889_v49 = vld [vmem:[%s5798_s26 + $0x6e8] sm:$0xff] }
 0x354   : > { %3137 = vmatprep.mubr.f32.mxu1 %v865_v42  ;;  %2206 = vmatprep.mubr.f32.mxu0 %v865_v42 }
 0x356   : > { %v2809_v8 = vpop.f32.mrb[150].mxu1 }
 0x357   : > { %v6894_v16 = vadd.f32 %v2809_v8, %v6674_v44  ;;  %v2811_v9 = vpop.f32.mrb[151].mxu1  ;;  %3138 = vmatmul.mubr.f32.gmra.mrb[0].mxu1 %v864_v33  ;;  %2207 = vmatmul.mubr.f32.gmra.mrb[64].mxu0 %v864_v33  ;;  %v876_v44 = vld [vmem:[%s5798_s26 + $0x680] sm:$0xff]  ;;  %v895_v8 = vld [vmem:[%s5798_s26 + $0x718] sm:$0xff] }
 0x358   : > { %3142 = vmatprep.mubr.f32.mxu1 %v871_v62  ;;  %2212 = vmatprep.mubr.f32.mxu0 %v871_v62 }
 0x35a   : > { %v2814_v22 = vpop.f32.mrb[152].mxu1 }
 0x35b   : > { %v6899_v21 = vadd.f32 %v2814_v22, %v6678_v51  ;;  %v2816_v25 = vpop.f32.mrb[153].mxu1  ;;  %3143 = vmatmul.mubr.f32.gmra.mrb[2].mxu1 %v870_v38  ;;  %2213 = vmatmul.mubr.f32.gmra.mrb[66].mxu0 %v870_v38  ;;  %v882_v51 = vld [vmem:[%s5798_s26 + $0x6b0] sm:$0xff]  ;;  %v901_v22 = vld [vmem:[%s5798_s26 + $0x748] sm:$0xff] }
 0x35c   : > { %3147 = vmatprep.mubr.f32.mxu1 %v877_v12  ;;  %2218 = vmatprep.mubr.f32.mxu0 %v877_v12 }
 0x35e   : > { %v2819_v39 = vpop.f32.mrb[154].mxu1 }
 0x35f   : > { %v6904_v26 = vadd.f32 %v2819_v39, %v6682_v57  ;;  %v2821_v42 = vpop.f32.mrb[155].mxu1  ;;  %3148 = vmatmul.mubr.f32.gmra.mrb[4].mxu1 %v876_v44  ;;  %2219 = vmatmul.mubr.f32.gmra.mrb[68].mxu0 %v876_v44  ;;  %v888_v57 = vld [vmem:[%s5798_s26 + $0x6e0] sm:$0xff]  ;;  %v907_v39 = vld [vmem:[%s5798_s26 + $0x778] sm:$0xff] }
 0x360   : > { %3152 = vmatprep.mubr.f32.mxu1 %v883_v30  ;;  %2224 = vmatprep.mubr.f32.mxu0 %v883_v30 }
 0x362   : > { %v2824_v58 = vpop.f32.mrb[156].mxu1 }
 0x363   : > { %v6909_v33 = vadd.f32 %v2824_v58, %v6686_v63  ;;  %v2826_v62 = vpop.f32.mrb[157].mxu1  ;;  %3153 = vmatmul.mubr.f32.gmra.mrb[6].mxu1 %v882_v51  ;;  %2225 = vmatmul.mubr.f32.gmra.mrb[70].mxu0 %v882_v51  ;;  %v894_v63 = vld [vmem:[%s5798_s26 + $0x710] sm:$0xff]  ;;  %v913_v58 = vld [vmem:[%s5798_s26 + $0x7a8] sm:$0xff] }
 0x364   : > { %3157 = vmatprep.mubr.f32.mxu1 %v889_v49  ;;  %2230 = vmatprep.mubr.f32.mxu0 %v889_v49 }
 0x366   : > { %v2829_v9 = vpop.f32.mrb[158].mxu1 }
 0x367   : > { %v6914_v38 = vadd.f32 %v2829_v9, %v6690_v7  ;;  %v2831_v12 = vpop.f32.mrb[159].mxu1  ;;  %3158 = vmatmul.mubr.f32.gmra.mrb[8].mxu1 %v888_v57  ;;  %2231 = vmatmul.mubr.f32.gmra.mrb[72].mxu0 %v888_v57  ;;  %v900_v7 = vld [vmem:[%s5798_s26 + $0x740] sm:$0xff]  ;;  %v919_v9 = vld [vmem:[%s5798_s26 + $0x7d8] sm:$0xff] }
 0x368   : > { %3162 = vmatprep.mubr.f32.mxu1 %v895_v8  ;;  %2236 = vmatprep.mubr.f32.mxu0 %v895_v8 }
 0x36a   : > { %v2834_v25 = vpop.f32.mrb[160].mxu1 }
 0x36b   : > { %v6919_v44 = vadd.f32 %v2834_v25, %v6694_v13  ;;  %v2836_v30 = vpop.f32.mrb[161].mxu1  ;;  %3163 = vmatmul.mubr.f32.gmra.mrb[10].mxu1 %v894_v63  ;;  %2237 = vmatmul.mubr.f32.gmra.mrb[74].mxu0 %v894_v63  ;;  %v906_v13 = vld [vmem:[%s5798_s26 + $0x770] sm:$0xff]  ;;  %v925_v25 = vld [vmem:[%s5798_s26 + $0x808] sm:$0xff] }
 0x36c   : > { %3167 = vmatprep.mubr.f32.mxu1 %v901_v22  ;;  %2242 = vmatprep.mubr.f32.mxu0 %v901_v22 }
 0x36e   : > { %v2839_v42 = vpop.f32.mrb[162].mxu1 }
 0x36f   : > { %v6924_v51 = vadd.f32 %v2839_v42, %v6698_v20  ;;  %v2841_v49 = vpop.f32.mrb[163].mxu1  ;;  %3168 = vmatmul.mubr.f32.gmra.mrb[12].mxu1 %v900_v7  ;;  %2243 = vmatmul.mubr.f32.gmra.mrb[76].mxu0 %v900_v7  ;;  %v912_v20 = vld [vmem:[%s5798_s26 + $0x7a0] sm:$0xff]  ;;  %v931_v42 = vld [vmem:[%s5798_s26 + $0x838] sm:$0xff] }
 0x370   : > { %3172 = vmatprep.mubr.f32.mxu1 %v907_v39  ;;  %2248 = vmatprep.mubr.f32.mxu0 %v907_v39 }
 0x372   : > { %v2844_v62 = vpop.f32.mrb[164].mxu1 }
 0x373   : > { %v6929_v57 = vadd.f32 %v2844_v62, %v6702_v29  ;;  %v2846_v8 = vpop.f32.mrb[165].mxu1  ;;  %3173 = vmatmul.mubr.f32.gmra.mrb[14].mxu1 %v906_v13  ;;  %2249 = vmatmul.mubr.f32.gmra.mrb[78].mxu0 %v906_v13  ;;  %v918_v29 = vld [vmem:[%s5798_s26 + $0x7d0] sm:$0xff]  ;;  %v937_v62 = vld [vmem:[%s5798_s26 + $0x868] sm:$0xff] }
 0x374   : > { %3177 = vmatprep.mubr.f32.mxu1 %v913_v58  ;;  %2254 = vmatprep.mubr.f32.mxu0 %v913_v58 }
 0x376   : > { %v2849_v12 = vpop.f32.mrb[166].mxu1 }
 0x377   : > { %v6934_v63 = vadd.f32 %v2849_v12, %v6706_v35  ;;  %v2851_v22 = vpop.f32.mrb[167].mxu1  ;;  %3178 = vmatmul.mubr.f32.gmra.mrb[16].mxu1 %v912_v20  ;;  %2255 = vmatmul.mubr.f32.gmra.mrb[80].mxu0 %v912_v20  ;;  %v924_v35 = vld [vmem:[%s5798_s26 + $0x800] sm:$0xff]  ;;  %v943_v12 = vld [vmem:[%s5798_s26 + $0x898] sm:$0xff] }
 0x378   : > { %3182 = vmatprep.mubr.f32.mxu1 %v919_v9  ;;  %2260 = vmatprep.mubr.f32.mxu0 %v919_v9 }
 0x37a   : > { %v2854_v30 = vpop.f32.mrb[168].mxu1 }
 0x37b   : > { %v6939_v7 = vadd.f32 %v2854_v30, %v6710_v43  ;;  %v2856_v39 = vpop.f32.mrb[169].mxu1  ;;  %3183 = vmatmul.mubr.f32.gmra.mrb[18].mxu1 %v918_v29  ;;  %2261 = vmatmul.mubr.f32.gmra.mrb[82].mxu0 %v918_v29  ;;  %v930_v43 = vld [vmem:[%s5798_s26 + $0x830] sm:$0xff]  ;;  %v949_v30 = vld [vmem:[%s5798_s26 + $0x8c8] sm:$0xff] }
 0x37c   : > { %3187 = vmatprep.mubr.f32.mxu1 %v925_v25  ;;  %2266 = vmatprep.mubr.f32.mxu0 %v925_v25 }
 0x37e   : > { %v2859_v49 = vpop.f32.mrb[170].mxu1 }
 0x37f   : > { %v6944_v13 = vadd.f32 %v2859_v49, %v6714_v52  ;;  %v2861_v58 = vpop.f32.mrb[171].mxu1  ;;  %3188 = vmatmul.mubr.f32.gmra.mrb[20].mxu1 %v924_v35  ;;  %2267 = vmatmul.mubr.f32.gmra.mrb[84].mxu0 %v924_v35  ;;  %v936_v52 = vld [vmem:[%s5798_s26 + $0x860] sm:$0xff]  ;;  %v955_v49 = vld [vmem:[%s5798_s26 + $0x8f8] sm:$0xff] }
 0x380   : > { %3192 = vmatprep.mubr.f32.mxu1 %v931_v42  ;;  %2272 = vmatprep.mubr.f32.mxu0 %v931_v42 }
 0x382   : > { %v2864_v8 = vpop.f32.mrb[172].mxu1 }
 0x383   : > { %v6949_v20 = vadd.f32 %v2864_v8, %v6718_v61  ;;  %v2866_v9 = vpop.f32.mrb[173].mxu1  ;;  %3193 = vmatmul.mubr.f32.gmra.mrb[22].mxu1 %v930_v43  ;;  %2273 = vmatmul.mubr.f32.gmra.mrb[86].mxu0 %v930_v43  ;;  %v942_v61 = vld [vmem:[%s5798_s26 + $0x890] sm:$0xff] }
 0x384   : > { %3197 = vmatprep.mubr.f32.mxu1 %v937_v62  ;;  %2278 = vmatprep.mubr.f32.mxu0 %v937_v62  ;;  %v954_v8 = vld [vmem:[%s5798_s26 + $0x8f0] sm:$0xff] }
 0x386   : > { %v2869_v22 = vpop.f32.mrb[174].mxu1 }
 0x387   : > { %v6954_v29 = vadd.f32 %v2869_v22, %v6722_v5  ;;  %v2871_v25 = vpop.f32.mrb[175].mxu1  ;;  %3198 = vmatmul.mubr.f32.gmra.mrb[24].mxu1 %v936_v52  ;;  %2279 = vmatmul.mubr.f32.gmra.mrb[88].mxu0 %v936_v52  ;;  %v948_v5 = vld [vmem:[%s5798_s26 + $0x8c0] sm:$0xff] }
 0x388   : > { %3202 = vmatprep.mubr.f32.mxu1 %v943_v12  ;;  %2284 = vmatprep.mubr.f32.mxu0 %v943_v12 }
 0x38a   : > { %v2874_v39 = vpop.f32.mrb[176].mxu1 }
 0x38b   : > { %v6959_v35 = vadd.f32 %v2874_v39, %v6726_v14  ;;  %v2876_v42 = vpop.f32.mrb[177].mxu1  ;;  %3203 = vmatmul.mubr.f32.gmra.mrb[26].mxu1 %v942_v61  ;;  %2285 = vmatmul.mubr.f32.gmra.mrb[90].mxu0 %v942_v61 }
 0x38c   : > { %3207 = vmatprep.mubr.f32.mxu1 %v949_v30  ;;  %2290 = vmatprep.mubr.f32.mxu0 %v949_v30 }
 0x38e   : > { %v2879_v58 = vpop.f32.mrb[178].mxu1 }
 0x38f   : > { %v6964_v43 = vadd.f32 %v2879_v58, %v6730_v24  ;;  %v2881_v62 = vpop.f32.mrb[179].mxu1  ;;  %3208 = vmatmul.mubr.f32.gmra.mrb[28].mxu1 %v948_v5  ;;  %2291 = vmatmul.mubr.f32.gmra.mrb[92].mxu0 %v948_v5 }
 0x390   : > { %3212 = vmatprep.mubr.f32.mxu1 %v955_v49  ;;  %2296 = vmatprep.mubr.f32.mxu0 %v955_v49 }
 0x392   : > { %v2884_v9 = vpop.f32.mrb[180].mxu1 }
 0x393   : > { %v6968_v14 = vadd.f32 %v2884_v9, %v6734_v34  ;;  %v2886_v52 = vpop.f32.mrb[181].mxu1  ;;  %3213 = vmatmul.mubr.f32.gmra.mrb[30].mxu1 %v954_v8  ;;  %2297 = vmatmul.mubr.f32.gmra.mrb[94].mxu0 %v954_v8  ;;  %v524_v8 = vld [vmem:[%s5830_s9] sm:$0xff]  ;;  %v525_v9 = vld [vmem:[%s5830_s9 + $0x8] sm:$0xff] }
 0x396   : > { %v2889_v12 = vpop.f32.mrb[182].mxu1 }
 0x397   : > { %v6971_v22 = vadd.f32 %v2889_v12, %v6738_v47  ;;  %v2891_v24 = vpop.f32.mrb[183].mxu1 }
 0x39a   : > { %v2894_v25 = vpop.f32.mrb[184].mxu1 }
 0x39b   : > { %v6974_v61 = vadd.f32 %v2894_v25, %v6742_v56  ;;  %v2896_v30 = vpop.f32.mrb[185].mxu1 }
 0x39e   : > { %v2899_v39 = vpop.f32.mrb[186].mxu1 }
 0x39f   : > { %v6977_v34 = vadd.f32 %v2899_v39, %v6746_v2  ;;  %v2901_v42 = vpop.f32.mrb[187].mxu1  ;;  %v526_v2 = vld [vmem:[%s5830_s9 + $0x10] sm:$0xff] }
 0x3a0   : > { %v527_v42 = vld [vmem:[%s5830_s9 + $0x18] sm:$0xff] }
 0x3a2   : > { %v2904_v5 = vpop.f32.mrb[188].mxu1 }
 0x3a3   : > { %v6980_v49 = vadd.f32 %v2904_v5, %v6750_v17  ;;  %v2906_v58 = vpop.f32.mrb[189].mxu1  ;;  %v528_v5 = vld [vmem:[%s5830_s9 + $0x20] sm:$0xff] }
 0x3a4   : > { %v529_v58 = vld [vmem:[%s5830_s9 + $0x28] sm:$0xff] }
 0x3a6   : > { %v2909_v47 = vpop.f32.mrb[190].mxu1 }
 0x3a7   : > { %v6983_v62 = vadd.f32 %v2909_v47, %v6754_v4  ;;  %v2911_v56 = vpop.f32.mrb[191].mxu1 }
 0x3aa   : > { %v2979_v52 = vpop.f32.mrb[192].mxu1  ;;  %v2016_v12 = vpop.f32.mrb[0].mxu0 }
 0x3ab   : > { %v2980_v24 = vadd.f32 %v2979_v52, %v6759_v48  ;;  %v3218_v17 = vadd.f32 %v2016_v12, %v524_v8  ;;  %v2981_v25 = vpop.f32.mrb[193].mxu1  ;;  %v2018_v30 = vpop.f32.mrb[1].mxu0 }
 0x3ac   : > { %v3219_v39 = vadd.f32 %v2018_v30, %v525_v9  ;;  %v530_v25 = vld [vmem:[%s5830_s9 + $0x30] sm:$0xff] }
 0x3ad   : > { %v3220_v4 = vadd.f32 %v2980_v24, %v526_v2  ;;  %3362 = vst [vmem:[%s5830_s9] sm:$0xff] %v3218_v17  ;;  %v531_v24 = vld [vmem:[%s5830_s9 + $0x38] sm:$0xff]  ;;  %v532_v17 = vld [vmem:[%s5830_s9 + $0x40] sm:$0xff] }
 0x3ae   : > { %3363 = vst [vmem:[%s5830_s9 + $0x8] sm:$0xff] %v3219_v39  ;;  %v2984_v47 = vpop.f32.mrb[194].mxu1  ;;  %v2022_v56 = vpop.f32.mrb[2].mxu0 }
 0x3af   : > { %3364 = vst [vmem:[%s5830_s9 + $0x10] sm:$0xff] %v3220_v4  ;;  %v2985_v48 = vadd.f32 %v2984_v47, %v6764_v1  ;;  %v3221_v8 = vadd.f32 %v2022_v56, %v527_v42  ;;  %v2986_v52 = vpop.f32.mrb[195].mxu1  ;;  %v2024_v12 = vpop.f32.mrb[3].mxu0  ;;  %v533_v56 = vld [vmem:[%s5830_s9 + $0x48] sm:$0xff] }
 0x3b0   : > { %v3222_v9 = vadd.f32 %v2024_v12, %v528_v5 }
 0x3b1   : > { %v3223_v2 = vadd.f32 %v2985_v48, %v529_v58  ;;  %3365 = vst [vmem:[%s5830_s9 + $0x18] sm:$0xff] %v3221_v8  ;;  %v534_v48 = vld [vmem:[%s5830_s9 + $0x50] sm:$0xff]  ;;  %v535_v8 = vld [vmem:[%s5830_s9 + $0x58] sm:$0xff] }
 0x3b2   : > { %3366 = vst [vmem:[%s5830_s9 + $0x20] sm:$0xff] %v3222_v9  ;;  %v2989_v30 = vpop.f32.mrb[196].mxu1  ;;  %v2028_v39 = vpop.f32.mrb[4].mxu0 }
 0x3b3   : > { %3367 = vst [vmem:[%s5830_s9 + $0x28] sm:$0xff] %v3223_v2  ;;  %v2990_v1 = vadd.f32 %v2989_v30, %v6769_v19  ;;  %v3224_v42 = vadd.f32 %v2028_v39, %v530_v25  ;;  %v2991_v4 = vpop.f32.mrb[197].mxu1  ;;  %v2030_v47 = vpop.f32.mrb[5].mxu0  ;;  %v536_v30 = vld [vmem:[%s5830_s9 + $0x60] sm:$0xff]  ;;  %v537_v39 = vld [vmem:[%s5830_s9 + $0x68] sm:$0xff] }
 0x3b4   : > { %v3225_v5 = vadd.f32 %v2030_v47, %v531_v24 }
 0x3b5   : > { %v3226_v58 = vadd.f32 %v2990_v1, %v532_v17  ;;  %3368 = vst [vmem:[%s5830_s9 + $0x30] sm:$0xff] %v3224_v42  ;;  %v538_v1 = vld [vmem:[%s5830_s9 + $0x70] sm:$0xff] }
 0x3b6   : > { %3369 = vst [vmem:[%s5830_s9 + $0x38] sm:$0xff] %v3225_v5  ;;  %v2994_v52 = vpop.f32.mrb[198].mxu1  ;;  %v2034_v12 = vpop.f32.mrb[6].mxu0 }
 0x3b7   : > { %3370 = vst [vmem:[%s5830_s9 + $0x40] sm:$0xff] %v3226_v58  ;;  %v2995_v19 = vadd.f32 %v2994_v52, %v6774_v37  ;;  %v3227_v9 = vadd.f32 %v2034_v12, %v533_v56  ;;  %v2996_v25 = vpop.f32.mrb[199].mxu1  ;;  %v2036_v2 = vpop.f32.mrb[7].mxu0  ;;  %v540_v52 = vld [vmem:[%s5830_s9 + $0x80] sm:$0xff]  ;;  %v541_v12 = vld [vmem:[%s5830_s9 + $0x88] sm:$0xff] }
 0x3b8   : > { %v3228_v24 = vadd.f32 %v2036_v2, %v534_v48  ;;  %v539_v48 = vld [vmem:[%s5830_s9 + $0x78] sm:$0xff] }
 0x3b9   : > { %v3229_v17 = vadd.f32 %v2995_v19, %v535_v8  ;;  %3371 = vst [vmem:[%s5830_s9 + $0x48] sm:$0xff] %v3227_v9 }
 0x3ba   : > { %3372 = vst [vmem:[%s5830_s9 + $0x50] sm:$0xff] %v3228_v24  ;;  %v2999_v42 = vpop.f32.mrb[200].mxu1  ;;  %v2040_v4 = vpop.f32.mrb[8].mxu0 }
 0x3bb   : > { %3373 = vst [vmem:[%s5830_s9 + $0x58] sm:$0xff] %v3229_v17  ;;  %v3000_v37 = vadd.f32 %v2999_v42, %v6779_v53  ;;  %v3230_v47 = vadd.f32 %v2040_v4, %v536_v30  ;;  %v3001_v5 = vpop.f32.mrb[201].mxu1  ;;  %v2042_v56 = vpop.f32.mrb[9].mxu0  ;;  %v542_v17 = vld [vmem:[%s5830_s9 + $0x90] sm:$0xff]  ;;  %v544_v42 = vld [vmem:[%s5830_s9 + $0xa0] sm:$0xff] }
 0x3bc   : > { %v3231_v58 = vadd.f32 %v2042_v56, %v537_v39 }
 0x3bd   : > { %v3232_v8 = vadd.f32 %v3000_v37, %v538_v1  ;;  %3374 = vst [vmem:[%s5830_s9 + $0x60] sm:$0xff] %v3230_v47  ;;  %v543_v1 = vld [vmem:[%s5830_s9 + $0x98] sm:$0xff] }
 0x3be   : > { %3375 = vst [vmem:[%s5830_s9 + $0x68] sm:$0xff] %v3231_v58  ;;  %v3004_v19 = vpop.f32.mrb[202].mxu1  ;;  %v2046_v9 = vpop.f32.mrb[10].mxu0 }
 0x3bf   : > { %3376 = vst [vmem:[%s5830_s9 + $0x70] sm:$0xff] %v3232_v8  ;;  %v3005_v53 = vadd.f32 %v3004_v19, %v6784_v15  ;;  %v3233_v25 = vadd.f32 %v2046_v9, %v539_v48  ;;  %v3006_v2 = vpop.f32.mrb[203].mxu1  ;;  %v2048_v24 = vpop.f32.mrb[11].mxu0  ;;  %v545_v48 = vld [vmem:[%s5830_s9 + $0xa8] sm:$0xff] }
 0x3c0   : > { %v3234_v30 = vadd.f32 %v2048_v24, %v540_v52  ;;  %v546_v52 = vld [vmem:[%s5830_s9 + $0xb0] sm:$0xff] }
 0x3c1   : > { %v3235_v39 = vadd.f32 %v3005_v53, %v541_v12  ;;  %3377 = vst [vmem:[%s5830_s9 + $0x78] sm:$0xff] %v3233_v25  ;;  %v547_v12 = vld [vmem:[%s5830_s9 + $0xb8] sm:$0xff] }
 0x3c2   : > { %3378 = vst [vmem:[%s5830_s9 + $0x80] sm:$0xff] %v3234_v30  ;;  %v3009_v4 = vpop.f32.mrb[204].mxu1  ;;  %v2052_v37 = vpop.f32.mrb[12].mxu0  ;;  %v548_v30 = vld [vmem:[%s5830_s9 + $0xc0] sm:$0xff] }
 0x3c3   : > { %3379 = vst [vmem:[%s5830_s9 + $0x88] sm:$0xff] %v3235_v39  ;;  %v3010_v15 = vadd.f32 %v3009_v4, %v6789_v28  ;;  %v3236_v47 = vadd.f32 %v2052_v37, %v542_v17  ;;  %v3011_v5 = vpop.f32.mrb[205].mxu1  ;;  %v2054_v56 = vpop.f32.mrb[13].mxu0  ;;  %v549_v39 = vld [vmem:[%s5830_s9 + $0xc8] sm:$0xff] }
 0x3c4   : > { %v3237_v58 = vadd.f32 %v2054_v56, %v543_v1  ;;  %v550_v1 = vld [vmem:[%s5830_s9 + $0xd0] sm:$0xff]  ;;  %v551_v56 = vld [vmem:[%s5830_s9 + $0xd8] sm:$0xff] }
 0x3c5   : > { %v3238_v8 = vadd.f32 %v3010_v15, %v544_v42  ;;  %3380 = vst [vmem:[%s5830_s9 + $0x90] sm:$0xff] %v3236_v47 }
 0x3c6   : > { %3381 = vst [vmem:[%s5830_s9 + $0x98] sm:$0xff] %v3237_v58  ;;  %v3014_v19 = vpop.f32.mrb[206].mxu1  ;;  %v2058_v9 = vpop.f32.mrb[14].mxu0 }
 0x3c7   : > { %3382 = vst [vmem:[%s5830_s9 + $0xa0] sm:$0xff] %v3238_v8  ;;  %v3015_v28 = vadd.f32 %v3014_v19, %v6794_v41  ;;  %v3239_v53 = vadd.f32 %v2058_v9, %v545_v48  ;;  %v3016_v25 = vpop.f32.mrb[207].mxu1  ;;  %v2060_v2 = vpop.f32.mrb[15].mxu0  ;;  %v552_v48 = vld [vmem:[%s5830_s9 + $0xe0] sm:$0xff]  ;;  %v553_v8 = vld [vmem:[%s5830_s9 + $0xe8] sm:$0xff] }
 0x3c8   : > { %v3240_v24 = vadd.f32 %v2060_v2, %v546_v52  ;;  %v554_v25 = vld [vmem:[%s5830_s9 + $0xf0] sm:$0xff] }
 0x3c9   : > { %v3241_v17 = vadd.f32 %v3015_v28, %v547_v12  ;;  %3383 = vst [vmem:[%s5830_s9 + $0xa8] sm:$0xff] %v3239_v53 }
 0x3ca   : > { %3384 = vst [vmem:[%s5830_s9 + $0xb0] sm:$0xff] %v3240_v24  ;;  %v3019_v42 = vpop.f32.mrb[208].mxu1  ;;  %v2064_v4 = vpop.f32.mrb[16].mxu0  ;;  %v555_v24 = vld [vmem:[%s5830_s9 + $0xf8] sm:$0xff] }
 0x3cb   : > { %3385 = vst [vmem:[%s5830_s9 + $0xb8] sm:$0xff] %v3241_v17  ;;  %v3020_v41 = vadd.f32 %v3019_v42, %v6799_v54  ;;  %v3242_v37 = vadd.f32 %v2064_v4, %v548_v30  ;;  %v3021_v15 = vpop.f32.mrb[209].mxu1  ;;  %v2066_v47 = vpop.f32.mrb[17].mxu0  ;;  %v556_v30 = vld [vmem:[%s5830_s9 + $0x100] sm:$0xff] }
 0x3cc   : > { %v3243_v5 = vadd.f32 %v2066_v47, %v549_v39  ;;  %v558_v47 = vld [vmem:[%s5830_s9 + $0x110] sm:$0xff] }
 0x3cd   : > { %v3244_v58 = vadd.f32 %v3020_v41, %v550_v1  ;;  %3386 = vst [vmem:[%s5830_s9 + $0xc0] sm:$0xff] %v3242_v37  ;;  %v557_v37 = vld [vmem:[%s5830_s9 + $0x108] sm:$0xff] }
 0x3ce   : > { %3387 = vst [vmem:[%s5830_s9 + $0xc8] sm:$0xff] %v3243_v5  ;;  %v3024_v52 = vpop.f32.mrb[210].mxu1  ;;  %v2070_v12 = vpop.f32.mrb[18].mxu0  ;;  %v559_v5 = vld [vmem:[%s5830_s9 + $0x118] sm:$0xff] }
 0x3cf   : > { %3388 = vst [vmem:[%s5830_s9 + $0xd0] sm:$0xff] %v3244_v58  ;;  %v3025_v54 = vadd.f32 %v3024_v52, %v6804_v3  ;;  %v3245_v19 = vadd.f32 %v2070_v12, %v551_v56  ;;  %v3026_v9 = vpop.f32.mrb[211].mxu1  ;;  %v2072_v28 = vpop.f32.mrb[19].mxu0 }
 0x3d0   : > { %v3246_v53 = vadd.f32 %v2072_v28, %v552_v48  ;;  %v561_v9 = vld [vmem:[%s5830_s9 + $0x128] sm:$0xff]  ;;  %v562_v28 = vld [vmem:[%s5830_s9 + $0x130] sm:$0xff] }
 0x3d1   : > { %v3247_v2 = vadd.f32 %v3025_v54, %v553_v8  ;;  %3389 = vst [vmem:[%s5830_s9 + $0xd8] sm:$0xff] %v3245_v19  ;;  %v560_v54 = vld [vmem:[%s5830_s9 + $0x120] sm:$0xff] }
 0x3d2   : > { %3390 = vst [vmem:[%s5830_s9 + $0xe0] sm:$0xff] %v3246_v53  ;;  %v3029_v17 = vpop.f32.mrb[212].mxu1  ;;  %v2076_v39 = vpop.f32.mrb[20].mxu0 }
 0x3d3   : > { %3391 = vst [vmem:[%s5830_s9 + $0xe8] sm:$0xff] %v3247_v2  ;;  %v3030_v3 = vadd.f32 %v3029_v17, %v6809_v18  ;;  %v3248_v1 = vadd.f32 %v2076_v39, %v554_v25  ;;  %v3031_v42 = vpop.f32.mrb[213].mxu1  ;;  %v2078_v4 = vpop.f32.mrb[21].mxu0  ;;  %v563_v39 = vld [vmem:[%s5830_s9 + $0x138] sm:$0xff] }
 0x3d4   : > { %v3249_v41 = vadd.f32 %v2078_v4, %v555_v24  ;;  %v565_v42 = vld [vmem:[%s5830_s9 + $0x148] sm:$0xff] }
 0x3d5   : > { %v3250_v15 = vadd.f32 %v3030_v3, %v556_v30  ;;  %3392 = vst [vmem:[%s5830_s9 + $0xf0] sm:$0xff] %v3248_v1  ;;  %v564_v1 = vld [vmem:[%s5830_s9 + $0x140] sm:$0xff] }
 0x3d6   : > { %3393 = vst [vmem:[%s5830_s9 + $0xf8] sm:$0xff] %v3249_v41  ;;  %v3034_v56 = vpop.f32.mrb[214].mxu1  ;;  %v2082_v58 = vpop.f32.mrb[22].mxu0 }
 0x3d7   : > { %3394 = vst [vmem:[%s5830_s9 + $0x100] sm:$0xff] %v3250_v15  ;;  %v3035_v18 = vadd.f32 %v3034_v56, %v6814_v32  ;;  %v3251_v48 = vadd.f32 %v2082_v58, %v557_v37  ;;  %v3036_v8 = vpop.f32.mrb[215].mxu1  ;;  %v2084_v52 = vpop.f32.mrb[23].mxu0  ;;  %v566_v56 = vld [vmem:[%s5830_s9 + $0x150] sm:$0xff] }
 0x3d8   : > { %v3252_v12 = vadd.f32 %v2084_v52, %v558_v47 }
 0x3d9   : > { %v3253_v19 = vadd.f32 %v3035_v18, %v559_v5  ;;  %3395 = vst [vmem:[%s5830_s9 + $0x108] sm:$0xff] %v3251_v48  ;;  %v567_v18 = vld [vmem:[%s5830_s9 + $0x158] sm:$0xff]  ;;  %v568_v48 = vld [vmem:[%s5830_s9 + $0x160] sm:$0xff] }
 0x3da   : > { %3396 = vst [vmem:[%s5830_s9 + $0x110] sm:$0xff] %v3252_v12  ;;  %v3039_v53 = vpop.f32.mrb[216].mxu1  ;;  %v2088_v25 = vpop.f32.mrb[24].mxu0 }
 0x3db   : > { %3397 = vst [vmem:[%s5830_s9 + $0x118] sm:$0xff] %v3253_v19  ;;  %v3040_v32 = vadd.f32 %v3039_v53, %v6819_v46  ;;  %v3254_v2 = vadd.f32 %v2088_v25, %v560_v54  ;;  %v3041_v24 = vpop.f32.mrb[217].mxu1  ;;  %v2090_v30 = vpop.f32.mrb[25].mxu0  ;;  %v570_v25 = vld [vmem:[%s5830_s9 + $0x170] sm:$0xff] }
 0x3dc   : > { %v3255_v17 = vadd.f32 %v2090_v30, %v561_v9 }
 0x3dd   : > { %v3256_v3 = vadd.f32 %v3040_v32, %v562_v28  ;;  %3398 = vst [vmem:[%s5830_s9 + $0x120] sm:$0xff] %v3254_v2  ;;  %v569_v28 = vld [vmem:[%s5830_s9 + $0x168] sm:$0xff]  ;;  %v571_v32 = vld [vmem:[%s5830_s9 + $0x178] sm:$0xff] }
 0x3de   : > { %3399 = vst [vmem:[%s5830_s9 + $0x128] sm:$0xff] %v3255_v17  ;;  %v3044_v4 = vpop.f32.mrb[218].mxu1  ;;  %v2094_v41 = vpop.f32.mrb[26].mxu0 }
 0x3df   : > { %3400 = vst [vmem:[%s5830_s9 + $0x130] sm:$0xff] %v3256_v3  ;;  %v3045_v46 = vadd.f32 %v3044_v4, %v6824_v60  ;;  %v3257_v37 = vadd.f32 %v2094_v41, %v563_v39  ;;  %v3046_v15 = vpop.f32.mrb[219].mxu1  ;;  %v2096_v47 = vpop.f32.mrb[27].mxu0  ;;  %v573_v4 = vld [vmem:[%s5830_s9 + $0x188] sm:$0xff]  ;;  %v574_v41 = vld [vmem:[%s5830_s9 + $0x190] sm:$0xff] }
 0x3e0   : > { %v3258_v5 = vadd.f32 %v2096_v47, %v564_v1  ;;  %v572_v1 = vld [vmem:[%s5830_s9 + $0x180] sm:$0xff] }
 0x3e1   : > { %v3259_v58 = vadd.f32 %v3045_v46, %v565_v42  ;;  %3401 = vst [vmem:[%s5830_s9 + $0x138] sm:$0xff] %v3257_v37 }
 0x3e2   : > { %3402 = vst [vmem:[%s5830_s9 + $0x140] sm:$0xff] %v3258_v5  ;;  %v3049_v8 = vpop.f32.mrb[220].mxu1  ;;  %v2100_v52 = vpop.f32.mrb[28].mxu0 }
 0x3e3   : > { %3403 = vst [vmem:[%s5830_s9 + $0x148] sm:$0xff] %v3259_v58  ;;  %v3050_v60 = vadd.f32 %v3049_v8, %v6829_v11  ;;  %v3260_v12 = vadd.f32 %v2100_v52, %v566_v56  ;;  %v3051_v54 = vpop.f32.mrb[221].mxu1  ;;  %v2102_v19 = vpop.f32.mrb[29].mxu0  ;;  %v575_v58 = vld [vmem:[%s5830_s9 + $0x198] sm:$0xff]  ;;  %v577_v8 = vld [vmem:[%s5830_s9 + $0x1a8] sm:$0xff] }
 0x3e4   : > { %v3261_v9 = vadd.f32 %v2102_v19, %v567_v18 }
 0x3e5   : > { %v3262_v53 = vadd.f32 %v3050_v60, %v568_v48  ;;  %3404 = vst [vmem:[%s5830_s9 + $0x150] sm:$0xff] %v3260_v12  ;;  %v576_v48 = vld [vmem:[%s5830_s9 + $0x1a0] sm:$0xff] }
 0x3e6   : > { %3405 = vst [vmem:[%s5830_s9 + $0x158] sm:$0xff] %v3261_v9  ;;  %v3054_v2 = vpop.f32.mrb[222].mxu1  ;;  %v2106_v24 = vpop.f32.mrb[30].mxu0 }
 0x3e7   : > { %3406 = vst [vmem:[%s5830_s9 + $0x160] sm:$0xff] %v3262_v53  ;;  %v3055_v11 = vadd.f32 %v3054_v2, %v6834_v23  ;;  %v3263_v30 = vadd.f32 %v2106_v24, %v569_v28  ;;  %v3056_v17 = vpop.f32.mrb[223].mxu1  ;;  %v2108_v39 = vpop.f32.mrb[31].mxu0  ;;  %v578_v28 = vld [vmem:[%s5830_s9 + $0x1b0] sm:$0xff] }
 0x3e8   : > { %v3264_v3 = vadd.f32 %v2108_v39, %v570_v25  ;;  %v579_v25 = vld [vmem:[%s5830_s9 + $0x1b8] sm:$0xff] }
 0x3e9   : > { %v3265_v42 = vadd.f32 %v3055_v11, %v571_v32  ;;  %3407 = vst [vmem:[%s5830_s9 + $0x168] sm:$0xff] %v3263_v30  ;;  %v580_v32 = vld [vmem:[%s5830_s9 + $0x1c0] sm:$0xff] }
 0x3ea   : > { %3408 = vst [vmem:[%s5830_s9 + $0x170] sm:$0xff] %v3264_v3  ;;  %v3059_v46 = vpop.f32.mrb[224].mxu1  ;;  %v2112_v37 = vpop.f32.mrb[32].mxu0  ;;  %v581_v3 = vld [vmem:[%s5830_s9 + $0x1c8] sm:$0xff] }
 0x3eb   : > { %3409 = vst [vmem:[%s5830_s9 + $0x178] sm:$0xff] %v3265_v42  ;;  %v3060_v23 = vadd.f32 %v3059_v46, %v6839_v27  ;;  %v3266_v15 = vadd.f32 %v2112_v37, %v572_v1  ;;  %v3061_v47 = vpop.f32.mrb[225].mxu1  ;;  %v2114_v5 = vpop.f32.mrb[33].mxu0  ;;  %v582_v42 = vld [vmem:[%s5830_s9 + $0x1d0] sm:$0xff] }
 0x3ec   : > { %v3267_v56 = vadd.f32 %v2114_v5, %v573_v4  ;;  %v583_v4 = vld [vmem:[%s5830_s9 + $0x1d8] sm:$0xff]  ;;  %v584_v5 = vld [vmem:[%s5830_s9 + $0x1e0] sm:$0xff] }
 0x3ed   : > { %v3268_v18 = vadd.f32 %v3060_v23, %v574_v41  ;;  %3410 = vst [vmem:[%s5830_s9 + $0x180] sm:$0xff] %v3266_v15 }
 0x3ee   : > { %3411 = vst [vmem:[%s5830_s9 + $0x188] sm:$0xff] %v3267_v56  ;;  %v3064_v52 = vpop.f32.mrb[226].mxu1  ;;  %v2118_v60 = vpop.f32.mrb[34].mxu0 }
 0x3ef   : > { %3412 = vst [vmem:[%s5830_s9 + $0x190] sm:$0xff] %v3268_v18  ;;  %v3065_v27 = vadd.f32 %v3064_v52, %v6844_v31  ;;  %v3269_v12 = vadd.f32 %v2118_v60, %v575_v58  ;;  %v3066_v54 = vpop.f32.mrb[227].mxu1  ;;  %v2120_v19 = vpop.f32.mrb[35].mxu0  ;;  %v585_v58 = vld [vmem:[%s5830_s9 + $0x1e8] sm:$0xff]  ;;  %v586_v18 = vld [vmem:[%s5830_s9 + $0x1f0] sm:$0xff] }
 0x3f0   : > { %v3270_v9 = vadd.f32 %v2120_v19, %v576_v48  ;;  %v587_v54 = vld [vmem:[%s5830_s9 + $0x1f8] sm:$0xff] }
 0x3f1   : > { %v3271_v53 = vadd.f32 %v3065_v27, %v577_v8  ;;  %3413 = vst [vmem:[%s5830_s9 + $0x198] sm:$0xff] %v3269_v12 }
 0x3f2   : > { %3414 = vst [vmem:[%s5830_s9 + $0x1a0] sm:$0xff] %v3270_v9  ;;  %v3069_v2 = vpop.f32.mrb[228].mxu1  ;;  %v2124_v24 = vpop.f32.mrb[36].mxu0  ;;  %v588_v9 = vld [vmem:[%s5830_s9 + $0x200] sm:$0xff] }
 0x3f3   : > { %3415 = vst [vmem:[%s5830_s9 + $0x1a8] sm:$0xff] %v3271_v53  ;;  %v3070_v31 = vadd.f32 %v3069_v2, %v6849_v36  ;;  %v3272_v11 = vadd.f32 %v2124_v24, %v578_v28  ;;  %v3071_v30 = vpop.f32.mrb[229].mxu1  ;;  %v2126_v17 = vpop.f32.mrb[37].mxu0  ;;  %v589_v28 = vld [vmem:[%s5830_s9 + $0x208] sm:$0xff] }
 0x3f4   : > { %v3273_v39 = vadd.f32 %v2126_v17, %v579_v25  ;;  %v591_v17 = vld [vmem:[%s5830_s9 + $0x218] sm:$0xff] }
 0x3f5   : > { %v3274_v1 = vadd.f32 %v3070_v31, %v580_v32  ;;  %3416 = vst [vmem:[%s5830_s9 + $0x1b0] sm:$0xff] %v3272_v11  ;;  %v590_v11 = vld [vmem:[%s5830_s9 + $0x210] sm:$0xff] }
 0x3f6   : > { %3417 = vst [vmem:[%s5830_s9 + $0x1b8] sm:$0xff] %v3273_v39  ;;  %v3074_v41 = vpop.f32.mrb[230].mxu1  ;;  %v2130_v46 = vpop.f32.mrb[38].mxu0  ;;  %v592_v39 = vld [vmem:[%s5830_s9 + $0x220] sm:$0xff] }
 0x3f7   : > { %3418 = vst [vmem:[%s5830_s9 + $0x1c0] sm:$0xff] %v3274_v1  ;;  %v3075_v36 = vadd.f32 %v3074_v41, %v6854_v40  ;;  %v3275_v37 = vadd.f32 %v2130_v46, %v581_v3  ;;  %v3076_v23 = vpop.f32.mrb[231].mxu1  ;;  %v2132_v15 = vpop.f32.mrb[39].mxu0 }
 0x3f8   : > { %v3276_v47 = vadd.f32 %v2132_v15, %v582_v42  ;;  %v594_v23 = vld [vmem:[%s5830_s9 + $0x230] sm:$0xff]  ;;  %v595_v15 = vld [vmem:[%s5830_s9 + $0x238] sm:$0xff] }
 0x3f9   : > { %v3277_v56 = vadd.f32 %v3075_v36, %v583_v4  ;;  %3419 = vst [vmem:[%s5830_s9 + $0x1c8] sm:$0xff] %v3275_v37  ;;  %v593_v36 = vld [vmem:[%s5830_s9 + $0x228] sm:$0xff] }
 0x3fa   : > { %3420 = vst [vmem:[%s5830_s9 + $0x1d0] sm:$0xff] %v3276_v47  ;;  %v3079_v48 = vpop.f32.mrb[232].mxu1  ;;  %v2136_v8 = vpop.f32.mrb[40].mxu0 }
 0x3fb   : > { %3421 = vst [vmem:[%s5830_s9 + $0x1d8] sm:$0xff] %v3277_v56  ;;  %v3080_v40 = vadd.f32 %v3079_v48, %v6859_v45  ;;  %v3278_v52 = vadd.f32 %v2136_v8, %v584_v5  ;;  %v3081_v60 = vpop.f32.mrb[233].mxu1  ;;  %v2138_v27 = vpop.f32.mrb[41].mxu0  ;;  %v596_v8 = vld [vmem:[%s5830_s9 + $0x240] sm:$0xff] }
 0x3fc   : > { %v3279_v12 = vadd.f32 %v2138_v27, %v585_v58  ;;  %v598_v60 = vld [vmem:[%s5830_s9 + $0x250] sm:$0xff] }
 0x3fd   : > { %v3280_v19 = vadd.f32 %v3080_v40, %v586_v18  ;;  %3422 = vst [vmem:[%s5830_s9 + $0x1e0] sm:$0xff] %v3278_v52  ;;  %v597_v52 = vld [vmem:[%s5830_s9 + $0x248] sm:$0xff] }
 0x3fe   : > { %3423 = vst [vmem:[%s5830_s9 + $0x1e8] sm:$0xff] %v3279_v12  ;;  %v3084_v53 = vpop.f32.mrb[234].mxu1  ;;  %v2142_v25 = vpop.f32.mrb[42].mxu0 }
 0x3ff   : > { %3424 = vst [vmem:[%s5830_s9 + $0x1f0] sm:$0xff] %v3280_v19  ;;  %v3085_v45 = vadd.f32 %v3084_v53, %v6864_v50  ;;  %v3281_v32 = vadd.f32 %v2142_v25, %v587_v54  ;;  %v3086_v2 = vpop.f32.mrb[235].mxu1  ;;  %v2144_v24 = vpop.f32.mrb[43].mxu0  ;;  %v599_v53 = vld [vmem:[%s5830_s9 + $0x258] sm:$0xff] }
 0x400   : > { %v3282_v31 = vadd.f32 %v2144_v24, %v588_v9 }
 0x401   : > { %v3283_v30 = vadd.f32 %v3085_v45, %v589_v28  ;;  %3425 = vst [vmem:[%s5830_s9 + $0x1f8] sm:$0xff] %v3281_v32  ;;  %v600_v45 = vld [vmem:[%s5830_s9 + $0x260] sm:$0xff]  ;;  %v601_v32 = vld [vmem:[%s5830_s9 + $0x268] sm:$0xff] }
 0x402   : > { %3426 = vst [vmem:[%s5830_s9 + $0x200] sm:$0xff] %v3282_v31  ;;  %v3089_v3 = vpop.f32.mrb[236].mxu1  ;;  %v2148_v1 = vpop.f32.mrb[44].mxu0 }
 0x403   : > { %3427 = vst [vmem:[%s5830_s9 + $0x208] sm:$0xff] %v3283_v30  ;;  %v3090_v50 = vadd.f32 %v3089_v3, %v6869_v55  ;;  %v3284_v42 = vadd.f32 %v2148_v1, %v590_v11  ;;  %v3091_v4 = vpop.f32.mrb[237].mxu1  ;;  %v2150_v41 = vpop.f32.mrb[45].mxu0  ;;  %v603_v1 = vld [vmem:[%s5830_s9 + $0x278] sm:$0xff] }
 0x404   : > { %v3285_v46 = vadd.f32 %v2150_v41, %v591_v17 }
 0x405   : > { %v3286_v37 = vadd.f32 %v3090_v50, %v592_v39  ;;  %3428 = vst [vmem:[%s5830_s9 + $0x210] sm:$0xff] %v3284_v42  ;;  %v602_v39 = vld [vmem:[%s5830_s9 + $0x270] sm:$0xff]  ;;  %v604_v50 = vld [vmem:[%s5830_s9 + $0x280] sm:$0xff] }
 0x406   : > { %3429 = vst [vmem:[%s5830_s9 + $0x218] sm:$0xff] %v3285_v46  ;;  %v3094_v47 = vpop.f32.mrb[238].mxu1  ;;  %v2154_v5 = vpop.f32.mrb[46].mxu0 }
 0x407   : > { %3430 = vst [vmem:[%s5830_s9 + $0x220] sm:$0xff] %v3286_v37  ;;  %v3095_v55 = vadd.f32 %v3094_v47, %v6874_v59  ;;  %v3287_v56 = vadd.f32 %v2154_v5, %v593_v36  ;;  %v3096_v58 = vpop.f32.mrb[239].mxu1  ;;  %v2156_v18 = vpop.f32.mrb[47].mxu0  ;;  %v606_v47 = vld [vmem:[%s5830_s9 + $0x290] sm:$0xff]  ;;  %v607_v5 = vld [vmem:[%s5830_s9 + $0x298] sm:$0xff] }
 0x408   : > { %v3288_v48 = vadd.f32 %v2156_v18, %v594_v23  ;;  %v605_v23 = vld [vmem:[%s5830_s9 + $0x288] sm:$0xff] }
 0x409   : > { %v3289_v40 = vadd.f32 %v3095_v55, %v595_v15  ;;  %3431 = vst [vmem:[%s5830_s9 + $0x228] sm:$0xff] %v3287_v56 }
 0x40a   : > { %3432 = vst [vmem:[%s5830_s9 + $0x230] sm:$0xff] %v3288_v48  ;;  %v3099_v27 = vpop.f32.mrb[240].mxu1  ;;  %v2160_v12 = vpop.f32.mrb[48].mxu0 }
 0x40b   : > { %3433 = vst [vmem:[%s5830_s9 + $0x238] sm:$0xff] %v3289_v40  ;;  %v3100_v59 = vadd.f32 %v3099_v27, %v6879_v0  ;;  %v3290_v54 = vadd.f32 %v2160_v12, %v596_v8  ;;  %v3101_v19 = vpop.f32.mrb[241].mxu1  ;;  %v2162_v9 = vpop.f32.mrb[49].mxu0  ;;  %v608_v40 = vld [vmem:[%s5830_s9 + $0x2a0] sm:$0xff]  ;;  %v610_v27 = vld [vmem:[%s5830_s9 + $0x2b0] sm:$0xff] }
 0x40c   : > { %v3291_v28 = vadd.f32 %v2162_v9, %v597_v52 }
 0x40d   : > { %v3292_v25 = vadd.f32 %v3100_v59, %v598_v60  ;;  %3434 = vst [vmem:[%s5830_s9 + $0x240] sm:$0xff] %v3290_v54  ;;  %v609_v60 = vld [vmem:[%s5830_s9 + $0x2a8] sm:$0xff] }
 0x40e   : > { %3435 = vst [vmem:[%s5830_s9 + $0x248] sm:$0xff] %v3291_v28  ;;  %v3104_v2 = vpop.f32.mrb[242].mxu1  ;;  %v2166_v24 = vpop.f32.mrb[50].mxu0 }
 0x40f   : > { %3436 = vst [vmem:[%s5830_s9 + $0x250] sm:$0xff] %v3292_v25  ;;  %v3105_v0 = vadd.f32 %v3104_v2, %v6884_v6  ;;  %v3293_v31 = vadd.f32 %v2166_v24, %v599_v53  ;;  %v3106_v11 = vpop.f32.mrb[243].mxu1  ;;  %v2168_v30 = vpop.f32.mrb[51].mxu0  ;;  %v611_v53 = vld [vmem:[%s5830_s9 + $0x2b8] sm:$0xff] }
 0x410   : > { %v3294_v17 = vadd.f32 %v2168_v30, %v600_v45  ;;  %v612_v45 = vld [vmem:[%s5830_s9 + $0x2c0] sm:$0xff] }
 0x411   : > { %v3295_v3 = vadd.f32 %v3105_v0, %v601_v32  ;;  %3437 = vst [vmem:[%s5830_s9 + $0x258] sm:$0xff] %v3293_v31  ;;  %v613_v32 = vld [vmem:[%s5830_s9 + $0x2c8] sm:$0xff] }
 0x412   : > { %3438 = vst [vmem:[%s5830_s9 + $0x260] sm:$0xff] %v3294_v17  ;;  %v3109_v42 = vpop.f32.mrb[244].mxu1  ;;  %v2172_v4 = vpop.f32.mrb[52].mxu0  ;;  %v614_v17 = vld [vmem:[%s5830_s9 + $0x2d0] sm:$0xff] }
 0x413   : > { %3439 = vst [vmem:[%s5830_s9 + $0x268] sm:$0xff] %v3295_v3  ;;  %v3110_v6 = vadd.f32 %v3109_v42, %v6889_v10  ;;  %v3296_v41 = vadd.f32 %v2172_v4, %v602_v39  ;;  %v3111_v46 = vpop.f32.mrb[245].mxu1  ;;  %v2174_v36 = vpop.f32.mrb[53].mxu0  ;;  %v615_v3 = vld [vmem:[%s5830_s9 + $0x2d8] sm:$0xff] }
 0x414   : > { %v3297_v37 = vadd.f32 %v2174_v36, %v603_v1  ;;  %v616_v1 = vld [vmem:[%s5830_s9 + $0x2e0] sm:$0xff]  ;;  %v617_v36 = vld [vmem:[%s5830_s9 + $0x2e8] sm:$0xff] }
 0x415   : > { %v3298_v15 = vadd.f32 %v3110_v6, %v604_v50  ;;  %3440 = vst [vmem:[%s5830_s9 + $0x270] sm:$0xff] %v3296_v41 }
 0x416   : > { %3441 = vst [vmem:[%s5830_s9 + $0x278] sm:$0xff] %v3297_v37  ;;  %v3114_v55 = vpop.f32.mrb[246].mxu1  ;;  %v2178_v56 = vpop.f32.mrb[54].mxu0 }
 0x417   : > { %3442 = vst [vmem:[%s5830_s9 + $0x280] sm:$0xff] %v3298_v15  ;;  %v3115_v10 = vadd.f32 %v3114_v55, %v6894_v16  ;;  %v3299_v58 = vadd.f32 %v2178_v56, %v605_v23  ;;  %v3116_v18 = vpop.f32.mrb[247].mxu1  ;;  %v2180_v48 = vpop.f32.mrb[55].mxu0  ;;  %v618_v23 = vld [vmem:[%s5830_s9 + $0x2f0] sm:$0xff]  ;;  %v619_v15 = vld [vmem:[%s5830_s9 + $0x2f8] sm:$0xff] }
 0x418   : > { %v3300_v8 = vadd.f32 %v2180_v48, %v606_v47  ;;  %v620_v18 = vld [vmem:[%s5830_s9 + $0x300] sm:$0xff] }
 0x419   : > { %v3301_v52 = vadd.f32 %v3115_v10, %v607_v5  ;;  %3443 = vst [vmem:[%s5830_s9 + $0x288] sm:$0xff] %v3299_v58 }
 0x41a   : > { %3444 = vst [vmem:[%s5830_s9 + $0x290] sm:$0xff] %v3300_v8  ;;  %v3119_v12 = vpop.f32.mrb[248].mxu1  ;;  %v2184_v59 = vpop.f32.mrb[56].mxu0  ;;  %v621_v8 = vld [vmem:[%s5830_s9 + $0x308] sm:$0xff] }
 0x41b   : > { %3445 = vst [vmem:[%s5830_s9 + $0x298] sm:$0xff] %v3301_v52  ;;  %v3120_v16 = vadd.f32 %v3119_v12, %v6899_v21  ;;  %v3302_v54 = vadd.f32 %v2184_v59, %v608_v40  ;;  %v3121_v19 = vpop.f32.mrb[249].mxu1  ;;  %v2186_v9 = vpop.f32.mrb[57].mxu0  ;;  %v622_v40 = vld [vmem:[%s5830_s9 + $0x310] sm:$0xff] }
 0x41c   : > { %v3303_v28 = vadd.f32 %v2186_v9, %v609_v60  ;;  %v624_v9 = vld [vmem:[%s5830_s9 + $0x320] sm:$0xff] }
 0x41d   : > { %v3304_v25 = vadd.f32 %v3120_v16, %v610_v27  ;;  %3446 = vst [vmem:[%s5830_s9 + $0x2a0] sm:$0xff] %v3302_v54  ;;  %v623_v54 = vld [vmem:[%s5830_s9 + $0x318] sm:$0xff] }
 0x41e   : > { %3447 = vst [vmem:[%s5830_s9 + $0x2a8] sm:$0xff] %v3303_v28  ;;  %v3124_v2 = vpop.f32.mrb[250].mxu1  ;;  %v2190_v24 = vpop.f32.mrb[58].mxu0  ;;  %v625_v28 = vld [vmem:[%s5830_s9 + $0x328] sm:$0xff] }
 0x41f   : > { %3448 = vst [vmem:[%s5830_s9 + $0x2b0] sm:$0xff] %v3304_v25  ;;  %v3125_v21 = vadd.f32 %v3124_v2, %v6904_v26  ;;  %v3305_v0 = vadd.f32 %v2190_v24, %v611_v53  ;;  %v3126_v31 = vpop.f32.mrb[251].mxu1  ;;  %v2192_v11 = vpop.f32.mrb[59].mxu0 }
 0x420   : > { %v3306_v30 = vadd.f32 %v2192_v11, %v612_v45  ;;  %v627_v31 = vld [vmem:[%s5830_s9 + $0x338] sm:$0xff]  ;;  %v628_v11 = vld [vmem:[%s5830_s9 + $0x340] sm:$0xff] }
 0x421   : > { %v3307_v39 = vadd.f32 %v3125_v21, %v613_v32  ;;  %3449 = vst [vmem:[%s5830_s9 + $0x2b8] sm:$0xff] %v3305_v0  ;;  %v626_v21 = vld [vmem:[%s5830_s9 + $0x330] sm:$0xff] }
 0x422   : > { %3450 = vst [vmem:[%s5830_s9 + $0x2c0] sm:$0xff] %v3306_v30  ;;  %v3129_v50 = vpop.f32.mrb[252].mxu1  ;;  %v2196_v42 = vpop.f32.mrb[60].mxu0 }
 0x423   : > { %3451 = vst [vmem:[%s5830_s9 + $0x2c8] sm:$0xff] %v3307_v39  ;;  %v3130_v26 = vadd.f32 %v3129_v50, %v6909_v33  ;;  %v3308_v4 = vadd.f32 %v2196_v42, %v614_v17  ;;  %v3131_v6 = vpop.f32.mrb[253].mxu1  ;;  %v2198_v41 = vpop.f32.mrb[61].mxu0  ;;  %v629_v42 = vld [vmem:[%s5830_s9 + $0x348] sm:$0xff] }
 0x424   : > { %v3309_v46 = vadd.f32 %v2198_v41, %v615_v3  ;;  %v631_v6 = vld [vmem:[%s5830_s9 + $0x358] sm:$0xff] }
 0x425   : > { %v3310_v37 = vadd.f32 %v3130_v26, %v616_v1  ;;  %3452 = vst [vmem:[%s5830_s9 + $0x2d0] sm:$0xff] %v3308_v4  ;;  %v630_v4 = vld [vmem:[%s5830_s9 + $0x350] sm:$0xff] }
 0x426   : > { %3453 = vst [vmem:[%s5830_s9 + $0x2d8] sm:$0xff] %v3309_v46  ;;  %v3134_v47 = vpop.f32.mrb[254].mxu1  ;;  %v2202_v5 = vpop.f32.mrb[62].mxu0 }
 0x427   : > { %3454 = vst [vmem:[%s5830_s9 + $0x2e0] sm:$0xff] %v3310_v37  ;;  %v3135_v33 = vadd.f32 %v3134_v47, %v6914_v38  ;;  %v3311_v55 = vadd.f32 %v2202_v5, %v617_v36  ;;  %v3136_v56 = vpop.f32.mrb[255].mxu1  ;;  %v2204_v10 = vpop.f32.mrb[63].mxu0  ;;  %v632_v47 = vld [vmem:[%s5830_s9 + $0x360] sm:$0xff] }
 0x428   : > { %v3312_v58 = vadd.f32 %v2204_v10, %v618_v23 }
 0x429   : > { %v3313_v48 = vadd.f32 %v3135_v33, %v619_v15  ;;  %3455 = vst [vmem:[%s5830_s9 + $0x2e8] sm:$0xff] %v3311_v55  ;;  %v633_v33 = vld [vmem:[%s5830_s9 + $0x368] sm:$0xff]  ;;  %v634_v55 = vld [vmem:[%s5830_s9 + $0x370] sm:$0xff] }
 0x42a   : > { %3456 = vst [vmem:[%s5830_s9 + $0x2f0] sm:$0xff] %v3312_v58  ;;  %v3139_v52 = vpop.f32.mrb[0].mxu1  ;;  %v2208_v60 = vpop.f32.mrb[64].mxu0 }
 0x42b   : > { %3457 = vst [vmem:[%s5830_s9 + $0x2f8] sm:$0xff] %v3313_v48  ;;  %v3140_v38 = vadd.f32 %v3139_v52, %v6919_v44  ;;  %v3314_v27 = vadd.f32 %v2208_v60, %v620_v18  ;;  %v3141_v12 = vpop.f32.mrb[1].mxu1  ;;  %v2210_v59 = vpop.f32.mrb[65].mxu0  ;;  %v636_v60 = vld [vmem:[%s5830_s9 + $0x380] sm:$0xff] }
 0x42c   : > { %v3315_v16 = vadd.f32 %v2210_v59, %v621_v8 }
 0x42d   : > { %v3316_v19 = vadd.f32 %v3140_v38, %v622_v40  ;;  %3458 = vst [vmem:[%s5830_s9 + $0x300] sm:$0xff] %v3314_v27  ;;  %v635_v40 = vld [vmem:[%s5830_s9 + $0x378] sm:$0xff]  ;;  %v637_v38 = vld [vmem:[%s5830_s9 + $0x388] sm:$0xff] }
 0x42e   : > { %3459 = vst [vmem:[%s5830_s9 + $0x308] sm:$0xff] %v3315_v16  ;;  %v3144_v53 = vpop.f32.mrb[2].mxu1  ;;  %v2214_v25 = vpop.f32.mrb[66].mxu0 }
 0x42f   : > { %3460 = vst [vmem:[%s5830_s9 + $0x310] sm:$0xff] %v3316_v19  ;;  %v3145_v44 = vadd.f32 %v3144_v53, %v6924_v51  ;;  %v3317_v45 = vadd.f32 %v2214_v25, %v623_v54  ;;  %v3146_v32 = vpop.f32.mrb[3].mxu1  ;;  %v2216_v2 = vpop.f32.mrb[67].mxu0  ;;  %v639_v53 = vld [vmem:[%s5830_s9 + $0x398] sm:$0xff]  ;;  %v640_v25 = vld [vmem:[%s5830_s9 + $0x3a0] sm:$0xff] }
 0x430   : > { %v3318_v24 = vadd.f32 %v2216_v2, %v624_v9  ;;  %v638_v9 = vld [vmem:[%s5830_s9 + $0x390] sm:$0xff] }
 0x431   : > { %v3319_v0 = vadd.f32 %v3145_v44, %v625_v28  ;;  %3461 = vst [vmem:[%s5830_s9 + $0x318] sm:$0xff] %v3317_v45 }
 0x432   : > { %3462 = vst [vmem:[%s5830_s9 + $0x320] sm:$0xff] %v3318_v24  ;;  %v3149_v30 = vpop.f32.mrb[4].mxu1  ;;  %v2220_v17 = vpop.f32.mrb[68].mxu0 }
 0x433   : > { %3463 = vst [vmem:[%s5830_s9 + $0x328] sm:$0xff] %v3319_v0  ;;  %v3150_v51 = vadd.f32 %v3149_v30, %v6929_v57  ;;  %v3320_v39 = vadd.f32 %v2220_v17, %v626_v21  ;;  %v3151_v3 = vpop.f32.mrb[5].mxu1  ;;  %v2222_v1 = vpop.f32.mrb[69].mxu0  ;;  %v641_v0 = vld [vmem:[%s5830_s9 + $0x3a8] sm:$0xff]  ;;  %v643_v30 = vld [vmem:[%s5830_s9 + $0x3b8] sm:$0xff] }
 0x434   : > { %v3321_v50 = vadd.f32 %v2222_v1, %v627_v31 }
 0x435   : > { %v3322_v26 = vadd.f32 %v3150_v51, %v628_v11  ;;  %3464 = vst [vmem:[%s5830_s9 + $0x330] sm:$0xff] %v3320_v39  ;;  %v642_v11 = vld [vmem:[%s5830_s9 + $0x3b0] sm:$0xff] }
 0x436   : > { %3465 = vst [vmem:[%s5830_s9 + $0x338] sm:$0xff] %v3321_v50  ;;  %v3154_v41 = vpop.f32.mrb[6].mxu1  ;;  %v2226_v46 = vpop.f32.mrb[70].mxu0 }
 0x437   : > { %3466 = vst [vmem:[%s5830_s9 + $0x340] sm:$0xff] %v3322_v26  ;;  %v3155_v57 = vadd.f32 %v3154_v41, %v6934_v63  ;;  %v3323_v36 = vadd.f32 %v2226_v46, %v629_v42  ;;  %v3156_v37 = vpop.f32.mrb[7].mxu1  ;;  %v2228_v23 = vpop.f32.mrb[71].mxu0  ;;  %v644_v42 = vld [vmem:[%s5830_s9 + $0x3c0] sm:$0xff] }
 0x438   : > { %v3324_v15 = vadd.f32 %v2228_v23, %v630_v4  ;;  %v645_v4 = vld [vmem:[%s5830_s9 + $0x3c8] sm:$0xff] }
 0x439   : > { %v3325_v5 = vadd.f32 %v3155_v57, %v631_v6  ;;  %3467 = vst [vmem:[%s5830_s9 + $0x348] sm:$0xff] %v3323_v36  ;;  %v646_v6 = vld [vmem:[%s5830_s9 + $0x3d0] sm:$0xff] }
 0x43a   : > { %3468 = vst [vmem:[%s5830_s9 + $0x350] sm:$0xff] %v3324_v15  ;;  %v3159_v56 = vpop.f32.mrb[8].mxu1  ;;  %v2232_v10 = vpop.f32.mrb[72].mxu0  ;;  %v647_v15 = vld [vmem:[%s5830_s9 + $0x3d8] sm:$0xff] }
 0x43b   : > { %3469 = vst [vmem:[%s5830_s9 + $0x358] sm:$0xff] %v3325_v5  ;;  %v3160_v63 = vadd.f32 %v3159_v56, %v6939_v7  ;;  %v3326_v58 = vadd.f32 %v2232_v10, %v632_v47  ;;  %v3161_v18 = vpop.f32.mrb[9].mxu1  ;;  %v2234_v48 = vpop.f32.mrb[73].mxu0  ;;  %v648_v5 = vld [vmem:[%s5830_s9 + $0x3e0] sm:$0xff] }
 0x43c   : > { %v3327_v8 = vadd.f32 %v2234_v48, %v633_v33  ;;  %v649_v33 = vld [vmem:[%s5830_s9 + $0x3e8] sm:$0xff]  ;;  %v650_v48 = vld [vmem:[%s5830_s9 + $0x3f0] sm:$0xff] }
 0x43d   : > { %v3328_v52 = vadd.f32 %v3160_v63, %v634_v55  ;;  %3470 = vst [vmem:[%s5830_s9 + $0x360] sm:$0xff] %v3326_v58 }
 0x43e   : > { %3471 = vst [vmem:[%s5830_s9 + $0x368] sm:$0xff] %v3327_v8  ;;  %v3164_v27 = vpop.f32.mrb[10].mxu1  ;;  %v2238_v12 = vpop.f32.mrb[74].mxu0 }
 0x43f   : > { %3472 = vst [vmem:[%s5830_s9 + $0x370] sm:$0xff] %v3328_v52  ;;  %v3165_v7 = vadd.f32 %v3164_v27, %v6944_v13  ;;  %v3329_v59 = vadd.f32 %v2238_v12, %v635_v40  ;;  %v3166_v16 = vpop.f32.mrb[11].mxu1  ;;  %v2240_v54 = vpop.f32.mrb[75].mxu0  ;;  %v651_v40 = vld [vmem:[%s5830_s9 + $0x3f8] sm:$0xff]  ;;  %v652_v52 = vld [vmem:[%s5830_s9 + $0x400] sm:$0xff] }
 0x440   : > { %v3330_v19 = vadd.f32 %v2240_v54, %v636_v60  ;;  %v653_v16 = vld [vmem:[%s5830_s9 + $0x408] sm:$0xff] }
 0x441   : > { %v3331_v28 = vadd.f32 %v3165_v7, %v637_v38  ;;  %3473 = vst [vmem:[%s5830_s9 + $0x378] sm:$0xff] %v3329_v59 }
 0x442   : > { %3474 = vst [vmem:[%s5830_s9 + $0x380] sm:$0xff] %v3330_v19  ;;  %v3169_v44 = vpop.f32.mrb[12].mxu1  ;;  %v2244_v45 = vpop.f32.mrb[76].mxu0  ;;  %v654_v19 = vld [vmem:[%s5830_s9 + $0x410] sm:$0xff] }
 0x443   : > { %3475 = vst [vmem:[%s5830_s9 + $0x388] sm:$0xff] %v3331_v28  ;;  %v3170_v13 = vadd.f32 %v3169_v44, %v6949_v20  ;;  %v3332_v32 = vadd.f32 %v2244_v45, %v638_v9  ;;  %v3171_v2 = vpop.f32.mrb[13].mxu1  ;;  %v2246_v24 = vpop.f32.mrb[77].mxu0  ;;  %v655_v9 = vld [vmem:[%s5830_s9 + $0x418] sm:$0xff] }
 0x444   : > { %v3333_v21 = vadd.f32 %v2246_v24, %v639_v53  ;;  %v657_v24 = vld [vmem:[%s5830_s9 + $0x428] sm:$0xff] }
 0x445   : > { %v3334_v31 = vadd.f32 %v3170_v13, %v640_v25  ;;  %3476 = vst [vmem:[%s5830_s9 + $0x390] sm:$0xff] %v3332_v32  ;;  %v656_v32 = vld [vmem:[%s5830_s9 + $0x420] sm:$0xff] }
 0x446   : > { %3477 = vst [vmem:[%s5830_s9 + $0x398] sm:$0xff] %v3333_v21  ;;  %v3174_v17 = vpop.f32.mrb[14].mxu1  ;;  %v2250_v51 = vpop.f32.mrb[78].mxu0  ;;  %v658_v21 = vld [vmem:[%s5830_s9 + $0x430] sm:$0xff] }
 0x447   : > { %3478 = vst [vmem:[%s5830_s9 + $0x3a0] sm:$0xff] %v3334_v31  ;;  %v3175_v20 = vadd.f32 %v3174_v17, %v6954_v29  ;;  %v3335_v39 = vadd.f32 %v2250_v51, %v641_v0  ;;  %v3176_v3 = vpop.f32.mrb[15].mxu1  ;;  %v2252_v1 = vpop.f32.mrb[79].mxu0 }
 0x448   : > { %v3336_v50 = vadd.f32 %v2252_v1, %v642_v11  ;;  %v660_v3 = vld [vmem:[%s5830_s9 + $0x440] sm:$0xff]  ;;  %v661_v1 = vld [vmem:[%s5830_s9 + $0x448] sm:$0xff] }
 0x449   : > { %v3337_v26 = vadd.f32 %v3175_v20, %v643_v30  ;;  %3479 = vst [vmem:[%s5830_s9 + $0x3a8] sm:$0xff] %v3335_v39  ;;  %v659_v20 = vld [vmem:[%s5830_s9 + $0x438] sm:$0xff] }
 0x44a   : > { %3480 = vst [vmem:[%s5830_s9 + $0x3b0] sm:$0xff] %v3336_v50  ;;  %v3179_v41 = vpop.f32.mrb[16].mxu1  ;;  %v2256_v46 = vpop.f32.mrb[80].mxu0 }
 0x44b   : > { %3481 = vst [vmem:[%s5830_s9 + $0x3b8] sm:$0xff] %v3337_v26  ;;  %v3180_v29 = vadd.f32 %v3179_v41, %v6959_v35  ;;  %v3338_v57 = vadd.f32 %v2256_v46, %v644_v42  ;;  %v3181_v36 = vpop.f32.mrb[17].mxu1  ;;  %v2258_v37 = vpop.f32.mrb[81].mxu0  ;;  %v662_v46 = vld [vmem:[%s5830_s9 + $0x450] sm:$0xff] }
 0x44c   : > { %v3339_v23 = vadd.f32 %v2258_v37, %v645_v4  ;;  %v664_v36 = vld [vmem:[%s5830_s9 + $0x460] sm:$0xff] }
 0x44d   : > { %v3340_v47 = vadd.f32 %v3180_v29, %v646_v6  ;;  %3482 = vst [vmem:[%s5830_s9 + $0x3c0] sm:$0xff] %v3338_v57  ;;  %v663_v57 = vld [vmem:[%s5830_s9 + $0x458] sm:$0xff] }
 0x44e   : > { %3483 = vst [vmem:[%s5830_s9 + $0x3c8] sm:$0xff] %v3339_v23  ;;  %v3184_v55 = vpop.f32.mrb[18].mxu1  ;;  %v2262_v56 = vpop.f32.mrb[82].mxu0 }
 0x44f   : > { %3484 = vst [vmem:[%s5830_s9 + $0x3d0] sm:$0xff] %v3340_v47  ;;  %v3185_v35 = vadd.f32 %v3184_v55, %v6964_v43  ;;  %v3341_v10 = vadd.f32 %v2262_v56, %v647_v15  ;;  %v3186_v63 = vpop.f32.mrb[19].mxu1  ;;  %v2264_v58 = vpop.f32.mrb[83].mxu0  ;;  %v665_v55 = vld [vmem:[%s5830_s9 + $0x468] sm:$0xff] }
 0x450   : > { %v3342_v18 = vadd.f32 %v2264_v58, %v648_v5 }
 0x451   : > { %v3343_v8 = vadd.f32 %v3185_v35, %v649_v33  ;;  %3485 = vst [vmem:[%s5830_s9 + $0x3d8] sm:$0xff] %v3341_v10  ;;  %v666_v35 = vld [vmem:[%s5830_s9 + $0x470] sm:$0xff]  ;;  %v667_v10 = vld [vmem:[%s5830_s9 + $0x478] sm:$0xff] }
 0x452   : > { %3486 = vst [vmem:[%s5830_s9 + $0x3e0] sm:$0xff] %v3342_v18  ;;  %v3189_v60 = vpop.f32.mrb[20].mxu1  ;;  %v2268_v38 = vpop.f32.mrb[84].mxu0 }
 0x453   : > { %3487 = vst [vmem:[%s5830_s9 + $0x3e8] sm:$0xff] %v3343_v8  ;;  %v3190_v43 = vadd.f32 %v3189_v60, %v6968_v14  ;;  %v3344_v27 = vadd.f32 %v2268_v38, %v650_v48  ;;  %v3191_v12 = vpop.f32.mrb[21].mxu1  ;;  %v2270_v7 = vpop.f32.mrb[85].mxu0  ;;  %v3800_v60 = vlaneseq (!%p4439_p13)  ;;  %v3654_v38 = vld [vmem:[%s5816_s24] sm:$0x7] (!%p4439_p13) }
 0x454   : > { %v3345_v59 = vadd.f32 %v2270_v7, %v651_v40  ;;  %v3656_v12 = vld [vmem:[%s5824_s25 + $0x8] sm:$0xff] (!%p4439_p13) }
 0x455   : > { %v3346_v54 = vadd.f32 %v3190_v43, %v652_v52  ;;  %3488 = vst [vmem:[%s5830_s9 + $0x3f0] sm:$0xff] %v3344_v27  ;;  %v3655_v43 = vld [vmem:[%s5824_s25] sm:$0xff] (!%p4439_p13) }
 0x456   : > { %3489 = vst [vmem:[%s5830_s9 + $0x3f8] sm:$0xff] %v3345_v59  ;;  %v3194_v28 = vpop.f32.mrb[22].mxu1  ;;  %v2274_v53 = vpop.f32.mrb[86].mxu0  ;;  %v3657_v59 = vld [vmem:[%s5824_s25 + $0x10] sm:$0xff] (!%p4439_p13) }
 0x457   : > { %3490 = vst [vmem:[%s5830_s9 + $0x400] sm:$0xff] %v3346_v54  ;;  %v3195_v14 = vadd.f32 %v3194_v28, %v6971_v22  ;;  %v3347_v25 = vadd.f32 %v2274_v53, %v653_v16  ;;  %v3196_v44 = vpop.f32.mrb[23].mxu1  ;;  %v2276_v45 = vpop.f32.mrb[87].mxu0  ;;  %v3510_v54 = vld [vmem:[%s5830_s9] sm:$0xff] (!%p4439_p13)  ;;  %v3513_v28 = vld [vmem:[%s5830_s9 + $0x18] sm:$0xff] (!%p4439_p13) }
 0x458   : > { %v3348_v13 = vadd.f32 %v2276_v45, %v654_v19  ;;  %v3511_v19 = vld [vmem:[%s5830_s9 + $0x8] sm:$0xff] (!%p4439_p13)  ;;  %v3658_v53 = vld [vmem:[%s5824_s25 + $0x18] sm:$0xff] (!%p4439_p13) }
 0x459   : > { %v3349_v2 = vadd.f32 %v3195_v14, %v655_v9  ;;  %3491 = vst [vmem:[%s5830_s9 + $0x408] sm:$0xff] %v3347_v25  ;;  %v3512_v9 = vld [vmem:[%s5830_s9 + $0x10] sm:$0xff] (!%p4439_p13)  ;;  %v3659_v14 = vld [vmem:[%s5824_s25 + $0x20] sm:$0xff] (!%p4439_p13) }
 0x45a   : > { %3492 = vst [vmem:[%s5830_s9 + $0x410] sm:$0xff] %v3348_v13  ;;  %v3199_v0 = vpop.f32.mrb[24].mxu1  ;;  %v2280_v31 = vpop.f32.mrb[88].mxu0  ;;  %v3514_v13 = vld [vmem:[%s5830_s9 + $0x20] sm:$0xff] (!%p4439_p13) }
 0x45b   : > { %3493 = vst [vmem:[%s5830_s9 + $0x418] sm:$0xff] %v3349_v2  ;;  %v3200_v22 = vadd.f32 %v3199_v0, %v6974_v61  ;;  %v3350_v11 = vadd.f32 %v2280_v31, %v656_v32  ;;  %v3201_v30 = vpop.f32.mrb[25].mxu1  ;;  %v2282_v17 = vpop.f32.mrb[89].mxu0  ;;  %v3660_v32 = vld [vmem:[%s5824_s25 + $0x28] sm:$0xff] (!%p4439_p13)  ;;  %v3661_v2 = vld [vmem:[%s5824_s25 + $0x30] sm:$0xff] (!%p4439_p13)  ;;  %v3517_v31 = vld [vmem:[%s5830_s9 + $0x38] sm:$0xff] (!%p4439_p13) }
 0x45c   : > { %v3351_v51 = vadd.f32 %v2282_v17, %v657_v24  ;;  %v3662_v24 = vld [vmem:[%s5824_s25 + $0x38] sm:$0xff] (!%p4439_p13)  ;;  %v3516_v0 = vld [vmem:[%s5830_s9 + $0x30] sm:$0xff] (!%p4439_p13) }
 0x45d   : > { %v3352_v39 = vadd.f32 %v3200_v22, %v658_v21  ;;  %3494 = vst [vmem:[%s5830_s9 + $0x420] sm:$0xff] %v3350_v11  ;;  %v3515_v21 = vld [vmem:[%s5830_s9 + $0x28] sm:$0xff] (!%p4439_p13) }
 0x45e   : > { %3495 = vst [vmem:[%s5830_s9 + $0x428] sm:$0xff] %v3351_v51  ;;  %v3204_v50 = vpop.f32.mrb[26].mxu1  ;;  %v2286_v42 = vpop.f32.mrb[90].mxu0  ;;  %v3663_v51 = vld [vmem:[%s5824_s25 + $0x40] sm:$0xff] (!%p4439_p13) }
 0x45f   : > { %3496 = vst [vmem:[%s5830_s9 + $0x430] sm:$0xff] %v3352_v39  ;;  %v3205_v61 = vadd.f32 %v3204_v50, %v6977_v34  ;;  %v3353_v26 = vadd.f32 %v2286_v42, %v659_v20  ;;  %v3206_v4 = vpop.f32.mrb[27].mxu1  ;;  %v2288_v6 = vpop.f32.mrb[91].mxu0  ;;  %v3664_v20 = vld [vmem:[%s5824_s25 + $0x48] sm:$0xff] (!%p4439_p13)  ;;  %v3665_v39 = vld [vmem:[%s5824_s25 + $0x50] sm:$0xff] (!%p4439_p13) }
 0x460   : > { %v3354_v41 = vadd.f32 %v2288_v6, %v660_v3  ;;  %v3520_v4 = vld [vmem:[%s5830_s9 + $0x50] sm:$0xff] (!%p4439_p13)  ;;  %v3521_v6 = vld [vmem:[%s5830_s9 + $0x58] sm:$0xff] (!%p4439_p13) }
 0x461   : > { %v3355_v29 = vadd.f32 %v3205_v61, %v661_v1  ;;  %3497 = vst [vmem:[%s5830_s9 + $0x438] sm:$0xff] %v3353_v26  ;;  %v3518_v61 = vld [vmem:[%s5830_s9 + $0x40] sm:$0xff] (!%p4439_p13)  ;;  %v3519_v26 = vld [vmem:[%s5830_s9 + $0x48] sm:$0xff] (!%p4439_p13) }
 0x462   : > { %3498 = vst [vmem:[%s5830_s9 + $0x440] sm:$0xff] %v3354_v41  ;;  %v3209_v37 = vpop.f32.mrb[28].mxu1  ;;  %v2292_v23 = vpop.f32.mrb[92].mxu0  ;;  %v3666_v41 = vld [vmem:[%s5824_s25 + $0x58] sm:$0xff] (!%p4439_p13) }
 0x463   : > { %3499 = vst [vmem:[%s5830_s9 + $0x448] sm:$0xff] %v3355_v29  ;;  %v3210_v34 = vadd.f32 %v3209_v37, %v6980_v49  ;;  %v3356_v15 = vadd.f32 %v2292_v23, %v662_v46  ;;  %v3211_v47 = vpop.f32.mrb[29].mxu1  ;;  %v2294_v5 = vpop.f32.mrb[93].mxu0  ;;  %v3667_v46 = vld [vmem:[%s5824_s25 + $0x60] sm:$0xff] (!%p4439_p13)  ;;  %v3668_v23 = vld [vmem:[%s5824_s25 + $0x68] sm:$0xff] (!%p4439_p13) }
 0x464   : > { %v3357_v33 = vadd.f32 %v2294_v5, %v663_v57 }
 0x465   : > { %v3358_v56 = vadd.f32 %v3210_v34, %v664_v36  ;;  %3500 = vst [vmem:[%s5830_s9 + $0x450] sm:$0xff] %v3356_v15  ;;  %3509 = sbr.rel (%p4439_p13) target bundleno = 1237 (0x4d5), region = 60  ;;  %v3669_v34 = vld [vmem:[%s5824_s25 + $0x70] sm:$0xff] (!%p4439_p13)  ;;  %v3670_v15 = vld [vmem:[%s5824_s25 + $0x78] sm:$0xff] (!%p4439_p13) }
 0x466   : > { %3501 = vst [vmem:[%s5830_s9 + $0x458] sm:$0xff] %v3357_v33  ;;  %v3214_v63 = vpop.f32.mrb[30].mxu1  ;;  %v2298_v58 = vpop.f32.mrb[94].mxu0 }
 0x467   : > { %3502 = vst [vmem:[%s5830_s9 + $0x460] sm:$0xff] %v3358_v56  ;;  %v3215_v18 = vadd.f32 %v3214_v63, %v6983_v62  ;;  %v3359_v48 = vadd.f32 %v2298_v58, %v665_v55  ;;  %v3216_v49 = vpop.f32.mrb[31].mxu1  ;;  %v2300_v8 = vpop.f32.mrb[95].mxu0  ;;  %v3801_v62 = vshrl.u32 (!%p4439_p13), %v3800_v60, 7  ;;  %v3522_v56 = vld [vmem:[%s5830_s9 + $0x60] sm:$0xff] (!%p4439_p13) }
 0x468   : > { %v3360_v40 = vadd.f32 %v2300_v8, %v666_v35  ;;  %v3523_v35 = vld [vmem:[%s5830_s9 + $0x68] sm:$0xff] (!%p4439_p13)  ;;  %v3525_v49 = vld [vmem:[%s5830_s9 + $0x78] sm:$0xff] (!%p4439_p13)  ;;  %v3671_v8 = vld [vmem:[%s5824_s25 + $0x80] sm:$0xff] (!%p4439_p13) }
 0x469   : > { %v3361_v52 = vadd.f32 %v3215_v18, %v667_v10  ;;  %3503 = vst [vmem:[%s5830_s9 + $0x468] sm:$0xff] %v3359_v48  ;;  %v3802_v27 = vsub.s32 (!%p4439_p13), 0, %v3801_v62  ;;  %v3806_v7 = vsub.s32 (!%p4439_p13), 1, %v3801_v62  ;;  %v3810_v16 = vsub.s32 (!%p4439_p13), 2, %v3801_v62  ;;  %v3524_v10 = vld [vmem:[%s5830_s9 + $0x70] sm:$0xff] (!%p4439_p13) }
 0x46a   : > { %3504 = vst [vmem:[%s5830_s9 + $0x470] sm:$0xff] %v3360_v40  ;;  %v3672_v40 = vld [vmem:[%s5824_s25 + $0x88] sm:$0xff] (!%p4439_p13) }
 0x46b   : > { %3505 = vst [vmem:[%s5830_s9 + $0x478] sm:$0xff] %v3361_v52  ;;  %v7332_v25 = vrot.slane (!%p4439_p13), %v3654_v38, %v3802_v27  ;;  %v7334_v44 = vrot.slane (!%p4439_p13), %v3654_v38, %v3806_v7  ;;  %v7336_v45 = vrot.slane (!%p4439_p13), %v3654_v38, %v3810_v16  ;;  %v3527_v27 = vld [vmem:[%s5830_s9 + $0x88] sm:$0xff] (!%p4439_p13)  ;;  %v3673_v7 = vld [vmem:[%s5824_s25 + $0x90] sm:$0xff] (!%p4439_p13)  ;;  %v3674_v16 = vld [vmem:[%s5824_s25 + $0x98] sm:$0xff] (!%p4439_p13) }
 0x46d   : > { %v3815_v22 = vadd.f32 %v7332_v25, %v3655_v43  ;;  %v3816_v11 = vadd.f32 %v7334_v44, %v3656_v12  ;;  %v3817_v30 = vadd.f32 %v7336_v45, %v3657_v59  ;;  %v3818_v17 = vadd.f32 %v7332_v25, %v3658_v53  ;;  %v3526_v43 = vld [vmem:[%s5830_s9 + $0x80] sm:$0xff]  ;;  %v3528_v12 = vld [vmem:[%s5830_s9 + $0x90] sm:$0xff]  ;;  %v3529_v59 = vld [vmem:[%s5830_s9 + $0x98] sm:$0xff] }
 0x46e   : > { %v3819_v3 = vadd.f32 %v7334_v44, %v3659_v14  ;;  %v3820_v1 = vadd.f32 %v7336_v45, %v3660_v32  ;;  %v3821_v50 = vadd.f32 %v7332_v25, %v3661_v2  ;;  %v3822_v42 = vadd.f32 %v7334_v44, %v3662_v24  ;;  %v3530_v53 = vld [vmem:[%s5830_s9 + $0xa0] sm:$0xff] }
 0x46f   : > { %v3959_v29 = vadd.f32 %v3815_v22, %v3510_v54  ;;  %v3960_v57 = vadd.f32 %v3816_v11, %v3511_v19  ;;  %v3961_v36 = vadd.f32 %v3817_v30, %v3512_v9  ;;  %v3962_v37 = vadd.f32 %v3818_v17, %v3513_v28  ;;  %v3675_v14 = vld [vmem:[%s5824_s25 + $0xa0] sm:$0xff]  ;;  %v3677_v22 = vld [vmem:[%s5824_s25 + $0xb0] sm:$0xff] }
 0x470   : > { %v3963_v47 = vadd.f32 %v3819_v3, %v3514_v13  ;;  %v3964_v5 = vadd.f32 %v3820_v1, %v3515_v21  ;;  %v3965_v33 = vadd.f32 %v3821_v50, %v3516_v0  ;;  %v3966_v55 = vadd.f32 %v3822_v42, %v3517_v31  ;;  %v3676_v13 = vld [vmem:[%s5824_s25 + $0xa8] sm:$0xff]  ;;  %v3532_v31 = vld [vmem:[%s5830_s9 + $0xb0] sm:$0xff]  ;;  %v3679_v3 = vld [vmem:[%s5824_s25 + $0xc0] sm:$0xff] }
 0x471   : > { %4103 = vst [vmem:[%s5830_s9] sm:$0xff] %v3959_v29  ;;  %4104 = vst [vmem:[%s5830_s9 + $0x8] sm:$0xff] %v3960_v57  ;;  %v3823_v63 = vadd.f32 %v7336_v45, %v3663_v51  ;;  %v3824_v58 = vadd.f32 %v7332_v25, %v3664_v20  ;;  %v3825_v18 = vadd.f32 %v7334_v44, %v3665_v39  ;;  %v3531_v0 = vld [vmem:[%s5830_s9 + $0xa8] sm:$0xff]  ;;  %v3533_v20 = vld [vmem:[%s5830_s9 + $0xb8] sm:$0xff] }
 0x472   : > { %4105 = vst [vmem:[%s5830_s9 + $0x10] sm:$0xff] %v3961_v36  ;;  %4106 = vst [vmem:[%s5830_s9 + $0x18] sm:$0xff] %v3962_v37  ;;  %v3826_v48 = vadd.f32 %v7336_v45, %v3666_v41  ;;  %v3827_v52 = vadd.f32 %v7332_v25, %v3667_v46  ;;  %v3828_v60 = vadd.f32 %v7334_v44, %v3668_v23  ;;  %v3678_v39 = vld [vmem:[%s5824_s25 + $0xb8] sm:$0xff]  ;;  %v3536_v41 = vld [vmem:[%s5830_s9 + $0xd0] sm:$0xff] }
 0x473   : > { %4107 = vst [vmem:[%s5830_s9 + $0x20] sm:$0xff] %v3963_v47  ;;  %4108 = vst [vmem:[%s5830_s9 + $0x28] sm:$0xff] %v3964_v5  ;;  %v3829_v62 = vadd.f32 %v7336_v45, %v3669_v34  ;;  %v3830_v38 = vadd.f32 %v7332_v25, %v3670_v15  ;;  %v3967_v54 = vadd.f32 %v3823_v63, %v3518_v61  ;;  %v3681_v37 = vld [vmem:[%s5824_s25 + $0xd0] sm:$0xff]  ;;  %v3537_v23 = vld [vmem:[%s5830_s9 + $0xd8] sm:$0xff] }
 0x474   : > { %4109 = vst [vmem:[%s5830_s9 + $0x30] sm:$0xff] %v3965_v33  ;;  %4110 = vst [vmem:[%s5830_s9 + $0x38] sm:$0xff] %v3966_v55  ;;  %v3968_v19 = vadd.f32 %v3824_v58, %v3519_v26  ;;  %v3969_v9 = vadd.f32 %v3825_v18, %v3520_v4  ;;  %v3970_v28 = vadd.f32 %v3826_v48, %v3521_v6  ;;  %v3534_v26 = vld [vmem:[%s5830_s9 + $0xc0] sm:$0xff]  ;;  %v3535_v4 = vld [vmem:[%s5830_s9 + $0xc8] sm:$0xff] }
 0x475   : > { %v3971_v32 = vadd.f32 %v3827_v52, %v3522_v56  ;;  %v3972_v2 = vadd.f32 %v3828_v60, %v3523_v35  ;;  %v3973_v24 = vadd.f32 %v3829_v62, %v3524_v10  ;;  %v3974_v21 = vadd.f32 %v3830_v38, %v3525_v49  ;;  %4111 = vst [vmem:[%s5830_s9 + $0x40] sm:$0xff] %v3967_v54  ;;  %v3680_v6 = vld [vmem:[%s5824_s25 + $0xc8] sm:$0xff]  ;;  %v3682_v34 = vld [vmem:[%s5824_s25 + $0xd8] sm:$0xff]  ;;  %v3538_v55 = vld [vmem:[%s5830_s9 + $0xe0] sm:$0xff] }
 0x476   : > { %4112 = vst [vmem:[%s5830_s9 + $0x48] sm:$0xff] %v3968_v19  ;;  %4113 = vst [vmem:[%s5830_s9 + $0x50] sm:$0xff] %v3969_v9  ;;  %v3831_v11 = vadd.f32 %v7334_v44, %v3671_v8  ;;  %v3832_v30 = vadd.f32 %v7336_v45, %v3672_v40  ;;  %v3833_v17 = vadd.f32 %v7332_v25, %v3673_v7  ;;  %v3683_v56 = vld [vmem:[%s5824_s25 + $0xe0] sm:$0xff]  ;;  %v3539_v35 = vld [vmem:[%s5830_s9 + $0xe8] sm:$0xff] }
 0x477   : > { %4114 = vst [vmem:[%s5830_s9 + $0x58] sm:$0xff] %v3970_v28  ;;  %v3834_v51 = vadd.f32 %v7334_v44, %v3674_v16  ;;  %4115 = vst [vmem:[%s5830_s9 + $0x60] sm:$0xff] %v3971_v32  ;;  %v3835_v1 = vadd.f32 %v7336_v45, %v3675_v14  ;;  %v3836_v50 = vadd.f32 %v7332_v25, %v3676_v13  ;;  %v3684_v48 = vld [vmem:[%s5824_s25 + $0xe8] sm:$0xff]  ;;  %v3540_v49 = vld [vmem:[%s5830_s9 + $0xf0] sm:$0xff] }
 0x478   : > { %4116 = vst [vmem:[%s5830_s9 + $0x68] sm:$0xff] %v3972_v2  ;;  %4117 = vst [vmem:[%s5830_s9 + $0x70] sm:$0xff] %v3973_v24  ;;  %v3837_v42 = vadd.f32 %v7334_v44, %v3677_v22  ;;  %v3838_v61 = vadd.f32 %v7336_v45, %v3678_v39  ;;  %v3975_v46 = vadd.f32 %v3831_v11, %v3526_v43  ;;  %v3685_v8 = vld [vmem:[%s5824_s25 + $0xf0] sm:$0xff]  ;;  %v3541_v62 = vld [vmem:[%s5830_s9 + $0xf8] sm:$0xff] }
 0x479   : > { %4118 = vst [vmem:[%s5830_s9 + $0x78] sm:$0xff] %v3974_v21  ;;  %v3976_v29 = vadd.f32 %v3832_v30, %v3527_v27  ;;  %v3977_v57 = vadd.f32 %v3833_v17, %v3528_v12  ;;  %v3978_v36 = vadd.f32 %v3834_v51, %v3529_v59  ;;  %v3979_v15 = vadd.f32 %v3835_v1, %v3530_v53  ;;  %v3686_v38 = vld [vmem:[%s5824_s25 + $0xf8] sm:$0xff]  ;;  %v3542_v43 = vld [vmem:[%s5830_s9 + $0x100] sm:$0xff]  ;;  %v3543_v54 = vld [vmem:[%s5830_s9 + $0x108] sm:$0xff] }
 0x47a   : > { %v3980_v47 = vadd.f32 %v3836_v50, %v3531_v0  ;;  %v3981_v5 = vadd.f32 %v3837_v42, %v3532_v31  ;;  %v3982_v33 = vadd.f32 %v3838_v61, %v3533_v20  ;;  %4119 = vst [vmem:[%s5830_s9 + $0x80] sm:$0xff] %v3975_v46  ;;  %v3839_v10 = vadd.f32 %v7332_v25, %v3679_v3  ;;  %v3687_v16 = vld [vmem:[%s5824_s25 + $0x100] sm:$0xff]  ;;  %v3688_v19 = vld [vmem:[%s5824_s25 + $0x108] sm:$0xff]  ;;  %v3544_v13 = vld [vmem:[%s5830_s9 + $0x110] sm:$0xff] }
 0x47b   : > { %4120 = vst [vmem:[%s5830_s9 + $0x88] sm:$0xff] %v3976_v29  ;;  %4121 = vst [vmem:[%s5830_s9 + $0x90] sm:$0xff] %v3977_v57  ;;  %v3840_v63 = vadd.f32 %v7334_v44, %v3680_v6  ;;  %v3841_v58 = vadd.f32 %v7336_v45, %v3681_v37  ;;  %v3842_v18 = vadd.f32 %v7332_v25, %v3682_v34  ;;  %v3689_v32 = vld [vmem:[%s5824_s25 + $0x110] sm:$0xff]  ;;  %v3545_v2 = vld [vmem:[%s5830_s9 + $0x118] sm:$0xff] }
 0x47c   : > { %4122 = vst [vmem:[%s5830_s9 + $0x98] sm:$0xff] %v3978_v36  ;;  %4123 = vst [vmem:[%s5830_s9 + $0xa0] sm:$0xff] %v3979_v15  ;;  %v3843_v40 = vadd.f32 %v7334_v44, %v3683_v56  ;;  %v3844_v52 = vadd.f32 %v7336_v45, %v3684_v48  ;;  %v3845_v60 = vadd.f32 %v7332_v25, %v3685_v8  ;;  %v3690_v31 = vld [vmem:[%s5824_s25 + $0x118] sm:$0xff]  ;;  %v3546_v22 = vld [vmem:[%s5830_s9 + $0x120] sm:$0xff] }
 0x47d   : > { %4124 = vst [vmem:[%s5830_s9 + $0xa8] sm:$0xff] %v3980_v47  ;;  %4125 = vst [vmem:[%s5830_s9 + $0xb0] sm:$0xff] %v3981_v5  ;;  %v3983_v27 = vadd.f32 %v3839_v10, %v3534_v26  ;;  %v3984_v12 = vadd.f32 %v3840_v63, %v3535_v4  ;;  %v3985_v7 = vadd.f32 %v3841_v58, %v3536_v41  ;;  %v3691_v11 = vld [vmem:[%s5824_s25 + $0x120] sm:$0xff]  ;;  %v3547_v20 = vld [vmem:[%s5830_s9 + $0x128] sm:$0xff] }
 0x47e   : > { %4126 = vst [vmem:[%s5830_s9 + $0xb8] sm:$0xff] %v3982_v33  ;;  %v3986_v59 = vadd.f32 %v3842_v18, %v3537_v23  ;;  %v3987_v9 = vadd.f32 %v3843_v40, %v3538_v55  ;;  %v3988_v28 = vadd.f32 %v3844_v52, %v3539_v35  ;;  %v3989_v53 = vadd.f32 %v3845_v60, %v3540_v49  ;;  %v3692_v39 = vld [vmem:[%s5824_s25 + $0x128] sm:$0xff]  ;;  %v3548_v3 = vld [vmem:[%s5830_s9 + $0x130] sm:$0xff]  ;;  %v3549_v4 = vld [vmem:[%s5830_s9 + $0x138] sm:$0xff] }
 0x47f   : > { %v3846_v14 = vadd.f32 %v7334_v44, %v3686_v38  ;;  %4127 = vst [vmem:[%s5830_s9 + $0xc0] sm:$0xff] %v3983_v27  ;;  %4128 = vst [vmem:[%s5830_s9 + $0xc8] sm:$0xff] %v3984_v12  ;;  %v3847_v24 = vadd.f32 %v7336_v45, %v3687_v16  ;;  %v3848_v21 = vadd.f32 %v7332_v25, %v3688_v19  ;;  %v3693_v26 = vld [vmem:[%s5824_s25 + $0x130] sm:$0xff]  ;;  %v3694_v6 = vld [vmem:[%s5824_s25 + $0x138] sm:$0xff] }
 0x480   : > { %4129 = vst [vmem:[%s5830_s9 + $0xd0] sm:$0xff] %v3985_v7  ;;  %4130 = vst [vmem:[%s5830_s9 + $0xd8] sm:$0xff] %v3986_v59  ;;  %v3849_v0 = vadd.f32 %v7334_v44, %v3689_v32  ;;  %v3850_v17 = vadd.f32 %v7336_v45, %v3690_v31  ;;  %v3851_v51 = vadd.f32 %v7332_v25, %v3691_v11  ;;  %v3550_v36 = vld [vmem:[%s5830_s9 + $0x140] sm:$0xff]  ;;  %v3551_v23 = vld [vmem:[%s5830_s9 + $0x148] sm:$0xff] }
 0x481   : > { %4131 = vst [vmem:[%s5830_s9 + $0xe0] sm:$0xff] %v3987_v9  ;;  %4132 = vst [vmem:[%s5830_s9 + $0xe8] sm:$0xff] %v3988_v28  ;;  %v3990_v30 = vadd.f32 %v3846_v14, %v3541_v62  ;;  %v3991_v1 = vadd.f32 %v3847_v24, %v3542_v43  ;;  %v3992_v50 = vadd.f32 %v3848_v21, %v3543_v54  ;;  %v3695_v37 = vld [vmem:[%s5824_s25 + $0x140] sm:$0xff]  ;;  %v3696_v47 = vld [vmem:[%s5824_s25 + $0x148] sm:$0xff] }
 0x482   : > { %4133 = vst [vmem:[%s5830_s9 + $0xf0] sm:$0xff] %v3989_v53  ;;  %v3993_v42 = vadd.f32 %v3849_v0, %v3544_v13  ;;  %v3852_v61 = vadd.f32 %v7334_v44, %v3692_v39  ;;  %v3994_v41 = vadd.f32 %v3850_v17, %v3545_v2  ;;  %v3995_v46 = vadd.f32 %v3851_v51, %v3546_v22  ;;  %v3552_v5 = vld [vmem:[%s5830_s9 + $0x150] sm:$0xff]  ;;  %v3553_v63 = vld [vmem:[%s5830_s9 + $0x158] sm:$0xff]  ;;  %v3554_v18 = vld [vmem:[%s5830_s9 + $0x160] sm:$0xff] }
 0x483   : > { %4134 = vst [vmem:[%s5830_s9 + $0xf8] sm:$0xff] %v3990_v30  ;;  %v3853_v29 = vadd.f32 %v7336_v45, %v3693_v26  ;;  %v3854_v57 = vadd.f32 %v7332_v25, %v3694_v6  ;;  %4135 = vst [vmem:[%s5830_s9 + $0x100] sm:$0xff] %v3991_v1  ;;  %v3855_v15 = vadd.f32 %v7334_v44, %v3695_v37  ;;  %v3697_v33 = vld [vmem:[%s5824_s25 + $0x150] sm:$0xff]  ;;  %v3698_v58 = vld [vmem:[%s5824_s25 + $0x158] sm:$0xff] }
 0x484   : > { %4136 = vst [vmem:[%s5830_s9 + $0x108] sm:$0xff] %v3992_v50  ;;  %4137 = vst [vmem:[%s5830_s9 + $0x110] sm:$0xff] %v3993_v42  ;;  %v3996_v34 = vadd.f32 %v3852_v61, %v3547_v20  ;;  %v3856_v35 = vadd.f32 %v7336_v45, %v3696_v47  ;;  %v3857_v10 = vadd.f32 %v7332_v25, %v3697_v33  ;;  %v3699_v8 = vld [vmem:[%s5824_s25 + $0x160] sm:$0xff]  ;;  %v3555_v40 = vld [vmem:[%s5830_s9 + $0x168] sm:$0xff] }
 0x485   : > { %4138 = vst [vmem:[%s5830_s9 + $0x118] sm:$0xff] %v3994_v41  ;;  %4139 = vst [vmem:[%s5830_s9 + $0x120] sm:$0xff] %v3995_v46  ;;  %v3997_v55 = vadd.f32 %v3853_v29, %v3548_v3  ;;  %v3998_v56 = vadd.f32 %v3854_v57, %v3549_v4  ;;  %v3999_v48 = vadd.f32 %v3855_v15, %v3550_v36  ;;  %v3700_v52 = vld [vmem:[%s5824_s25 + $0x168] sm:$0xff]  ;;  %v3556_v27 = vld [vmem:[%s5830_s9 + $0x170] sm:$0xff] }
 0x486   : > { %4140 = vst [vmem:[%s5830_s9 + $0x128] sm:$0xff] %v3996_v34  ;;  %v3858_v49 = vadd.f32 %v7334_v44, %v3698_v58  ;;  %v4000_v60 = vadd.f32 %v3856_v35, %v3551_v23  ;;  %v4001_v62 = vadd.f32 %v3857_v10, %v3552_v5  ;;  %v3859_v38 = vadd.f32 %v7336_v45, %v3699_v8  ;;  %v3701_v12 = vld [vmem:[%s5824_s25 + $0x170] sm:$0xff]  ;;  %v3557_v7 = vld [vmem:[%s5830_s9 + $0x178] sm:$0xff]  ;;  %v3558_v19 = vld [vmem:[%s5830_s9 + $0x180] sm:$0xff] }
 0x487   : > { %4141 = vst [vmem:[%s5830_s9 + $0x130] sm:$0xff] %v3997_v55  ;;  %4142 = vst [vmem:[%s5830_s9 + $0x138] sm:$0xff] %v3998_v56  ;;  %v3860_v43 = vadd.f32 %v7332_v25, %v3700_v52  ;;  %v3861_v16 = vadd.f32 %v7334_v44, %v3701_v12  ;;  %v3702_v54 = vld [vmem:[%s5824_s25 + $0x178] sm:$0xff]  ;;  %v3703_v9 = vld [vmem:[%s5824_s25 + $0x180] sm:$0xff] }
 0x488   : > { %4143 = vst [vmem:[%s5830_s9 + $0x140] sm:$0xff] %v3999_v48  ;;  %v4002_v59 = vadd.f32 %v3858_v49, %v3553_v63  ;;  %4144 = vst [vmem:[%s5830_s9 + $0x148] sm:$0xff] %v4000_v60  ;;  %v4003_v28 = vadd.f32 %v3859_v38, %v3554_v18  ;;  %v3862_v14 = vadd.f32 %v7336_v45, %v3702_v54  ;;  %v3559_v32 = vld [vmem:[%s5830_s9 + $0x188] sm:$0xff]  ;;  %v3560_v24 = vld [vmem:[%s5830_s9 + $0x190] sm:$0xff] }
 0x489   : > { %4145 = vst [vmem:[%s5830_s9 + $0x150] sm:$0xff] %v4001_v62  ;;  %v4004_v53 = vadd.f32 %v3860_v43, %v3555_v40  ;;  %v3863_v13 = vadd.f32 %v7332_v25, %v3703_v9  ;;  %v3704_v2 = vld [vmem:[%s5824_s25 + $0x188] sm:$0xff]  ;;  %v4005_v21 = vadd.f32 %v3861_v16, %v3556_v27  ;;  %v3705_v31 = vld [vmem:[%s5824_s25 + $0x190] sm:$0xff]  ;;  %v3561_v22 = vld [vmem:[%s5830_s9 + $0x198] sm:$0xff] }
 0x48a   : > { %4146 = vst [vmem:[%s5830_s9 + $0x158] sm:$0xff] %v4002_v59  ;;  %v3864_v0 = vadd.f32 %v7334_v44, %v3704_v2  ;;  %v3706_v11 = vld [vmem:[%s5824_s25 + $0x198] sm:$0xff]  ;;  %4147 = vst [vmem:[%s5830_s9 + $0x160] sm:$0xff] %v4003_v28  ;;  %v4006_v30 = vadd.f32 %v3862_v14, %v3557_v7  ;;  %v3865_v51 = vadd.f32 %v7336_v45, %v3705_v31  ;;  %v3562_v39 = vld [vmem:[%s5830_s9 + $0x1a0] sm:$0xff] }
 0x48b   : > { %4148 = vst [vmem:[%s5830_s9 + $0x168] sm:$0xff] %v4004_v53  ;;  %v4007_v17 = vadd.f32 %v3863_v13, %v3558_v19  ;;  %v3866_v20 = vadd.f32 %v7332_v25, %v3706_v11  ;;  %v3707_v3 = vld [vmem:[%s5824_s25 + $0x1a0] sm:$0xff]  ;;  %v3563_v1 = vld [vmem:[%s5830_s9 + $0x1a8] sm:$0xff]  ;;  %4149 = vst [vmem:[%s5830_s9 + $0x170] sm:$0xff] %v4005_v21 }
 0x48c   : > { %v4008_v50 = vadd.f32 %v3864_v0, %v3559_v32  ;;  %v3867_v42 = vadd.f32 %v7334_v44, %v3707_v3  ;;  %v3708_v61 = vld [vmem:[%s5824_s25 + $0x1a8] sm:$0xff]  ;;  %v3564_v26 = vld [vmem:[%s5830_s9 + $0x1b0] sm:$0xff]  ;;  %4150 = vst [vmem:[%s5830_s9 + $0x178] sm:$0xff] %v4006_v30  ;;  %v4009_v6 = vadd.f32 %v3865_v51, %v3560_v24  ;;  %v3565_v57 = vld [vmem:[%s5830_s9 + $0x1b8] sm:$0xff] }
 0x48d   : > { %v3709_v4 = vld [vmem:[%s5824_s25 + $0x1b0] sm:$0xff]  ;;  %4151 = vst [vmem:[%s5830_s9 + $0x180] sm:$0xff] %v4007_v17  ;;  %v4010_v41 = vadd.f32 %v3866_v20, %v3561_v22  ;;  %v3868_v46 = vadd.f32 %v7336_v45, %v3708_v61  ;;  %v3710_v36 = vld [vmem:[%s5824_s25 + $0x1b8] sm:$0xff]  ;;  %v3566_v37 = vld [vmem:[%s5830_s9 + $0x1c0] sm:$0xff] }
 0x48e   : > { %v3869_v29 = vadd.f32 %v7332_v25, %v3709_v4  ;;  %4152 = vst [vmem:[%s5830_s9 + $0x188] sm:$0xff] %v4008_v50  ;;  %v4011_v23 = vadd.f32 %v3867_v42, %v3562_v39  ;;  %v3870_v34 = vadd.f32 %v7334_v44, %v3710_v36  ;;  %v3711_v15 = vld [vmem:[%s5824_s25 + $0x1c0] sm:$0xff]  ;;  %v3567_v47 = vld [vmem:[%s5830_s9 + $0x1c8] sm:$0xff]  ;;  %4153 = vst [vmem:[%s5830_s9 + $0x190] sm:$0xff] %v4009_v6 }
 0x48f   : > { %v3712_v5 = vld [vmem:[%s5824_s25 + $0x1c8] sm:$0xff]  ;;  %4154 = vst [vmem:[%s5830_s9 + $0x198] sm:$0xff] %v4010_v41  ;;  %v4012_v33 = vadd.f32 %v3868_v46, %v3563_v1  ;;  %v3871_v56 = vadd.f32 %v7336_v45, %v3711_v15  ;;  %v3568_v10 = vld [vmem:[%s5830_s9 + $0x1d0] sm:$0xff]  ;;  %v3569_v58 = vld [vmem:[%s5830_s9 + $0x1d8] sm:$0xff] }
 0x490   : > { %v4013_v55 = vadd.f32 %v3869_v29, %v3564_v26  ;;  %v3872_v35 = vadd.f32 %v7332_v25, %v3712_v5  ;;  %v3713_v63 = vld [vmem:[%s5824_s25 + $0x1d0] sm:$0xff]  ;;  %4155 = vst [vmem:[%s5830_s9 + $0x1a0] sm:$0xff] %v4011_v23  ;;  %v4014_v18 = vadd.f32 %v3870_v34, %v3565_v57  ;;  %v3714_v49 = vld [vmem:[%s5824_s25 + $0x1d8] sm:$0xff]  ;;  %v3570_v8 = vld [vmem:[%s5830_s9 + $0x1e0] sm:$0xff] }
 0x491   : > { %v3873_v48 = vadd.f32 %v7334_v44, %v3713_v63  ;;  %v3715_v40 = vld [vmem:[%s5824_s25 + $0x1e0] sm:$0xff]  ;;  %4156 = vst [vmem:[%s5830_s9 + $0x1a8] sm:$0xff] %v4012_v33  ;;  %v4015_v52 = vadd.f32 %v3871_v56, %v3566_v37  ;;  %v3874_v62 = vadd.f32 %v7336_v45, %v3714_v49  ;;  %v3571_v43 = vld [vmem:[%s5830_s9 + $0x1e8] sm:$0xff]  ;;  %v3572_v12 = vld [vmem:[%s5830_s9 + $0x1f0] sm:$0xff] }
 0x492   : > { %4157 = vst [vmem:[%s5830_s9 + $0x1b0] sm:$0xff] %v4013_v55  ;;  %v4016_v60 = vadd.f32 %v3872_v35, %v3567_v47  ;;  %v3875_v38 = vadd.f32 %v7332_v25, %v3715_v40  ;;  %v3716_v27 = vld [vmem:[%s5824_s25 + $0x1e8] sm:$0xff]  ;;  %4158 = vst [vmem:[%s5830_s9 + $0x1b8] sm:$0xff] %v4014_v18  ;;  %v3717_v16 = vld [vmem:[%s5824_s25 + $0x1f0] sm:$0xff] }
 0x493   : > { %v4017_v7 = vadd.f32 %v3873_v48, %v3568_v10  ;;  %v3876_v59 = vadd.f32 %v7334_v44, %v3716_v27  ;;  %v3573_v54 = vld [vmem:[%s5830_s9 + $0x1f8] sm:$0xff]  ;;  %4159 = vst [vmem:[%s5830_s9 + $0x1c0] sm:$0xff] %v4015_v52  ;;  %v4018_v9 = vadd.f32 %v3874_v62, %v3569_v58  ;;  %v3877_v53 = vadd.f32 %v7336_v45, %v3717_v16  ;;  %v3574_v13 = vld [vmem:[%s5830_s9 + $0x200] sm:$0xff]  ;;  %v3575_v2 = vld [vmem:[%s5830_s9 + $0x208] sm:$0xff] }
 0x494   : > { %v3718_v19 = vld [vmem:[%s5824_s25 + $0x1f8] sm:$0xff]  ;;  %4160 = vst [vmem:[%s5830_s9 + $0x1c8] sm:$0xff] %v4016_v60  ;;  %v4019_v28 = vadd.f32 %v3875_v38, %v3570_v8  ;;  %v3719_v32 = vld [vmem:[%s5824_s25 + $0x200] sm:$0xff]  ;;  %v3720_v0 = vld [vmem:[%s5824_s25 + $0x208] sm:$0xff] }
 0x495   : > { %v3878_v14 = vadd.f32 %v7332_v25, %v3718_v19  ;;  %4161 = vst [vmem:[%s5830_s9 + $0x1d0] sm:$0xff] %v4017_v7  ;;  %v4020_v24 = vadd.f32 %v3876_v59, %v3571_v43  ;;  %v3879_v21 = vadd.f32 %v7334_v44, %v3719_v32  ;;  %v3576_v31 = vld [vmem:[%s5830_s9 + $0x210] sm:$0xff]  ;;  %4162 = vst [vmem:[%s5830_s9 + $0x1d8] sm:$0xff] %v4018_v9  ;;  %v3577_v20 = vld [vmem:[%s5830_s9 + $0x218] sm:$0xff] }
 0x496   : > { %v3721_v22 = vld [vmem:[%s5824_s25 + $0x210] sm:$0xff]  ;;  %4163 = vst [vmem:[%s5830_s9 + $0x1e0] sm:$0xff] %v4019_v28  ;;  %v4021_v11 = vadd.f32 %v3877_v53, %v3572_v12  ;;  %v3880_v17 = vadd.f32 %v7336_v45, %v3720_v0  ;;  %v3722_v39 = vld [vmem:[%s5824_s25 + $0x218] sm:$0xff]  ;;  %v3578_v3 = vld [vmem:[%s5830_s9 + $0x220] sm:$0xff] }
 0x497   : > { %v4022_v30 = vadd.f32 %v3878_v14, %v3573_v54  ;;  %v3881_v51 = vadd.f32 %v7332_v25, %v3721_v22  ;;  %4164 = vst [vmem:[%s5830_s9 + $0x1e8] sm:$0xff] %v4020_v24  ;;  %v4023_v1 = vadd.f32 %v3879_v21, %v3574_v13  ;;  %v3882_v50 = vadd.f32 %v7334_v44, %v3722_v39  ;;  %v3723_v42 = vld [vmem:[%s5824_s25 + $0x220] sm:$0xff]  ;;  %v3579_v61 = vld [vmem:[%s5830_s9 + $0x228] sm:$0xff]  ;;  %v3580_v29 = vld [vmem:[%s5830_s9 + $0x230] sm:$0xff] }
 0x498   : > { %v3724_v26 = vld [vmem:[%s5824_s25 + $0x228] sm:$0xff]  ;;  %4165 = vst [vmem:[%s5830_s9 + $0x1f0] sm:$0xff] %v4021_v11  ;;  %v4024_v4 = vadd.f32 %v3880_v17, %v3575_v2  ;;  %v3883_v41 = vadd.f32 %v7336_v45, %v3723_v42  ;;  %v3725_v57 = vld [vmem:[%s5824_s25 + $0x230] sm:$0xff]  ;;  %v3581_v36 = vld [vmem:[%s5830_s9 + $0x238] sm:$0xff] }
 0x499   : > { %4166 = vst [vmem:[%s5830_s9 + $0x1f8] sm:$0xff] %v4022_v30  ;;  %v4025_v6 = vadd.f32 %v3881_v51, %v3576_v31  ;;  %v3884_v46 = vadd.f32 %v7332_v25, %v3724_v26  ;;  %4167 = vst [vmem:[%s5830_s9 + $0x200] sm:$0xff] %v4023_v1  ;;  %v4026_v37 = vadd.f32 %v3882_v50, %v3577_v20  ;;  %v3726_v34 = vld [vmem:[%s5824_s25 + $0x238] sm:$0xff]  ;;  %v3582_v15 = vld [vmem:[%s5830_s9 + $0x240] sm:$0xff] }
 0x49a   : > { %v3885_v23 = vadd.f32 %v7334_v44, %v3725_v57  ;;  %v3727_v47 = vld [vmem:[%s5824_s25 + $0x240] sm:$0xff]  ;;  %4168 = vst [vmem:[%s5830_s9 + $0x208] sm:$0xff] %v4024_v4  ;;  %v4027_v5 = vadd.f32 %v3883_v41, %v3578_v3  ;;  %v3886_v55 = vadd.f32 %v7336_v45, %v3726_v34  ;;  %v3583_v35 = vld [vmem:[%s5830_s9 + $0x248] sm:$0xff]  ;;  %v3584_v63 = vld [vmem:[%s5830_s9 + $0x250] sm:$0xff] }
 0x49b   : > { %4169 = vst [vmem:[%s5830_s9 + $0x210] sm:$0xff] %v4025_v6  ;;  %v4028_v33 = vadd.f32 %v3884_v46, %v3579_v61  ;;  %v3887_v56 = vadd.f32 %v7332_v25, %v3727_v47  ;;  %v3728_v10 = vld [vmem:[%s5824_s25 + $0x248] sm:$0xff]  ;;  %4170 = vst [vmem:[%s5830_s9 + $0x218] sm:$0xff] %v4026_v37  ;;  %v3729_v48 = vld [vmem:[%s5824_s25 + $0x250] sm:$0xff] }
 0x49c   : > { %v4029_v58 = vadd.f32 %v3885_v23, %v3580_v29  ;;  %v3888_v18 = vadd.f32 %v7334_v44, %v3728_v10  ;;  %v3585_v49 = vld [vmem:[%s5830_s9 + $0x258] sm:$0xff]  ;;  %4171 = vst [vmem:[%s5830_s9 + $0x220] sm:$0xff] %v4027_v5  ;;  %v4030_v40 = vadd.f32 %v3886_v55, %v3581_v36  ;;  %v3889_v60 = vadd.f32 %v7336_v45, %v3729_v48  ;;  %v3586_v38 = vld [vmem:[%s5830_s9 + $0x260] sm:$0xff]  ;;  %v3587_v27 = vld [vmem:[%s5830_s9 + $0x268] sm:$0xff] }
 0x49d   : > { %v3730_v8 = vld [vmem:[%s5824_s25 + $0x258] sm:$0xff]  ;;  %4172 = vst [vmem:[%s5830_s9 + $0x228] sm:$0xff] %v4028_v33  ;;  %v4031_v52 = vadd.f32 %v3887_v56, %v3582_v15  ;;  %v3731_v43 = vld [vmem:[%s5824_s25 + $0x260] sm:$0xff]  ;;  %v3732_v59 = vld [vmem:[%s5824_s25 + $0x268] sm:$0xff] }
 0x49e   : > { %v3890_v62 = vadd.f32 %v7332_v25, %v3730_v8  ;;  %4173 = vst [vmem:[%s5830_s9 + $0x230] sm:$0xff] %v4029_v58  ;;  %v4032_v12 = vadd.f32 %v3888_v18, %v3583_v35  ;;  %v3891_v7 = vadd.f32 %v7334_v44, %v3731_v43  ;;  %v3588_v16 = vld [vmem:[%s5830_s9 + $0x270] sm:$0xff]  ;;  %4174 = vst [vmem:[%s5830_s9 + $0x238] sm:$0xff] %v4030_v40  ;;  %v3589_v14 = vld [vmem:[%s5830_s9 + $0x278] sm:$0xff] }
 0x49f   : > { %v3733_v54 = vld [vmem:[%s5824_s25 + $0x270] sm:$0xff]  ;;  %4175 = vst [vmem:[%s5830_s9 + $0x240] sm:$0xff] %v4031_v52  ;;  %v4033_v19 = vadd.f32 %v3889_v60, %v3584_v63  ;;  %v3892_v28 = vadd.f32 %v7336_v45, %v3732_v59  ;;  %v3734_v13 = vld [vmem:[%s5824_s25 + $0x278] sm:$0xff]  ;;  %v3590_v32 = vld [vmem:[%s5830_s9 + $0x280] sm:$0xff] }
 0x4a0   : > { %v4034_v9 = vadd.f32 %v3890_v62, %v3585_v49  ;;  %v3893_v53 = vadd.f32 %v7332_v25, %v3733_v54  ;;  %4176 = vst [vmem:[%s5830_s9 + $0x248] sm:$0xff] %v4032_v12  ;;  %v4035_v2 = vadd.f32 %v3891_v7, %v3586_v38  ;;  %v3894_v24 = vadd.f32 %v7334_v44, %v3734_v13  ;;  %v3735_v21 = vld [vmem:[%s5824_s25 + $0x280] sm:$0xff]  ;;  %v3591_v0 = vld [vmem:[%s5830_s9 + $0x288] sm:$0xff]  ;;  %v3592_v51 = vld [vmem:[%s5830_s9 + $0x290] sm:$0xff] }
 0x4a1   : > { %v3736_v31 = vld [vmem:[%s5824_s25 + $0x288] sm:$0xff]  ;;  %4177 = vst [vmem:[%s5830_s9 + $0x250] sm:$0xff] %v4033_v19  ;;  %v4036_v22 = vadd.f32 %v3892_v28, %v3587_v27  ;;  %v3895_v30 = vadd.f32 %v7336_v45, %v3735_v21  ;;  %v3737_v20 = vld [vmem:[%s5824_s25 + $0x290] sm:$0xff]  ;;  %v3593_v39 = vld [vmem:[%s5830_s9 + $0x298] sm:$0xff] }
 0x4a2   : > { %4178 = vst [vmem:[%s5830_s9 + $0x258] sm:$0xff] %v4034_v9  ;;  %v4037_v11 = vadd.f32 %v3893_v53, %v3588_v16  ;;  %v3896_v17 = vadd.f32 %v7332_v25, %v3736_v31  ;;  %4179 = vst [vmem:[%s5830_s9 + $0x260] sm:$0xff] %v4035_v2  ;;  %v4038_v3 = vadd.f32 %v3894_v24, %v3589_v14  ;;  %v3738_v50 = vld [vmem:[%s5824_s25 + $0x298] sm:$0xff]  ;;  %v3594_v42 = vld [vmem:[%s5830_s9 + $0x2a0] sm:$0xff] }
 0x4a3   : > { %v3897_v1 = vadd.f32 %v7334_v44, %v3737_v20  ;;  %v3739_v61 = vld [vmem:[%s5824_s25 + $0x2a0] sm:$0xff]  ;;  %4180 = vst [vmem:[%s5830_s9 + $0x268] sm:$0xff] %v4036_v22  ;;  %v4039_v26 = vadd.f32 %v3895_v30, %v3590_v32  ;;  %v3898_v6 = vadd.f32 %v7336_v45, %v3738_v50  ;;  %v3595_v46 = vld [vmem:[%s5830_s9 + $0x2a8] sm:$0xff]  ;;  %v3596_v57 = vld [vmem:[%s5830_s9 + $0x2b0] sm:$0xff] }
 0x4a4   : > { %4181 = vst [vmem:[%s5830_s9 + $0x270] sm:$0xff] %v4037_v11  ;;  %v4040_v4 = vadd.f32 %v3896_v17, %v3591_v0  ;;  %v3899_v41 = vadd.f32 %v7332_v25, %v3739_v61  ;;  %v3740_v29 = vld [vmem:[%s5824_s25 + $0x2a8] sm:$0xff]  ;;  %4182 = vst [vmem:[%s5830_s9 + $0x278] sm:$0xff] %v4038_v3  ;;  %v3741_v23 = vld [vmem:[%s5824_s25 + $0x2b0] sm:$0xff] }
 0x4a5   : > { %v4041_v36 = vadd.f32 %v3897_v1, %v3592_v51  ;;  %v3900_v37 = vadd.f32 %v7334_v44, %v3740_v29  ;;  %v3597_v34 = vld [vmem:[%s5830_s9 + $0x2b8] sm:$0xff]  ;;  %4183 = vst [vmem:[%s5830_s9 + $0x280] sm:$0xff] %v4039_v26  ;;  %v4042_v47 = vadd.f32 %v3898_v6, %v3593_v39  ;;  %v3901_v33 = vadd.f32 %v7336_v45, %v3741_v23  ;;  %v3598_v56 = vld [vmem:[%s5830_s9 + $0x2c0] sm:$0xff]  ;;  %v3599_v10 = vld [vmem:[%s5830_s9 + $0x2c8] sm:$0xff] }
 0x4a6   : > { %v3742_v15 = vld [vmem:[%s5824_s25 + $0x2b8] sm:$0xff]  ;;  %4184 = vst [vmem:[%s5830_s9 + $0x288] sm:$0xff] %v4040_v4  ;;  %v4043_v5 = vadd.f32 %v3899_v41, %v3594_v42  ;;  %v3743_v35 = vld [vmem:[%s5824_s25 + $0x2c0] sm:$0xff]  ;;  %v3744_v18 = vld [vmem:[%s5824_s25 + $0x2c8] sm:$0xff] }
 0x4a7   : > { %v3902_v55 = vadd.f32 %v7332_v25, %v3742_v15  ;;  %4185 = vst [vmem:[%s5830_s9 + $0x290] sm:$0xff] %v4041_v36  ;;  %v4044_v63 = vadd.f32 %v3900_v37, %v3595_v46  ;;  %v3903_v58 = vadd.f32 %v7334_v44, %v3743_v35  ;;  %v3600_v48 = vld [vmem:[%s5830_s9 + $0x2d0] sm:$0xff]  ;;  %4186 = vst [vmem:[%s5830_s9 + $0x298] sm:$0xff] %v4042_v47  ;;  %v3601_v62 = vld [vmem:[%s5830_s9 + $0x2d8] sm:$0xff] }
 0x4a8   : > { %v3745_v49 = vld [vmem:[%s5824_s25 + $0x2d0] sm:$0xff]  ;;  %4187 = vst [vmem:[%s5830_s9 + $0x2a0] sm:$0xff] %v4043_v5  ;;  %v4045_v8 = vadd.f32 %v3901_v33, %v3596_v57  ;;  %v3904_v52 = vadd.f32 %v7336_v45, %v3744_v18  ;;  %v3746_v38 = vld [vmem:[%s5824_s25 + $0x2d8] sm:$0xff]  ;;  %v3602_v43 = vld [vmem:[%s5830_s9 + $0x2e0] sm:$0xff] }
 0x4a9   : > { %v4046_v40 = vadd.f32 %v3902_v55, %v3597_v34  ;;  %v3905_v60 = vadd.f32 %v7332_v25, %v3745_v49  ;;  %4188 = vst [vmem:[%s5830_s9 + $0x2a8] sm:$0xff] %v4044_v63  ;;  %v4047_v27 = vadd.f32 %v3903_v58, %v3598_v56  ;;  %v3906_v12 = vadd.f32 %v7334_v44, %v3746_v38  ;;  %v3747_v7 = vld [vmem:[%s5824_s25 + $0x2e0] sm:$0xff]  ;;  %v3603_v59 = vld [vmem:[%s5830_s9 + $0x2e8] sm:$0xff]  ;;  %v3604_v53 = vld [vmem:[%s5830_s9 + $0x2f0] sm:$0xff] }
 0x4aa   : > { %v3748_v16 = vld [vmem:[%s5824_s25 + $0x2e8] sm:$0xff]  ;;  %4189 = vst [vmem:[%s5830_s9 + $0x2b0] sm:$0xff] %v4045_v8  ;;  %v4048_v54 = vadd.f32 %v3904_v52, %v3599_v10  ;;  %v3907_v9 = vadd.f32 %v7336_v45, %v3747_v7  ;;  %v3749_v14 = vld [vmem:[%s5824_s25 + $0x2f0] sm:$0xff]  ;;  %v3605_v13 = vld [vmem:[%s5830_s9 + $0x2f8] sm:$0xff] }
 0x4ab   : > { %4190 = vst [vmem:[%s5830_s9 + $0x2b8] sm:$0xff] %v4046_v40  ;;  %v4049_v19 = vadd.f32 %v3905_v60, %v3600_v48  ;;  %v3908_v28 = vadd.f32 %v7332_v25, %v3748_v16  ;;  %4191 = vst [vmem:[%s5830_s9 + $0x2c0] sm:$0xff] %v4047_v27  ;;  %v4050_v32 = vadd.f32 %v3906_v12, %v3601_v62  ;;  %v3750_v24 = vld [vmem:[%s5824_s25 + $0x2f8] sm:$0xff]  ;;  %v3606_v21 = vld [vmem:[%s5830_s9 + $0x300] sm:$0xff] }
 0x4ac   : > { %v3909_v2 = vadd.f32 %v7334_v44, %v3749_v14  ;;  %v3751_v0 = vld [vmem:[%s5824_s25 + $0x300] sm:$0xff]  ;;  %4192 = vst [vmem:[%s5830_s9 + $0x2c8] sm:$0xff] %v4048_v54  ;;  %v4051_v31 = vadd.f32 %v3907_v9, %v3602_v43  ;;  %v3910_v11 = vadd.f32 %v7336_v45, %v3750_v24  ;;  %v3607_v17 = vld [vmem:[%s5830_s9 + $0x308] sm:$0xff]  ;;  %v3608_v20 = vld [vmem:[%s5830_s9 + $0x310] sm:$0xff] }
 0x4ad   : > { %4193 = vst [vmem:[%s5830_s9 + $0x2d0] sm:$0xff] %v4049_v19  ;;  %v4052_v22 = vadd.f32 %v3908_v28, %v3603_v59  ;;  %v3911_v30 = vadd.f32 %v7332_v25, %v3751_v0  ;;  %v3752_v51 = vld [vmem:[%s5824_s25 + $0x308] sm:$0xff]  ;;  %4194 = vst [vmem:[%s5830_s9 + $0x2d8] sm:$0xff] %v4050_v32  ;;  %v3753_v1 = vld [vmem:[%s5824_s25 + $0x310] sm:$0xff] }
 0x4ae   : > { %v4053_v39 = vadd.f32 %v3909_v2, %v3604_v53  ;;  %v3912_v3 = vadd.f32 %v7334_v44, %v3752_v51  ;;  %v3609_v50 = vld [vmem:[%s5830_s9 + $0x318] sm:$0xff]  ;;  %4195 = vst [vmem:[%s5830_s9 + $0x2e0] sm:$0xff] %v4051_v31  ;;  %v4054_v61 = vadd.f32 %v3910_v11, %v3605_v13  ;;  %v3913_v4 = vadd.f32 %v7336_v45, %v3753_v1  ;;  %v3610_v41 = vld [vmem:[%s5830_s9 + $0x320] sm:$0xff]  ;;  %v3611_v29 = vld [vmem:[%s5830_s9 + $0x328] sm:$0xff] }
 0x4af   : > { %v3754_v42 = vld [vmem:[%s5824_s25 + $0x318] sm:$0xff]  ;;  %4196 = vst [vmem:[%s5830_s9 + $0x2e8] sm:$0xff] %v4052_v22  ;;  %v4055_v26 = vadd.f32 %v3911_v30, %v3606_v21  ;;  %v3755_v46 = vld [vmem:[%s5824_s25 + $0x320] sm:$0xff]  ;;  %v3756_v37 = vld [vmem:[%s5824_s25 + $0x328] sm:$0xff] }
 0x4b0   : > { %v3914_v6 = vadd.f32 %v7332_v25, %v3754_v42  ;;  %4197 = vst [vmem:[%s5830_s9 + $0x2f0] sm:$0xff] %v4053_v39  ;;  %v4056_v57 = vadd.f32 %v3912_v3, %v3607_v17  ;;  %v3915_v36 = vadd.f32 %v7334_v44, %v3755_v46  ;;  %v3612_v23 = vld [vmem:[%s5830_s9 + $0x330] sm:$0xff]  ;;  %4198 = vst [vmem:[%s5830_s9 + $0x2f8] sm:$0xff] %v4054_v61  ;;  %v3613_v55 = vld [vmem:[%s5830_s9 + $0x338] sm:$0xff] }
 0x4b1   : > { %v3757_v34 = vld [vmem:[%s5824_s25 + $0x330] sm:$0xff]  ;;  %4199 = vst [vmem:[%s5830_s9 + $0x300] sm:$0xff] %v4055_v26  ;;  %v4057_v15 = vadd.f32 %v3913_v4, %v3608_v20  ;;  %v3916_v5 = vadd.f32 %v7336_v45, %v3756_v37  ;;  %v3758_v56 = vld [vmem:[%s5824_s25 + $0x338] sm:$0xff]  ;;  %v3614_v35 = vld [vmem:[%s5830_s9 + $0x340] sm:$0xff] }
 0x4b2   : > { %v4058_v47 = vadd.f32 %v3914_v6, %v3609_v50  ;;  %v3917_v33 = vadd.f32 %v7332_v25, %v3757_v34  ;;  %4200 = vst [vmem:[%s5830_s9 + $0x308] sm:$0xff] %v4056_v57  ;;  %v4059_v10 = vadd.f32 %v3915_v36, %v3610_v41  ;;  %v3918_v63 = vadd.f32 %v7334_v44, %v3758_v56  ;;  %v3759_v58 = vld [vmem:[%s5824_s25 + $0x340] sm:$0xff]  ;;  %v3615_v18 = vld [vmem:[%s5830_s9 + $0x348] sm:$0xff]  ;;  %v3616_v60 = vld [vmem:[%s5830_s9 + $0x350] sm:$0xff] }
 0x4b3   : > { %v3760_v48 = vld [vmem:[%s5824_s25 + $0x348] sm:$0xff]  ;;  %4201 = vst [vmem:[%s5830_s9 + $0x310] sm:$0xff] %v4057_v15  ;;  %v4060_v49 = vadd.f32 %v3916_v5, %v3611_v29  ;;  %v3919_v40 = vadd.f32 %v7336_v45, %v3759_v58  ;;  %v3761_v62 = vld [vmem:[%s5824_s25 + $0x350] sm:$0xff]  ;;  %v3617_v38 = vld [vmem:[%s5830_s9 + $0x358] sm:$0xff] }
 0x4b4   : > { %4202 = vst [vmem:[%s5830_s9 + $0x318] sm:$0xff] %v4058_v47  ;;  %v4061_v8 = vadd.f32 %v3917_v33, %v3612_v23  ;;  %v3920_v52 = vadd.f32 %v7332_v25, %v3760_v48  ;;  %4203 = vst [vmem:[%s5830_s9 + $0x320] sm:$0xff] %v4059_v10  ;;  %v4062_v43 = vadd.f32 %v3918_v63, %v3613_v55  ;;  %v3762_v12 = vld [vmem:[%s5824_s25 + $0x358] sm:$0xff]  ;;  %v3618_v7 = vld [vmem:[%s5830_s9 + $0x360] sm:$0xff] }
 0x4b5   : > { %v3921_v27 = vadd.f32 %v7334_v44, %v3761_v62  ;;  %v3763_v59 = vld [vmem:[%s5824_s25 + $0x360] sm:$0xff]  ;;  %4204 = vst [vmem:[%s5830_s9 + $0x328] sm:$0xff] %v4060_v49  ;;  %v4063_v16 = vadd.f32 %v3919_v40, %v3614_v35  ;;  %v3922_v19 = vadd.f32 %v7336_v45, %v3762_v12  ;;  %v3619_v28 = vld [vmem:[%s5830_s9 + $0x368] sm:$0xff]  ;;  %v3620_v14 = vld [vmem:[%s5830_s9 + $0x370] sm:$0xff] }
 0x4b6   : > { %4205 = vst [vmem:[%s5830_s9 + $0x330] sm:$0xff] %v4061_v8  ;;  %v4064_v54 = vadd.f32 %v3920_v52, %v3615_v18  ;;  %v3923_v9 = vadd.f32 %v7332_v25, %v3763_v59  ;;  %v3764_v53 = vld [vmem:[%s5824_s25 + $0x368] sm:$0xff]  ;;  %4206 = vst [vmem:[%s5830_s9 + $0x338] sm:$0xff] %v4062_v43  ;;  %v3765_v2 = vld [vmem:[%s5824_s25 + $0x370] sm:$0xff] }
 0x4b7   : > { %v4065_v13 = vadd.f32 %v3921_v27, %v3616_v60  ;;  %v3924_v32 = vadd.f32 %v7334_v44, %v3764_v53  ;;  %v3621_v24 = vld [vmem:[%s5830_s9 + $0x378] sm:$0xff]  ;;  %4207 = vst [vmem:[%s5830_s9 + $0x340] sm:$0xff] %v4063_v16  ;;  %v4066_v0 = vadd.f32 %v3922_v19, %v3617_v38  ;;  %v3925_v22 = vadd.f32 %v7336_v45, %v3765_v2  ;;  %v3622_v30 = vld [vmem:[%s5830_s9 + $0x380] sm:$0xff]  ;;  %v3623_v51 = vld [vmem:[%s5830_s9 + $0x388] sm:$0xff] }
 0x4b8   : > { %v3766_v21 = vld [vmem:[%s5824_s25 + $0x378] sm:$0xff]  ;;  %4208 = vst [vmem:[%s5830_s9 + $0x348] sm:$0xff] %v4064_v54  ;;  %v4067_v31 = vadd.f32 %v3923_v9, %v3618_v7  ;;  %v3767_v17 = vld [vmem:[%s5824_s25 + $0x380] sm:$0xff]  ;;  %v3768_v3 = vld [vmem:[%s5824_s25 + $0x388] sm:$0xff] }
 0x4b9   : > { %v3926_v11 = vadd.f32 %v7332_v25, %v3766_v21  ;;  %4209 = vst [vmem:[%s5830_s9 + $0x350] sm:$0xff] %v4065_v13  ;;  %v4068_v20 = vadd.f32 %v3924_v32, %v3619_v28  ;;  %v3927_v39 = vadd.f32 %v7334_v44, %v3767_v17  ;;  %v3624_v1 = vld [vmem:[%s5830_s9 + $0x390] sm:$0xff]  ;;  %4210 = vst [vmem:[%s5830_s9 + $0x358] sm:$0xff] %v4066_v0  ;;  %v3625_v6 = vld [vmem:[%s5830_s9 + $0x398] sm:$0xff] }
 0x4ba   : > { %v3769_v50 = vld [vmem:[%s5824_s25 + $0x390] sm:$0xff]  ;;  %4211 = vst [vmem:[%s5830_s9 + $0x360] sm:$0xff] %v4067_v31  ;;  %v4069_v42 = vadd.f32 %v3925_v22, %v3620_v14  ;;  %v3928_v26 = vadd.f32 %v7336_v45, %v3768_v3  ;;  %v3770_v41 = vld [vmem:[%s5824_s25 + $0x398] sm:$0xff]  ;;  %v3626_v46 = vld [vmem:[%s5830_s9 + $0x3a0] sm:$0xff] }
 0x4bb   : > { %v4070_v61 = vadd.f32 %v3926_v11, %v3621_v24  ;;  %v3929_v4 = vadd.f32 %v7332_v25, %v3769_v50  ;;  %4212 = vst [vmem:[%s5830_s9 + $0x368] sm:$0xff] %v4068_v20  ;;  %v4071_v29 = vadd.f32 %v3927_v39, %v3622_v30  ;;  %v3930_v57 = vadd.f32 %v7334_v44, %v3770_v41  ;;  %v3771_v36 = vld [vmem:[%s5824_s25 + $0x3a0] sm:$0xff]  ;;  %v3627_v37 = vld [vmem:[%s5830_s9 + $0x3a8] sm:$0xff]  ;;  %v3628_v33 = vld [vmem:[%s5830_s9 + $0x3b0] sm:$0xff] }
 0x4bc   : > { %v3772_v23 = vld [vmem:[%s5824_s25 + $0x3a8] sm:$0xff]  ;;  %4213 = vst [vmem:[%s5830_s9 + $0x370] sm:$0xff] %v4069_v42  ;;  %v4072_v34 = vadd.f32 %v3928_v26, %v3623_v51  ;;  %v3931_v47 = vadd.f32 %v7336_v45, %v3771_v36  ;;  %v3773_v55 = vld [vmem:[%s5824_s25 + $0x3b0] sm:$0xff]  ;;  %v3629_v56 = vld [vmem:[%s5830_s9 + $0x3b8] sm:$0xff] }
 0x4bd   : > { %4214 = vst [vmem:[%s5830_s9 + $0x378] sm:$0xff] %v4070_v61  ;;  %v4073_v15 = vadd.f32 %v3929_v4, %v3624_v1  ;;  %v3932_v5 = vadd.f32 %v7332_v25, %v3772_v23  ;;  %4215 = vst [vmem:[%s5830_s9 + $0x380] sm:$0xff] %v4071_v29  ;;  %v4074_v35 = vadd.f32 %v3930_v57, %v3625_v6  ;;  %v3774_v63 = vld [vmem:[%s5824_s25 + $0x3b8] sm:$0xff]  ;;  %v3630_v58 = vld [vmem:[%s5830_s9 + $0x3c0] sm:$0xff] }
 0x4be   : > { %v3933_v10 = vadd.f32 %v7334_v44, %v3773_v55  ;;  %v3775_v18 = vld [vmem:[%s5824_s25 + $0x3c0] sm:$0xff]  ;;  %4216 = vst [vmem:[%s5830_s9 + $0x388] sm:$0xff] %v4072_v34  ;;  %v4075_v48 = vadd.f32 %v3931_v47, %v3626_v46  ;;  %v3934_v8 = vadd.f32 %v7336_v45, %v3774_v63  ;;  %v3631_v52 = vld [vmem:[%s5830_s9 + $0x3c8] sm:$0xff]  ;;  %v3632_v62 = vld [vmem:[%s5830_s9 + $0x3d0] sm:$0xff] }
 0x4bf   : > { %4217 = vst [vmem:[%s5830_s9 + $0x390] sm:$0xff] %v4073_v15  ;;  %v4076_v49 = vadd.f32 %v3932_v5, %v3627_v37  ;;  %v3935_v40 = vadd.f32 %v7332_v25, %v3775_v18  ;;  %v3776_v60 = vld [vmem:[%s5824_s25 + $0x3c8] sm:$0xff]  ;;  %4218 = vst [vmem:[%s5830_s9 + $0x398] sm:$0xff] %v4074_v35  ;;  %v3777_v27 = vld [vmem:[%s5824_s25 + $0x3d0] sm:$0xff] }
 0x4c0   : > { %v4077_v38 = vadd.f32 %v3933_v10, %v3628_v33  ;;  %v3936_v43 = vadd.f32 %v7334_v44, %v3776_v60  ;;  %v3633_v12 = vld [vmem:[%s5830_s9 + $0x3d8] sm:$0xff]  ;;  %4219 = vst [vmem:[%s5830_s9 + $0x3a0] sm:$0xff] %v4075_v48  ;;  %v4078_v59 = vadd.f32 %v3934_v8, %v3629_v56  ;;  %v3937_v54 = vadd.f32 %v7336_v45, %v3777_v27  ;;  %v3634_v9 = vld [vmem:[%s5830_s9 + $0x3e0] sm:$0xff]  ;;  %v3635_v53 = vld [vmem:[%s5830_s9 + $0x3e8] sm:$0xff] }
 0x4c1   : > { %v3778_v7 = vld [vmem:[%s5824_s25 + $0x3d8] sm:$0xff]  ;;  %4220 = vst [vmem:[%s5830_s9 + $0x3a8] sm:$0xff] %v4076_v49  ;;  %v4079_v16 = vadd.f32 %v3935_v40, %v3630_v58  ;;  %v3779_v28 = vld [vmem:[%s5824_s25 + $0x3e0] sm:$0xff]  ;;  %v3780_v32 = vld [vmem:[%s5824_s25 + $0x3e8] sm:$0xff] }
 0x4c2   : > { %v3938_v19 = vadd.f32 %v7332_v25, %v3778_v7  ;;  %4221 = vst [vmem:[%s5830_s9 + $0x3b0] sm:$0xff] %v4077_v38  ;;  %v4080_v14 = vadd.f32 %v3936_v43, %v3631_v52  ;;  %v3939_v13 = vadd.f32 %v7334_v44, %v3779_v28  ;;  %v3636_v2 = vld [vmem:[%s5830_s9 + $0x3f0] sm:$0xff]  ;;  %4222 = vst [vmem:[%s5830_s9 + $0x3b8] sm:$0xff] %v4078_v59  ;;  %v3637_v11 = vld [vmem:[%s5830_s9 + $0x3f8] sm:$0xff] }
 0x4c3   : > { %v3781_v24 = vld [vmem:[%s5824_s25 + $0x3f0] sm:$0xff]  ;;  %4223 = vst [vmem:[%s5830_s9 + $0x3c0] sm:$0xff] %v4079_v16  ;;  %v4081_v21 = vadd.f32 %v3937_v54, %v3632_v62  ;;  %v3940_v31 = vadd.f32 %v7336_v45, %v3780_v32  ;;  %v3782_v30 = vld [vmem:[%s5824_s25 + $0x3f8] sm:$0xff]  ;;  %v3638_v17 = vld [vmem:[%s5830_s9 + $0x400] sm:$0xff] }
 0x4c4   : > { %v4082_v0 = vadd.f32 %v3938_v19, %v3633_v12  ;;  %v3941_v22 = vadd.f32 %v7332_v25, %v3781_v24  ;;  %4224 = vst [vmem:[%s5830_s9 + $0x3c8] sm:$0xff] %v4080_v14  ;;  %v4083_v51 = vadd.f32 %v3939_v13, %v3634_v9  ;;  %v3942_v20 = vadd.f32 %v7334_v44, %v3782_v30  ;;  %v3783_v39 = vld [vmem:[%s5824_s25 + $0x400] sm:$0xff]  ;;  %v3639_v3 = vld [vmem:[%s5830_s9 + $0x408] sm:$0xff]  ;;  %v3640_v4 = vld [vmem:[%s5830_s9 + $0x410] sm:$0xff] }
 0x4c5   : > { %v3784_v1 = vld [vmem:[%s5824_s25 + $0x408] sm:$0xff]  ;;  %4225 = vst [vmem:[%s5830_s9 + $0x3d0] sm:$0xff] %v4081_v21  ;;  %v4084_v50 = vadd.f32 %v3940_v31, %v3635_v53  ;;  %v3943_v61 = vadd.f32 %v7336_v45, %v3783_v39  ;;  %v3785_v6 = vld [vmem:[%s5824_s25 + $0x410] sm:$0xff]  ;;  %v3641_v41 = vld [vmem:[%s5830_s9 + $0x418] sm:$0xff] }
 0x4c6   : > { %4226 = vst [vmem:[%s5830_s9 + $0x3d8] sm:$0xff] %v4082_v0  ;;  %v4085_v42 = vadd.f32 %v3941_v22, %v3636_v2  ;;  %v3944_v26 = vadd.f32 %v7332_v25, %v3784_v1  ;;  %4227 = vst [vmem:[%s5830_s9 + $0x3e0] sm:$0xff] %v4083_v51  ;;  %v4086_v46 = vadd.f32 %v3942_v20, %v3637_v11  ;;  %v3786_v57 = vld [vmem:[%s5824_s25 + $0x418] sm:$0xff]  ;;  %v3642_v36 = vld [vmem:[%s5830_s9 + $0x420] sm:$0xff] }
 0x4c7   : > { %v3945_v29 = vadd.f32 %v7334_v44, %v3785_v6  ;;  %v3787_v37 = vld [vmem:[%s5824_s25 + $0x420] sm:$0xff]  ;;  %4228 = vst [vmem:[%s5830_s9 + $0x3e8] sm:$0xff] %v4084_v50  ;;  %v4087_v23 = vadd.f32 %v3943_v61, %v3638_v17  ;;  %v3946_v15 = vadd.f32 %v7336_v45, %v3786_v57  ;;  %v3643_v5 = vld [vmem:[%s5830_s9 + $0x428] sm:$0xff]  ;;  %v3644_v55 = vld [vmem:[%s5830_s9 + $0x430] sm:$0xff] }
 0x4c8   : > { %4229 = vst [vmem:[%s5830_s9 + $0x3f0] sm:$0xff] %v4085_v42  ;;  %v4088_v34 = vadd.f32 %v3944_v26, %v3639_v3  ;;  %v3947_v47 = vadd.f32 %v7332_v25, %v3787_v37  ;;  %v3788_v33 = vld [vmem:[%s5824_s25 + $0x428] sm:$0xff]  ;;  %4230 = vst [vmem:[%s5830_s9 + $0x3f8] sm:$0xff] %v4086_v46  ;;  %v3789_v10 = vld [vmem:[%s5824_s25 + $0x430] sm:$0xff] }
 0x4c9   : > { %v4089_v56 = vadd.f32 %v3945_v29, %v3640_v4  ;;  %v3948_v35 = vadd.f32 %v7334_v44, %v3788_v33  ;;  %v3645_v63 = vld [vmem:[%s5830_s9 + $0x438] sm:$0xff]  ;;  %4231 = vst [vmem:[%s5830_s9 + $0x400] sm:$0xff] %v4087_v23  ;;  %v4090_v18 = vadd.f32 %v3946_v15, %v3641_v41  ;;  %v3949_v49 = vadd.f32 %v7336_v45, %v3789_v10  ;;  %v3646_v40 = vld [vmem:[%s5830_s9 + $0x440] sm:$0xff]  ;;  %v3647_v60 = vld [vmem:[%s5830_s9 + $0x448] sm:$0xff] }
 0x4ca   : > { %v3790_v58 = vld [vmem:[%s5824_s25 + $0x438] sm:$0xff]  ;;  %4232 = vst [vmem:[%s5830_s9 + $0x408] sm:$0xff] %v4088_v34  ;;  %v4091_v48 = vadd.f32 %v3947_v47, %v3642_v36  ;;  %v3791_v52 = vld [vmem:[%s5824_s25 + $0x440] sm:$0xff]  ;;  %v3792_v43 = vld [vmem:[%s5824_s25 + $0x448] sm:$0xff] }
 0x4cb   : > { %v3950_v8 = vadd.f32 %v7332_v25, %v3790_v58  ;;  %4233 = vst [vmem:[%s5830_s9 + $0x410] sm:$0xff] %v4089_v56  ;;  %v4092_v62 = vadd.f32 %v3948_v35, %v3643_v5  ;;  %v3951_v38 = vadd.f32 %v7334_v44, %v3791_v52  ;;  %v3648_v27 = vld [vmem:[%s5830_s9 + $0x450] sm:$0xff]  ;;  %4234 = vst [vmem:[%s5830_s9 + $0x418] sm:$0xff] %v4090_v18  ;;  %v3649_v19 = vld [vmem:[%s5830_s9 + $0x458] sm:$0xff] }
 0x4cc   : > { %v3793_v12 = vld [vmem:[%s5824_s25 + $0x450] sm:$0xff]  ;;  %4235 = vst [vmem:[%s5830_s9 + $0x420] sm:$0xff] %v4091_v48  ;;  %v4093_v7 = vadd.f32 %v3949_v49, %v3644_v55  ;;  %v3952_v16 = vadd.f32 %v7336_v45, %v3792_v43  ;;  %v3794_v9 = vld [vmem:[%s5824_s25 + $0x458] sm:$0xff]  ;;  %v3650_v28 = vld [vmem:[%s5830_s9 + $0x460] sm:$0xff] }
 0x4cd   : > { %v4094_v59 = vadd.f32 %v3950_v8, %v3645_v63  ;;  %v3953_v54 = vadd.f32 %v7332_v25, %v3793_v12  ;;  %4236 = vst [vmem:[%s5830_s9 + $0x428] sm:$0xff] %v4092_v62  ;;  %v4095_v53 = vadd.f32 %v3951_v38, %v3646_v40  ;;  %v3954_v14 = vadd.f32 %v7334_v44, %v3794_v9  ;;  %v3795_v13 = vld [vmem:[%s5824_s25 + $0x460] sm:$0xff]  ;;  %v3651_v32 = vld [vmem:[%s5830_s9 + $0x468] sm:$0xff]  ;;  %v3652_v22 = vld [vmem:[%s5830_s9 + $0x470] sm:$0xff] }
 0x4ce   : > { %v3796_v2 = vld [vmem:[%s5824_s25 + $0x468] sm:$0xff]  ;;  %4237 = vst [vmem:[%s5830_s9 + $0x430] sm:$0xff] %v4093_v7  ;;  %v4096_v24 = vadd.f32 %v3952_v16, %v3647_v60  ;;  %v3955_v0 = vadd.f32 %v7336_v45, %v3795_v13  ;;  %v3797_v11 = vld [vmem:[%s5824_s25 + $0x470] sm:$0xff]  ;;  %v3653_v51 = vld [vmem:[%s5830_s9 + $0x478] sm:$0xff] }
 0x4cf   : > { %4238 = vst [vmem:[%s5830_s9 + $0x438] sm:$0xff] %v4094_v59  ;;  %v4097_v21 = vadd.f32 %v3953_v54, %v3648_v27  ;;  %v3956_v31 = vadd.f32 %v7332_v25, %v3796_v2  ;;  %4239 = vst [vmem:[%s5830_s9 + $0x440] sm:$0xff] %v4095_v53  ;;  %v4098_v30 = vadd.f32 %v3954_v14, %v3649_v19  ;;  %v3798_v20 = vld [vmem:[%s5824_s25 + $0x478] sm:$0xff] }
 0x4d0   : > { %v3957_v17 = vadd.f32 %v7334_v44, %v3797_v11  ;;  %4240 = vst [vmem:[%s5830_s9 + $0x448] sm:$0xff] %v4096_v24  ;;  %v4099_v39 = vadd.f32 %v3955_v0, %v3650_v28  ;;  %v3958_v1 = vadd.f32 %v7336_v45, %v3798_v20 }
 0x4d1   : > { %4241 = vst [vmem:[%s5830_s9 + $0x450] sm:$0xff] %v4097_v21  ;;  %v4100_v3 = vadd.f32 %v3956_v31, %v3651_v32  ;;  %4242 = vst [vmem:[%s5830_s9 + $0x458] sm:$0xff] %v4098_v30 }
 0x4d2   : > { %v4101_v50 = vadd.f32 %v3957_v17, %v3652_v22  ;;  %4243 = vst [vmem:[%s5830_s9 + $0x460] sm:$0xff] %v4099_v39  ;;  %v4102_v25 = vadd.f32 %v3958_v1, %v3653_v51 }
 0x4d3   : > { %4244 = vst [vmem:[%s5830_s9 + $0x468] sm:$0xff] %v4100_v3 }
 0x4d4   : > { %4245 = vst [vmem:[%s5830_s9 + $0x470] sm:$0xff] %v4101_v50  ;;  %4246 = vst [vmem:[%s5830_s9 + $0x478] sm:$0xff] %v4102_v25 }
 0x4d5 PF: > { %s8052_s20 = sld [smem:[#allocation19_spill]]  ;;  %s4264_s30 = sshll.u32 %s5830_s9, 4  ;;  %s7912_s30 = int_to_ptr.vmem [resolvable:$true] %s4264_s30 }
 0x4d6   : > { %s8053_s26 = sld [smem:[#allocation29_spill]]  ;;  %s4248_s1 = scalar_lea.sflag [#allocation4], %s5813_s7 }
 0x4d7   : > { %s5256_s3 = scalar_lea.vmem %s7912_s30, 18432  ;;  %p8055_p0 = scmp.ne.s32.totalorder %s8040_s8, 0 }
 0x4d8   : > { %p5257_p10 = scmp.ne.s32.totalorder %s7912_s30, %s5256_s3  ;;  %s5427_s29 = smov [#allocation10]  }
 0x4d9   : > { %s5260_s12 = sshll.u32 %s5427_s29, 4  ;;  %s5261_s12 = int_to_ptr.vmem [resolvable:$false] %s5260_s12 }
 0x4da   : > { %p5258_p1 = pnand %p5257_p10, %p8055_p0  ;;  %s5262_s24 = scalar_lea.vmem %s5261_s12, 36864 }
 0x4db   : > { %s4446_s5 = smul.u32 384, %s8052_s20  ;;  %p5263_p11 = scmp.lt.s32.totalorder %s7912_s30, %s5261_s12 }
 0x4dc   : > { %s8054_s6 = smov %s8053_s26  ;;  %p5259_p4 = pneg %p5258_p1 }
 0x4dd   : > { %s7910_s11 = scalar_lea.hbm %s8053_s26, %s4446_s5  ;;  %p5264_p7 = scmp.lt.s32.totalorder %s5262_s24, %s5256_s3 }
 0x4df   : > { %p5265_p2 = por %p5264_p7, %p5263_p11 }
 0x4e1   : > { %p5266_p8 = pnand %p5265_p2, %p5259_p4 }
 0x4e3   : > { %5269 = shalt.err (!%p5266_p8)
}
 0x4e4   : > { %s5270_s10 = scalar_lea.hbm %s7910_s11, 18432  ;;  %s5274_s9 = scalar_lea.hbm %s8054_s6, 36864 }
 0x4e5   : > { %p5271_p9 = scmp.ne.s32.totalorder %s7910_s11, %s5270_s10  ;;  %p5275_p3 = scmp.lt.u32.totalorder %s7910_s11, %s8054_s6 }
 0x4e6   : > { %p5276_p6 = scmp.lt.u32.totalorder %s5274_s9, %s5270_s10  ;;  %p5278_p10 = scmp.lt.u32.totalorder %s5270_s10, %s7910_s11 }
 0x4e7   : > { %p5272_p12 = pnand %p5271_p9, %p8055_p0 }
 0x4e8   : > { %p5277_p13 = por %p5276_p6, %p5275_p3 }
 0x4e9   : > { %p5273_p5 = pneg %p5272_p12 }
 0x4ea   : > { %p5279_p1 = por %p5278_p10, %p5277_p13 }
 0x4ec   : > { %p5280_p4 = pnand %p5279_p1, %p5273_p5 }
 0x4ee   : > { %5283 = shalt.err (!%p5280_p4)
}
 0x4ef   : > { %s5428_s20 = smov 384   ;;  %s5429_s5 = smov 768  }
 0x4f0   : > { %s5430_s14 = smov 24  }
 0x4f1   : > { %4992 = dma.vmem_to_hbm [thread:$0]  (%p8055_p0), %s7912_s30, 18432, %s7910_s11, %s4248_s1, %s5428_s20, %s5429_s5, %s5430_s14  }
 0x4f2 PF: > { %p5013_p11 = scmp.ge.s32.totalorder %s5414_s28, 2  ;;  %s4279_s23 = sand.u32 1, %s5362_s15  }
 0x4f3   : > { %p8056_p7 = scmp.ne.s32.totalorder %s8041_s18, 0  ;;  %s4280_s26 = scalar_lea.sflag [#allocation4], %s4279_s23 }
 0x4f5   : > { %p5008_p2 = pnand %p5013_p11, %p8056_p7 }
 0x4f7   : > { %5357 = dma.done.wait (!%p5008_p2), %s4280_s26, 18432  }
 0x4f8   : > { %5359 = vsyncadd (!%p5008_p2), %s4280_s26, 4294948864  ;;  %s26_s28 = sadd.s32 1, %s5414_s28   ;;  %s8058_s8 = sld [smem:[#allocation25_spill]] }
 0x4f9   : > { %p7943_p8 = scmp.ge.s32.totalorder %s26_s28, 10   ;;  %s8059_s7 = sld [smem:[#allocation16_spill]] }
 0x4fa   : > { %s8060_s20 = sld [smem:[#allocation23_spill]]  ;;  %s8061_s30 = sld [smem:[#allocation17_spill]] }
 0x4fb   : > { %s8062_s23 = sld [smem:[#allocation24_spill]]  ;;  %s8063_s24 = sld [smem:[#allocation20_spill]] }
 0x4fc   : > { %s8064_s26 = sld [smem:[#allocation21_spill]]  ;;  %s8065_s11 = sld [smem:[#allocation22_spill]] }
 0x4fd   : > { %s8066_s15 = smov %s5366_s16  ;;  %s8067_s16 = smov %s5370_s17 }
 0x4fe   : > { %s8068_s17 = smov %s8058_s8  ;;  %s8069_s18 = smov %s5378_s19 }
 0x4ff   : > { %s8070_s19 = smov %s8059_s7  ;;  %s8071_s21 = smov %s5390_s22 }
 0x500   : > { %s8072_s22 = smov %s8061_s30  ;;  %s8073_s25 = smov %s5410_s27 }
 0x501   :  { %25 = sbr.rel (!%p7943_p8) target bundleno = 19 (0x13), region = 126 }
 0x502   : > { %s8074_s27 = smov %s8065_s11 }
 0x508   :  { %4285 = vsyncpa [#allocation3], 1 }
 0x509   :  { %4287 = vsyncpa [#allocation3 + $0x1], 1 }
 0x50a   :  { %4288 = vsyncpa [#allocation6], 1 }
 0x50b   :  { %4290 = vsyncpa [#allocation6 + $0x1], 1 }
 0x50c   :  { %4291 = vsyncpa [#allocation9], 1 }
 0x50d   :  { %4293 = vsyncpa [#allocation9 + $0x1], 1 }
 0x50e   :  { %4294 = vsyncpa [#allocation4], 1 }
 0x50f   :  { %4296 = vsyncpa [#allocation4 + $0x1], 1 }

</bundles_post_ra>
